<compile_context>
chip_gen: v5e
topology: v5e:2x2
jax: 0.10.0
libtpu: 0.0.40
codegen_flags: <defaults>
</compile_context>

<pallas_src>
import numpy as np

import jax
import jax.numpy as jnp
from jax import lax
from jax.experimental import pallas as pl
from jax.experimental.pallas import tpu as pltpu


# --------------------------- weight pre-packing ----------------------------

def _band_matrices(w, w_in):
    """w: (OC, C, KH, KW) -> (KH, C*w_in, OC*w_out) banded matrices.

    band[i][c*w_in + (x + j), o*w_out + x] = w[o, c, i, j]
    so (input_row[r+i] @ band[i]) is kernel-row i's contribution to output
    row r for every (o, x).
    """
    oc, cc, kh, kw = w.shape
    w_out = w_in - kw + 1
    band = np.zeros((kh, cc * w_in, oc * w_out), np.float32)
    xs = np.arange(w_out)
    for i in range(kh):
        for o in range(oc):
            for c in range(cc):
                for j in range(kw):
                    band[i, c * w_in + xs + j, o * w_out + xs] = w[o, c, i, j]
    return band


def _pool_col_matrix(w_in, channels):
    """Block-diagonal (channels*w_in, channels*w_in//2) column-pool (0.5)."""
    w_out = w_in // 2
    p = np.zeros((channels * w_in, channels * w_out), np.float32)
    v = np.arange(w_out)
    for c in range(channels):
        p[c * w_in + 2 * v, c * w_out + v] = 0.5
        p[c * w_in + 2 * v + 1, c * w_out + v] = 0.5
    return p


_WEIGHT_ORDER = ("B1", "cb1", "B2", "cb2", "M3", "cb3",
                 "Wf1", "bf1", "Wf2", "bf2")


def prepare_params(params):
    """One-time repacking of PyTorch-layout params into kernel layouts."""
    w1 = np.asarray(params["conv1_w"], np.float32)    # (6, 1, 5, 5)
    b1 = np.asarray(params["conv1_b"], np.float32)
    w2 = np.asarray(params["conv2_w"], np.float32)    # (16, 6, 5, 5)
    b2 = np.asarray(params["conv2_b"], np.float32)
    w3 = np.asarray(params["conv3_w"], np.float32)    # (120, 16, 5, 5)
    b3 = np.asarray(params["conv3_b"], np.float32)
    wf1 = np.asarray(params["fc1_w"], np.float32)     # (84, 120)
    bf1 = np.asarray(params["fc1_b"], np.float32)
    wf2 = np.asarray(params["fc2_w"], np.float32)     # (10, 84)
    bf2 = np.asarray(params["fc2_b"], np.float32)

    band1 = _band_matrices(w1, 32)                    # (5, 32, 168)
    band2 = _band_matrices(w2, 14)                    # (5, 84, 160)
    # conv3 is dense over its 16x5x5 receptive field: per kernel row i,
    # m3[i][c*5 + j, o] = w3[o, c, i, j]
    m3 = np.transpose(w3, (2, 1, 3, 0)).reshape(5, 16 * 5, 120)   # (5, 80, 120)
    pw1 = _pool_col_matrix(28, 6)                     # (168, 84)
    pw2 = _pool_col_matrix(10, 16)                    # (160, 80)

    prep = {
        # conv1: K-concat of the 5 band rows -> one (160, 168) matmul
        "B1":  np.concatenate(list(band1), axis=0),                       # (160, 168)
        "cb1": np.repeat(b1, 28)[None, :],                                # (1, 168)
        # conv2: column-pool of layer-1 folded in, then K-concat -> (840, 160)
        "B2":  np.concatenate([pw1 @ band2[i] for i in range(5)], axis=0),
        "cb2": np.repeat(b2, 10)[None, :],                                # (1, 160)
        # conv3: column-pool of layer-2 folded in, K-concat -> (800, 120)
        "M3":  np.concatenate([pw2 @ m3[i] for i in range(5)], axis=0),
        "cb3": b3[None, :],                                               # (1, 120)
        "Wf1": wf1.T,                                                     # (120, 84)
        "bf1": bf1[None, :],                                              # (1, 84)
        "Wf2": wf2.T,                                                     # (84, 10)
        "bf2": bf2[None, :],                                              # (1, 10)
    }
    return {k: jnp.asarray(v, jnp.float32) for k, v in prep.items()}


# ------------------------------ Pallas kernel -------------------------------

def _lenet5_kernel(x_ref, b1_ref, cb1_ref, b2_ref, cb2_ref, m3_ref, cb3_ref,
                   wf1_ref, bf1_ref, wf2_ref, bf2_ref, out_ref):
    f32 = jnp.float32
    tb = out_ref.shape[0]                       # batch tile (static)

    def mm(a, w_ref):
        """(M, K) @ shared (K, N) -> (M, N), f32 MXU accumulate."""
        return lax.dot_general(a, w_ref[...],
                               dimension_numbers=(((1,), (0,)), ((), ())),
                               preferred_element_type=f32)

    def conv_tanh(act, out_h, w_ref, b_ref):
        """act: (rows*tb, K) h-major slab -> (out_h*tb, N).

        Lane-concat the 5 shifted row windows so the whole conv layer is ONE
        matmul with K = 5*Cin*Win and M = out_h*tb.
        """
        lhs = jnp.concatenate(
            [act[i * tb:(i + out_h) * tb, :] for i in range(5)], axis=-1)
        return jnp.tanh(mm(lhs, w_ref) + b_ref[...])

    def row_pool(act, out_h):
        """Row half of 2x2 avg pool (0.5x); column half folded into weights."""
        return jnp.concatenate(
            [0.5 * (act[(2 * u) * tb:(2 * u + 1) * tb, :]
                    + act[(2 * u + 1) * tb:(2 * u + 2) * tb, :])
             for u in range(out_h)], axis=0)

    # ---- feature extractor (all VMEM-resident) ----
    x = x_ref[0]                                      # (32*tb, 32), h-major
    z1 = conv_tanh(x, 28, b1_ref, cb1_ref)            # (28*tb, 168)
    q1 = row_pool(z1, 14)                             # (14*tb, 168)
    z2 = conv_tanh(q1, 10, b2_ref, cb2_ref)           # (10*tb, 160)
    q2 = row_pool(z2, 5)                              # (5*tb, 160)

    # conv3: 5x5 kernel over a 5x5 map == dense over all remaining rows.
    lhs3 = jnp.concatenate(
        [q2[i * tb:(i + 1) * tb, :] for i in range(5)], axis=-1)  # (tb, 800)
    h = jnp.tanh(mm(lhs3, m3_ref) + cb3_ref[...])     # (tb, 120)

    # ---- classifier ----
    h = jnp.tanh(mm(h, wf1_ref) + bf1_ref[...])       # (tb, 84)
    logits = mm(h, wf2_ref) + bf2_ref[...]            # (tb, 10)

    # exact softmax (rows must sum to 1 tightly)
    m = jnp.max(logits, axis=-1, keepdims=True)
    e = jnp.exp(logits - m)
    out_ref[...] = e / jnp.sum(e, axis=-1, keepdims=True)


# --------------------------------- wrapper ----------------------------------

def _round_up(n, m):
    return ((n + m - 1) // m) * m


def lenet5_forward(prepared, x, *, tile_b=None):
    """x: (B, 1, 32, 32) float32 -> (B, 10) softmax probabilities."""
    b = x.shape[0]
    x = x.reshape(b, 32, 32).astype(jnp.float32)

    if tile_b is None:
        tile_b = min(128, _round_up(b, 8))
    tile_b = max(8, _round_up(int(tile_b), 8))

    pad = (-b) % tile_b
    if pad:
        x = jnp.concatenate([x, jnp.zeros((pad, 32, 32), jnp.float32)], axis=0)
    bp = b + pad
    n_tiles = bp // tile_b

    # Host-side layout: per batch tile, an h-major 2-D slab (32*tile_b, 32)
    # with row index = h*tile_b + local_batch.  Cheap one-time relayout.
    xt = x.transpose(1, 0, 2)                                # (32, bp, 32)
    xt = xt.reshape(32, n_tiles, tile_b, 32).transpose(1, 0, 2, 3)
    xt = xt.reshape(n_tiles, 32 * tile_b, 32)

    weights = [prepared[k] for k in _WEIGHT_ORDER]           # all 2-D
    weight_specs = [pl.BlockSpec(w.shape, lambda i: (0, 0)) for w in weights]

    grid_spec = pltpu.PrefetchScalarGridSpec(
        num_scalar_prefetch=0,
        grid=(n_tiles,),
        in_specs=[pl.BlockSpec((1, 32 * tile_b, 32), lambda i: (i, 0, 0))]
                 + weight_specs,
        out_specs=pl.BlockSpec((tile_b, 10), lambda i: (i, 0)),
    )
    probs = pl.pallas_call(
        _lenet5_kernel,
        out_shape=jax.ShapeDtypeStruct((bp, 10), jnp.float32),
        grid_spec=grid_spec,
        compiler_params=pltpu.CompilerParams(
            dimension_semantics=("parallel",),
            vmem_limit_bytes=48 * 1024 * 1024),
    )(xt, *weights)
    return probs[:b]


# ------------------------ params / reference / main -------------------------

def init_params(key):
    ks = jax.random.split(key, 10)
    s = 0.1

    def nrm(k, shape):
        return (s * jax.random.normal(k, shape)).astype(jnp.float32)

    return {
        "conv1_w": nrm(ks[0], (6, 1, 5, 5)),    "conv1_b": nrm(ks[1], (6,)),
        "conv2_w": nrm(ks[2], (16, 6, 5, 5)),   "conv2_b": nrm(ks[3], (16,)),
        "conv3_w": nrm(ks[4], (120, 16, 5, 5)), "conv3_b": nrm(ks[5], (120,)),
        "fc1_w":   nrm(ks[6], (84, 120)),       "fc1_b":   nrm(ks[7], (84,)),
        "fc2_w":   nrm(ks[8], (10, 84)),        "fc2_b":   nrm(ks[9], (10,)),
    }


def reference_forward(params, x):
    """Plain-JAX (XLA) LeNet-5, used only to validate the Pallas kernel."""
    def conv_tanh(x, w, b):
        y = lax.conv_general_dilated(
            x, w, window_strides=(1, 1), padding="VALID",
            dimension_numbers=("NCHW", "OIHW", "NCHW"))
        return jnp.tanh(y + b[None, :, None, None])

    def avg_pool(x):
        y = lax.reduce_window(x, 0.0, lax.add, (1, 1, 2, 2), (1, 1, 2, 2),
                              "VALID")
        return y * 0.25

    x = avg_pool(conv_tanh(x, params["conv1_w"], params["conv1_b"]))
    x = avg_pool(conv_tanh(x, params["conv2_w"], params["conv2_b"]))
    x = conv_tanh(x, params["conv3_w"], params["conv3_b"])
    x = x.reshape(-1, 120)
    x = jnp.tanh(x @ params["fc1_w"].T + params["fc1_b"])
    logits = x @ params["fc2_w"].T + params["fc2_b"]
    return jax.nn.softmax(logits, axis=1)


if __name__ == "__main__":
    key = jax.random.PRNGKey(0)
    pkey, xkey = jax.random.split(key)
    params = init_params(pkey)
    prepared = prepare_params(params)          # one-time weight repacking

    # LeNet-5 architecture requires 32x32 single-channel input.
    x = jax.random.normal(xkey, (8, 1, 32, 32), dtype=jnp.float32)

    fwd = jax.jit(lambda p, xx: lenet5_forward(p, xx, tile_b=8))
    probs = jax.block_until_ready(fwd(prepared, x))

    assert probs.shape == (8, 10)
    assert bool(jnp.allclose(jnp.sum(probs, axis=1), 1.0, atol=1e-3))

    ref = jax.block_until_ready(jax.jit(reference_forward)(params, x))
    assert bool(jnp.allclose(probs, ref, atol=2e-3, rtol=2e-3))

    print("KERNEL_OK")
</pallas_src>

<mosaic_0001>
module attributes {stable_mosaic.version = 11 : i64} {
  func.func @_lenet5_kernel(%arg0: i32, %arg1: memref<1x256x32xf32, #tpu.memory_space<vmem>>, %arg2: memref<160x168xf32, #tpu.memory_space<vmem>>, %arg3: memref<1x168xf32, #tpu.memory_space<vmem>>, %arg4: memref<840x160xf32, #tpu.memory_space<vmem>>, %arg5: memref<1x160xf32, #tpu.memory_space<vmem>>, %arg6: memref<800x120xf32, #tpu.memory_space<vmem>>, %arg7: memref<1x120xf32, #tpu.memory_space<vmem>>, %arg8: memref<120x84xf32, #tpu.memory_space<vmem>>, %arg9: memref<1x84xf32, #tpu.memory_space<vmem>>, %arg10: memref<84x10xf32, #tpu.memory_space<vmem>>, %arg11: memref<1x10xf32, #tpu.memory_space<vmem>>, %arg12: memref<8x10xf32, #tpu.memory_space<vmem>>) attributes {dimension_semantics = [#tpu.dimension_semantics<parallel>], iteration_bounds = array<i64: 1>, scalar_prefetch = 0 : i64, scratch_operands = 0 : i64, tpu.core_type = #tpu.core_type<tc>, window_params = [{transform_indices = @transform_0, window_bounds = array<i64: 1, 256, 32>}, {pipeline_mode = #tpu.pipeline_mode<synchronous>, transform_indices = @transform_1, window_bounds = array<i64: 160, 168>}, {pipeline_mode = #tpu.pipeline_mode<synchronous>, transform_indices = @transform_2, window_bounds = array<i64: 1, 168>}, {pipeline_mode = #tpu.pipeline_mode<synchronous>, transform_indices = @transform_3, window_bounds = array<i64: 840, 160>}, {pipeline_mode = #tpu.pipeline_mode<synchronous>, transform_indices = @transform_4, window_bounds = array<i64: 1, 160>}, {pipeline_mode = #tpu.pipeline_mode<synchronous>, transform_indices = @transform_5, window_bounds = array<i64: 800, 120>}, {pipeline_mode = #tpu.pipeline_mode<synchronous>, transform_indices = @transform_6, window_bounds = array<i64: 1, 120>}, {pipeline_mode = #tpu.pipeline_mode<synchronous>, transform_indices = @transform_7, window_bounds = array<i64: 120, 84>}, {pipeline_mode = #tpu.pipeline_mode<synchronous>, transform_indices = @transform_8, window_bounds = array<i64: 1, 84>}, {pipeline_mode = #tpu.pipeline_mode<synchronous>, transform_indices = @transform_9, window_bounds = array<i64: 84, 10>}, {pipeline_mode = #tpu.pipeline_mode<synchronous>, transform_indices = @transform_10, window_bounds = array<i64: 1, 10>}, {transform_indices = @transform_11, window_bounds = array<i64: 8, 10>}]} {
    %c0 = arith.constant 0 : index
    %c0_0 = arith.constant 0 : index
    %c0_1 = arith.constant 0 : index
    %0 = vector.load %arg1[%c0, %c0_0, %c0_1] : memref<1x256x32xf32, #tpu.memory_space<vmem>>, vector<1x256x32xf32>
    %1 = vector.shape_cast %0 : vector<1x256x32xf32> to vector<256x32xf32>
    %2 = vector.extract_strided_slice %1 {offsets = [0, 0], sizes = [224, 32], strides = [1, 1]} : vector<256x32xf32> to vector<224x32xf32>
    %3 = vector.extract_strided_slice %1 {offsets = [8, 0], sizes = [224, 32], strides = [1, 1]} : vector<256x32xf32> to vector<224x32xf32>
    %4 = vector.extract_strided_slice %1 {offsets = [16, 0], sizes = [224, 32], strides = [1, 1]} : vector<256x32xf32> to vector<224x32xf32>
    %5 = vector.extract_strided_slice %1 {offsets = [24, 0], sizes = [224, 32], strides = [1, 1]} : vector<256x32xf32> to vector<224x32xf32>
    %6 = vector.extract_strided_slice %1 {offsets = [32, 0], sizes = [224, 32], strides = [1, 1]} : vector<256x32xf32> to vector<224x32xf32>
    %7 = tpu.concatenate %2, %3, %4, %5, %6 in 1 : vector<224x32xf32>, vector<224x32xf32>, vector<224x32xf32>, vector<224x32xf32>, vector<224x32xf32> -> vector<224x160xf32>
    %c0_2 = arith.constant 0 : index
    %c0_3 = arith.constant 0 : index
    %8 = vector.load %arg2[%c0_2, %c0_3] : memref<160x168xf32, #tpu.memory_space<vmem>>, vector<160x168xf32>
    %cst = arith.constant dense<0.000000e+00> : vector<224x168xf32>
    %9 = tpu.matmul %7, %8, %cst {dimension_numbers = #tpu.dot_dimension_numbers<[1], [0], [0], [1], [0, 0, 1, 1], [], []>} : vector<224x160xf32>, vector<160x168xf32>, vector<224x168xf32> -> vector<224x168xf32>
    %c0_4 = arith.constant 0 : index
    %c0_5 = arith.constant 0 : index
    %10 = vector.load %arg3[%c0_4, %c0_5] : memref<1x168xf32, #tpu.memory_space<vmem>>, vector<1x168xf32>
    %11 = vector.broadcast %10 : vector<1x168xf32> to vector<224x168xf32>
    %12 = arith.addf %9, %11 : vector<224x168xf32>
    %13 = math.tanh %12 : vector<224x168xf32>
    %14 = vector.extract_strided_slice %13 {offsets = [0, 0], sizes = [8, 168], strides = [1, 1]} : vector<224x168xf32> to vector<8x168xf32>
    %15 = vector.extract_strided_slice %13 {offsets = [8, 0], sizes = [8, 168], strides = [1, 1]} : vector<224x168xf32> to vector<8x168xf32>
    %16 = arith.addf %14, %15 : vector<8x168xf32>
    %cst_6 = arith.constant 5.000000e-01 : f32
    %17 = vector.broadcast %cst_6 : f32 to vector<8x168xf32>
    %18 = arith.mulf %17, %16 : vector<8x168xf32>
    %19 = vector.extract_strided_slice %13 {offsets = [16, 0], sizes = [8, 168], strides = [1, 1]} : vector<224x168xf32> to vector<8x168xf32>
    %20 = vector.extract_strided_slice %13 {offsets = [24, 0], sizes = [8, 168], strides = [1, 1]} : vector<224x168xf32> to vector<8x168xf32>
    %21 = arith.addf %19, %20 : vector<8x168xf32>
    %cst_7 = arith.constant 5.000000e-01 : f32
    %22 = vector.broadcast %cst_7 : f32 to vector<8x168xf32>
    %23 = arith.mulf %22, %21 : vector<8x168xf32>
    %24 = vector.extract_strided_slice %13 {offsets = [32, 0], sizes = [8, 168], strides = [1, 1]} : vector<224x168xf32> to vector<8x168xf32>
    %25 = vector.extract_strided_slice %13 {offsets = [40, 0], sizes = [8, 168], strides = [1, 1]} : vector<224x168xf32> to vector<8x168xf32>
    %26 = arith.addf %24, %25 : vector<8x168xf32>
    %cst_8 = arith.constant 5.000000e-01 : f32
    %27 = vector.broadcast %cst_8 : f32 to vector<8x168xf32>
    %28 = arith.mulf %27, %26 : vector<8x168xf32>
    %29 = vector.extract_strided_slice %13 {offsets = [48, 0], sizes = [8, 168], strides = [1, 1]} : vector<224x168xf32> to vector<8x168xf32>
    %30 = vector.extract_strided_slice %13 {offsets = [56, 0], sizes = [8, 168], strides = [1, 1]} : vector<224x168xf32> to vector<8x168xf32>
    %31 = arith.addf %29, %30 : vector<8x168xf32>
    %cst_9 = arith.constant 5.000000e-01 : f32
    %32 = vector.broadcast %cst_9 : f32 to vector<8x168xf32>
    %33 = arith.mulf %32, %31 : vector<8x168xf32>
    %34 = vector.extract_strided_slice %13 {offsets = [64, 0], sizes = [8, 168], strides = [1, 1]} : vector<224x168xf32> to vector<8x168xf32>
    %35 = vector.extract_strided_slice %13 {offsets = [72, 0], sizes = [8, 168], strides = [1, 1]} : vector<224x168xf32> to vector<8x168xf32>
    %36 = arith.addf %34, %35 : vector<8x168xf32>
    %cst_10 = arith.constant 5.000000e-01 : f32
    %37 = vector.broadcast %cst_10 : f32 to vector<8x168xf32>
    %38 = arith.mulf %37, %36 : vector<8x168xf32>
    %39 = vector.extract_strided_slice %13 {offsets = [80, 0], sizes = [8, 168], strides = [1, 1]} : vector<224x168xf32> to vector<8x168xf32>
    %40 = vector.extract_strided_slice %13 {offsets = [88, 0], sizes = [8, 168], strides = [1, 1]} : vector<224x168xf32> to vector<8x168xf32>
    %41 = arith.addf %39, %40 : vector<8x168xf32>
    %cst_11 = arith.constant 5.000000e-01 : f32
    %42 = vector.broadcast %cst_11 : f32 to vector<8x168xf32>
    %43 = arith.mulf %42, %41 : vector<8x168xf32>
    %44 = vector.extract_strided_slice %13 {offsets = [96, 0], sizes = [8, 168], strides = [1, 1]} : vector<224x168xf32> to vector<8x168xf32>
    %45 = vector.extract_strided_slice %13 {offsets = [104, 0], sizes = [8, 168], strides = [1, 1]} : vector<224x168xf32> to vector<8x168xf32>
    %46 = arith.addf %44, %45 : vector<8x168xf32>
    %cst_12 = arith.constant 5.000000e-01 : f32
    %47 = vector.broadcast %cst_12 : f32 to vector<8x168xf32>
    %48 = arith.mulf %47, %46 : vector<8x168xf32>
    %49 = vector.extract_strided_slice %13 {offsets = [112, 0], sizes = [8, 168], strides = [1, 1]} : vector<224x168xf32> to vector<8x168xf32>
    %50 = vector.extract_strided_slice %13 {offsets = [120, 0], sizes = [8, 168], strides = [1, 1]} : vector<224x168xf32> to vector<8x168xf32>
    %51 = arith.addf %49, %50 : vector<8x168xf32>
    %cst_13 = arith.constant 5.000000e-01 : f32
    %52 = vector.broadcast %cst_13 : f32 to vector<8x168xf32>
    %53 = arith.mulf %52, %51 : vector<8x168xf32>
    %54 = vector.extract_strided_slice %13 {offsets = [128, 0], sizes = [8, 168], strides = [1, 1]} : vector<224x168xf32> to vector<8x168xf32>
    %55 = vector.extract_strided_slice %13 {offsets = [136, 0], sizes = [8, 168], strides = [1, 1]} : vector<224x168xf32> to vector<8x168xf32>
    %56 = arith.addf %54, %55 : vector<8x168xf32>
    %cst_14 = arith.constant 5.000000e-01 : f32
    %57 = vector.broadcast %cst_14 : f32 to vector<8x168xf32>
    %58 = arith.mulf %57, %56 : vector<8x168xf32>
    %59 = vector.extract_strided_slice %13 {offsets = [144, 0], sizes = [8, 168], strides = [1, 1]} : vector<224x168xf32> to vector<8x168xf32>
    %60 = vector.extract_strided_slice %13 {offsets = [152, 0], sizes = [8, 168], strides = [1, 1]} : vector<224x168xf32> to vector<8x168xf32>
    %61 = arith.addf %59, %60 : vector<8x168xf32>
    %cst_15 = arith.constant 5.000000e-01 : f32
    %62 = vector.broadcast %cst_15 : f32 to vector<8x168xf32>
    %63 = arith.mulf %62, %61 : vector<8x168xf32>
    %64 = vector.extract_strided_slice %13 {offsets = [160, 0], sizes = [8, 168], strides = [1, 1]} : vector<224x168xf32> to vector<8x168xf32>
    %65 = vector.extract_strided_slice %13 {offsets = [168, 0], sizes = [8, 168], strides = [1, 1]} : vector<224x168xf32> to vector<8x168xf32>
    %66 = arith.addf %64, %65 : vector<8x168xf32>
    %cst_16 = arith.constant 5.000000e-01 : f32
    %67 = vector.broadcast %cst_16 : f32 to vector<8x168xf32>
    %68 = arith.mulf %67, %66 : vector<8x168xf32>
    %69 = vector.extract_strided_slice %13 {offsets = [176, 0], sizes = [8, 168], strides = [1, 1]} : vector<224x168xf32> to vector<8x168xf32>
    %70 = vector.extract_strided_slice %13 {offsets = [184, 0], sizes = [8, 168], strides = [1, 1]} : vector<224x168xf32> to vector<8x168xf32>
    %71 = arith.addf %69, %70 : vector<8x168xf32>
    %cst_17 = arith.constant 5.000000e-01 : f32
    %72 = vector.broadcast %cst_17 : f32 to vector<8x168xf32>
    %73 = arith.mulf %72, %71 : vector<8x168xf32>
    %74 = vector.extract_strided_slice %13 {offsets = [192, 0], sizes = [8, 168], strides = [1, 1]} : vector<224x168xf32> to vector<8x168xf32>
    %75 = vector.extract_strided_slice %13 {offsets = [200, 0], sizes = [8, 168], strides = [1, 1]} : vector<224x168xf32> to vector<8x168xf32>
    %76 = arith.addf %74, %75 : vector<8x168xf32>
    %cst_18 = arith.constant 5.000000e-01 : f32
    %77 = vector.broadcast %cst_18 : f32 to vector<8x168xf32>
    %78 = arith.mulf %77, %76 : vector<8x168xf32>
    %79 = vector.extract_strided_slice %13 {offsets = [208, 0], sizes = [8, 168], strides = [1, 1]} : vector<224x168xf32> to vector<8x168xf32>
    %80 = vector.extract_strided_slice %13 {offsets = [216, 0], sizes = [8, 168], strides = [1, 1]} : vector<224x168xf32> to vector<8x168xf32>
    %81 = arith.addf %79, %80 : vector<8x168xf32>
    %cst_19 = arith.constant 5.000000e-01 : f32
    %82 = vector.broadcast %cst_19 : f32 to vector<8x168xf32>
    %83 = arith.mulf %82, %81 : vector<8x168xf32>
    %84 = tpu.concatenate %18, %23, %28, %33, %38, %43, %48, %53, %58, %63, %68, %73, %78, %83 in 0 : vector<8x168xf32>, vector<8x168xf32>, vector<8x168xf32>, vector<8x168xf32>, vector<8x168xf32>, vector<8x168xf32>, vector<8x168xf32>, vector<8x168xf32>, vector<8x168xf32>, vector<8x168xf32>, vector<8x168xf32>, vector<8x168xf32>, vector<8x168xf32>, vector<8x168xf32> -> vector<112x168xf32>
    %85 = vector.extract_strided_slice %84 {offsets = [0, 0], sizes = [80, 168], strides = [1, 1]} : vector<112x168xf32> to vector<80x168xf32>
    %86 = vector.extract_strided_slice %84 {offsets = [8, 0], sizes = [80, 168], strides = [1, 1]} : vector<112x168xf32> to vector<80x168xf32>
    %87 = vector.extract_strided_slice %84 {offsets = [16, 0], sizes = [80, 168], strides = [1, 1]} : vector<112x168xf32> to vector<80x168xf32>
    %88 = vector.extract_strided_slice %84 {offsets = [24, 0], sizes = [80, 168], strides = [1, 1]} : vector<112x168xf32> to vector<80x168xf32>
    %89 = vector.extract_strided_slice %84 {offsets = [32, 0], sizes = [80, 168], strides = [1, 1]} : vector<112x168xf32> to vector<80x168xf32>
    %90 = tpu.concatenate %85, %86, %87, %88, %89 in 1 : vector<80x168xf32>, vector<80x168xf32>, vector<80x168xf32>, vector<80x168xf32>, vector<80x168xf32> -> vector<80x840xf32>
    %c0_20 = arith.constant 0 : index
    %c0_21 = arith.constant 0 : index
    %91 = vector.load %arg4[%c0_20, %c0_21] : memref<840x160xf32, #tpu.memory_space<vmem>>, vector<840x160xf32>
    %cst_22 = arith.constant dense<0.000000e+00> : vector<80x160xf32>
    %92 = tpu.matmul %90, %91, %cst_22 {dimension_numbers = #tpu.dot_dimension_numbers<[1], [0], [0], [1], [0, 0, 1, 1], [], []>} : vector<80x840xf32>, vector<840x160xf32>, vector<80x160xf32> -> vector<80x160xf32>
    %c0_23 = arith.constant 0 : index
    %c0_24 = arith.constant 0 : index
    %93 = vector.load %arg5[%c0_23, %c0_24] : memref<1x160xf32, #tpu.memory_space<vmem>>, vector<1x160xf32>
    %94 = vector.broadcast %93 : vector<1x160xf32> to vector<80x160xf32>
    %95 = arith.addf %92, %94 : vector<80x160xf32>
    %96 = math.tanh %95 : vector<80x160xf32>
    %97 = vector.extract_strided_slice %96 {offsets = [0, 0], sizes = [8, 160], strides = [1, 1]} : vector<80x160xf32> to vector<8x160xf32>
    %98 = vector.extract_strided_slice %96 {offsets = [8, 0], sizes = [8, 160], strides = [1, 1]} : vector<80x160xf32> to vector<8x160xf32>
    %99 = arith.addf %97, %98 : vector<8x160xf32>
    %cst_25 = arith.constant 5.000000e-01 : f32
    %100 = vector.broadcast %cst_25 : f32 to vector<8x160xf32>
    %101 = arith.mulf %100, %99 : vector<8x160xf32>
    %102 = vector.extract_strided_slice %96 {offsets = [16, 0], sizes = [8, 160], strides = [1, 1]} : vector<80x160xf32> to vector<8x160xf32>
    %103 = vector.extract_strided_slice %96 {offsets = [24, 0], sizes = [8, 160], strides = [1, 1]} : vector<80x160xf32> to vector<8x160xf32>
    %104 = arith.addf %102, %103 : vector<8x160xf32>
    %cst_26 = arith.constant 5.000000e-01 : f32
    %105 = vector.broadcast %cst_26 : f32 to vector<8x160xf32>
    %106 = arith.mulf %105, %104 : vector<8x160xf32>
    %107 = vector.extract_strided_slice %96 {offsets = [32, 0], sizes = [8, 160], strides = [1, 1]} : vector<80x160xf32> to vector<8x160xf32>
    %108 = vector.extract_strided_slice %96 {offsets = [40, 0], sizes = [8, 160], strides = [1, 1]} : vector<80x160xf32> to vector<8x160xf32>
    %109 = arith.addf %107, %108 : vector<8x160xf32>
    %cst_27 = arith.constant 5.000000e-01 : f32
    %110 = vector.broadcast %cst_27 : f32 to vector<8x160xf32>
    %111 = arith.mulf %110, %109 : vector<8x160xf32>
    %112 = vector.extract_strided_slice %96 {offsets = [48, 0], sizes = [8, 160], strides = [1, 1]} : vector<80x160xf32> to vector<8x160xf32>
    %113 = vector.extract_strided_slice %96 {offsets = [56, 0], sizes = [8, 160], strides = [1, 1]} : vector<80x160xf32> to vector<8x160xf32>
    %114 = arith.addf %112, %113 : vector<8x160xf32>
    %cst_28 = arith.constant 5.000000e-01 : f32
    %115 = vector.broadcast %cst_28 : f32 to vector<8x160xf32>
    %116 = arith.mulf %115, %114 : vector<8x160xf32>
    %117 = vector.extract_strided_slice %96 {offsets = [64, 0], sizes = [8, 160], strides = [1, 1]} : vector<80x160xf32> to vector<8x160xf32>
    %118 = vector.extract_strided_slice %96 {offsets = [72, 0], sizes = [8, 160], strides = [1, 1]} : vector<80x160xf32> to vector<8x160xf32>
    %119 = arith.addf %117, %118 : vector<8x160xf32>
    %cst_29 = arith.constant 5.000000e-01 : f32
    %120 = vector.broadcast %cst_29 : f32 to vector<8x160xf32>
    %121 = arith.mulf %120, %119 : vector<8x160xf32>
    %122 = tpu.concatenate %101, %106, %111, %116, %121 in 0 : vector<8x160xf32>, vector<8x160xf32>, vector<8x160xf32>, vector<8x160xf32>, vector<8x160xf32> -> vector<40x160xf32>
    %123 = vector.extract_strided_slice %122 {offsets = [0, 0], sizes = [8, 160], strides = [1, 1]} : vector<40x160xf32> to vector<8x160xf32>
    %124 = vector.extract_strided_slice %122 {offsets = [8, 0], sizes = [8, 160], strides = [1, 1]} : vector<40x160xf32> to vector<8x160xf32>
    %125 = vector.extract_strided_slice %122 {offsets = [16, 0], sizes = [8, 160], strides = [1, 1]} : vector<40x160xf32> to vector<8x160xf32>
    %126 = vector.extract_strided_slice %122 {offsets = [24, 0], sizes = [8, 160], strides = [1, 1]} : vector<40x160xf32> to vector<8x160xf32>
    %127 = vector.extract_strided_slice %122 {offsets = [32, 0], sizes = [8, 160], strides = [1, 1]} : vector<40x160xf32> to vector<8x160xf32>
    %128 = tpu.concatenate %123, %124, %125, %126, %127 in 1 : vector<8x160xf32>, vector<8x160xf32>, vector<8x160xf32>, vector<8x160xf32>, vector<8x160xf32> -> vector<8x800xf32>
    %c0_30 = arith.constant 0 : index
    %c0_31 = arith.constant 0 : index
    %129 = vector.load %arg6[%c0_30, %c0_31] : memref<800x120xf32, #tpu.memory_space<vmem>>, vector<800x120xf32>
    %cst_32 = arith.constant dense<0.000000e+00> : vector<8x120xf32>
    %130 = tpu.matmul %128, %129, %cst_32 {dimension_numbers = #tpu.dot_dimension_numbers<[1], [0], [0], [1], [0, 0, 1, 1], [], []>} : vector<8x800xf32>, vector<800x120xf32>, vector<8x120xf32> -> vector<8x120xf32>
    %c0_33 = arith.constant 0 : index
    %c0_34 = arith.constant 0 : index
    %131 = vector.load %arg7[%c0_33, %c0_34] : memref<1x120xf32, #tpu.memory_space<vmem>>, vector<1x120xf32>
    %132 = vector.broadcast %131 : vector<1x120xf32> to vector<8x120xf32>
    %133 = arith.addf %130, %132 : vector<8x120xf32>
    %134 = math.tanh %133 : vector<8x120xf32>
    %c0_35 = arith.constant 0 : index
    %c0_36 = arith.constant 0 : index
    %135 = vector.load %arg8[%c0_35, %c0_36] : memref<120x84xf32, #tpu.memory_space<vmem>>, vector<120x84xf32>
    %cst_37 = arith.constant dense<0.000000e+00> : vector<8x84xf32>
    %136 = tpu.matmul %134, %135, %cst_37 {dimension_numbers = #tpu.dot_dimension_numbers<[1], [0], [0], [1], [0, 0, 1, 1], [], []>} : vector<8x120xf32>, vector<120x84xf32>, vector<8x84xf32> -> vector<8x84xf32>
    %c0_38 = arith.constant 0 : index
    %c0_39 = arith.constant 0 : index
    %137 = vector.load %arg9[%c0_38, %c0_39] : memref<1x84xf32, #tpu.memory_space<vmem>>, vector<1x84xf32>
    %138 = vector.broadcast %137 : vector<1x84xf32> to vector<8x84xf32>
    %139 = arith.addf %136, %138 : vector<8x84xf32>
    %140 = math.tanh %139 : vector<8x84xf32>
    %c0_40 = arith.constant 0 : index
    %c0_41 = arith.constant 0 : index
    %141 = vector.load %arg10[%c0_40, %c0_41] : memref<84x10xf32, #tpu.memory_space<vmem>>, vector<84x10xf32>
    %cst_42 = arith.constant dense<0.000000e+00> : vector<8x10xf32>
    %142 = tpu.matmul %140, %141, %cst_42 {dimension_numbers = #tpu.dot_dimension_numbers<[1], [0], [0], [1], [0, 0, 1, 1], [], []>} : vector<8x84xf32>, vector<84x10xf32>, vector<8x10xf32> -> vector<8x10xf32>
    %c0_43 = arith.constant 0 : index
    %c0_44 = arith.constant 0 : index
    %143 = vector.load %arg11[%c0_43, %c0_44] : memref<1x10xf32, #tpu.memory_space<vmem>>, vector<1x10xf32>
    %144 = vector.broadcast %143 : vector<1x10xf32> to vector<8x10xf32>
    %145 = arith.addf %142, %144 : vector<8x10xf32>
    %cst_45 = arith.constant dense<0xFF800000> : vector<8xf32>
    %146 = vector.multi_reduction <maximumf>, %145, %cst_45 [1] : vector<8x10xf32> to vector<8xf32>
    %147 = vector.shape_cast %146 : vector<8xf32> to vector<8x1xf32>
    %148 = vector.broadcast %147 : vector<8x1xf32> to vector<8x10xf32>
    %149 = arith.subf %145, %148 : vector<8x10xf32>
    %150 = math.exp %149 : vector<8x10xf32>
    %cst_46 = arith.constant dense<0.000000e+00> : vector<8xf32>
    %151 = vector.multi_reduction <add>, %150, %cst_46 [1] : vector<8x10xf32> to vector<8xf32>
    %152 = vector.shape_cast %151 : vector<8xf32> to vector<8x1xf32>
    %153 = vector.broadcast %152 : vector<8x1xf32> to vector<8x10xf32>
    %154 = arith.divf %150, %153 : vector<8x10xf32>
    %c0_47 = arith.constant 0 : index
    %c0_48 = arith.constant 0 : index
    %155 = vector.load %arg12[%c0_47, %c0_48] : memref<8x10xf32, #tpu.memory_space<vmem>>, vector<8x10xf32>
    tpu.vector_store %arg12[%c0_47, %c0_48], %154 {strides = array<i32>} : memref<8x10xf32, #tpu.memory_space<vmem>>, vector<8x10xf32>,
    return
  }
  func.func @transform_0(%arg0: i32) -> (i32, i32, i32) {
    %c0_i32 = arith.constant 0 : i32
    %c0_i32_0 = arith.constant 0 : i32
    %c0_i32_1 = arith.constant 0 : i32
    return %arg0, %c0_i32, %c0_i32_0 : i32, i32, i32
  }
  func.func @transform_1(%arg0: i32) -> (i32, i32) {
    %c0_i32 = arith.constant 0 : i32
    %c0_i32_0 = arith.constant 0 : i32
    %c0_i32_1 = arith.constant 0 : i32
    return %c0_i32, %c0_i32_0 : i32, i32
  }
  func.func @transform_2(%arg0: i32) -> (i32, i32) {
    %c0_i32 = arith.constant 0 : i32
    %c0_i32_0 = arith.constant 0 : i32
    %c0_i32_1 = arith.constant 0 : i32
    return %c0_i32, %c0_i32_0 : i32, i32
  }
  func.func @transform_3(%arg0: i32) -> (i32, i32) {
    %c0_i32 = arith.constant 0 : i32
    %c0_i32_0 = arith.constant 0 : i32
    %c0_i32_1 = arith.constant 0 : i32
    return %c0_i32, %c0_i32_0 : i32, i32
  }
  func.func @transform_4(%arg0: i32) -> (i32, i32) {
    %c0_i32 = arith.constant 0 : i32
    %c0_i32_0 = arith.constant 0 : i32
    %c0_i32_1 = arith.constant 0 : i32
    return %c0_i32, %c0_i32_0 : i32, i32
  }
  func.func @transform_5(%arg0: i32) -> (i32, i32) {
    %c0_i32 = arith.constant 0 : i32
    %c0_i32_0 = arith.constant 0 : i32
    %c0_i32_1 = arith.constant 0 : i32
    return %c0_i32, %c0_i32_0 : i32, i32
  }
  func.func @transform_6(%arg0: i32) -> (i32, i32) {
    %c0_i32 = arith.constant 0 : i32
    %c0_i32_0 = arith.constant 0 : i32
    %c0_i32_1 = arith.constant 0 : i32
    return %c0_i32, %c0_i32_0 : i32, i32
  }
  func.func @transform_7(%arg0: i32) -> (i32, i32) {
    %c0_i32 = arith.constant 0 : i32
    %c0_i32_0 = arith.constant 0 : i32
    %c0_i32_1 = arith.constant 0 : i32
    return %c0_i32, %c0_i32_0 : i32, i32
  }
  func.func @transform_8(%arg0: i32) -> (i32, i32) {
    %c0_i32 = arith.constant 0 : i32
    %c0_i32_0 = arith.constant 0 : i32
    %c0_i32_1 = arith.constant 0 : i32
    return %c0_i32, %c0_i32_0 : i32, i32
  }
  func.func @transform_9(%arg0: i32) -> (i32, i32) {
    %c0_i32 = arith.constant 0 : i32
    %c0_i32_0 = arith.constant 0 : i32
    %c0_i32_1 = arith.constant 0 : i32
    return %c0_i32, %c0_i32_0 : i32, i32
  }
  func.func @transform_10(%arg0: i32) -> (i32, i32) {
    %c0_i32 = arith.constant 0 : i32
    %c0_i32_0 = arith.constant 0 : i32
    %c0_i32_1 = arith.constant 0 : i32
    return %c0_i32, %c0_i32_0 : i32, i32
  }
  func.func @transform_11(%arg0: i32) -> (i32, i32) {
    %c0_i32 = arith.constant 0 : i32
    %c0_i32_0 = arith.constant 0 : i32
    return %arg0, %c0_i32 : i32, i32
  }
}

</mosaic_0001>

<bundles_post_ra>
// kernel: _lambda_.1
= control target key start
LH: loop header
LB: loop body
LE: loop exit
PB: predicated region body
PF: predicated region fallthrough
CT: control target
= control target key end

     0   :  { %s3370_s12 = smov 32   ;;  %s3371_s13 = smov 96   ;;  %s6257_s0 = inlined_call_operand.vmem [shape: f32[1,256,32], index: 0, kind: input, shape index: {}]   ;;  %s6258_s1 = inlined_call_operand.vmem [shape: f32[160,168], index: 1, kind: input, shape index: {}]   ;;  %s6259_s2 = inlined_call_operand.vmem [shape: f32[1,168], index: 2, kind: input, shape index: {}]   ;;  %s6260_s3 = inlined_call_operand.vmem [shape: f32[840,160], index: 3, kind: input, shape index: {}]   ;;  %s6261_s4 = inlined_call_operand.vmem [shape: f32[1,160], index: 4, kind: input, shape index: {}]   ;;  %s6262_s5 = inlined_call_operand.vmem [shape: f32[800,120], index: 5, kind: input, shape index: {}]   ;;  %s6263_s6 = inlined_call_operand.vmem [shape: f32[1,120], index: 6, kind: input, shape index: {}]   ;;  %s6264_s7 = inlined_call_operand.vmem [shape: f32[120,84], index: 7, kind: input, shape index: {}]   ;;  %s6265_s8 = inlined_call_operand.vmem [shape: f32[1,84], index: 8, kind: input, shape index: {}]   ;;  %s6266_s9 = inlined_call_operand.vmem [shape: f32[84,10], index: 9, kind: input, shape index: {}]   ;;  %s6267_s10 = inlined_call_operand.vmem [shape: f32[1,10], index: 10, kind: input, shape index: {}]   ;;  %s6268_s11 = inlined_call_operand.hbm [shape: f32[8,10], index: 11, kind: output, shape index: {}]  }
   0x1   :  { %v3440_v0 = vld [vmem:[%s6257_s0 + $0x8] sm:$0xff]  ;;  %v3445_v1 = vld [vmem:[%s6257_s0 + $0x10] sm:$0xff]  ;;  %v3450_v2 = vld [vmem:[%s6257_s0 + $0x18] sm:$0xff]  ;;  %s3372_s14 = smov 64  }
   0x2   :  { %v2836_v3 = vpack.i.bf16 %v3445_v1, %v3440_v0  ;;  %v3457_v4 = vld [vmem:[%s6257_s0 + $0x20] sm:$0xff]  ;;  %v3462_v5 = vld [vmem:[%s6257_s0 + $0x28] sm:$0xff]  ;;  %v478_v8 = vld [vmem:[%s6258_s1 + $0x130] sm:$0xff] }
   0x3   :  { %v2846_v6 = vpack.i.bf16 %v3457_v4, %v3450_v2  ;;  %v2856_v7 = vpack.i.bf16 %v3462_v5, %v3457_v4  ;;  %v476_v9 = vld [vmem:[%s6258_s1 + $0x120] sm:$0xff]  ;;  %656 = vmatpush.msra.mxu1 %v478_v8  ;;  %v474_v10 = vld [vmem:[%s6258_s1 + $0x110] sm:$0xff] }
   0x4   :  { %2837 = vrot.lane.b32.xlu0 %v2836_v3, %s3370_s12  ;;  %v472_v11 = vld [vmem:[%s6258_s1 + $0x100] sm:$0xff] }
   0x5   :  { %2847 = vrot.lane.b32.xlu1 %v2846_v6, %s3371_s13  ;;  %2857 = vrot.lane.b32.xlu2 %v2856_v7, %s3372_s14 }
   0x6   :  { %657 = vmatpush.msra.mxu1 %v476_v9 }
   0x7   :  { %16 = vsyncpa [#allocation3], 0  ;;  %v2841_v12 = vpack.i.bf16 %v3450_v2, %v3445_v1  ;;  %v3488_v13 = vld [vmem:[%s6257_s0 + $0x30] sm:$0xff]  ;;  %vm353_vm0 = vcmask 261120   ;;  %v3500_v15 = vld [vmem:[%s6257_s0 + $0x38] sm:$0xff]  ;;  %vm382_vm1 = vcmask 523264  }
   0x8   :  { %658 = vmatpush.msra.mxu1 %v474_v10  ;;  %v2861_v14 = vpack.i.bf16 %v3488_v13, %v3462_v5  ;;  %v3505_v16 = vld [vmem:[%s6257_s0 + $0x40] sm:$0xff]  ;;  %v2871_v17 = vpack.i.bf16 %v3500_v15, %v3488_v13  ;;  %v470_v19 = vld [vmem:[%s6258_s1 + $0xf0] sm:$0xff]  ;;  %v471_v20 = vld [vmem:[%s6258_s1 + $0xf8] sm:$0xff]  ;;  %vm411_vm2 = vcmask 785408   ;;  %s3373_s22 = smov 40   ;;  %s3374_s16 = smov 80  }
   0x9   :  { %v2876_v18 = vpack.i.bf16 %v3505_v16, %v3500_v15  ;;  %v468_v21 = vld [vmem:[%s6258_s1 + $0xe0] sm:$0xff]  ;;  %543 = vmatpush.msra.mxu0 %v470_v19  ;;  %v469_v22 = vld [vmem:[%s6258_s1 + $0xe8] sm:$0xff]  ;;  %v466_v23 = vld [vmem:[%s6258_s1 + $0xd0] sm:$0xff]  ;;  %745 = vmatpush.msra.mxu2 %v471_v20  ;;  %s3375_s23 = smov 120   ;;  %vm1119_vm3 = vcmask 326656   ;;  %vm1192_vm4 = vcmask 654336  }
   0xa   :  { %659 = vmatpush.msra.mxu1 %v472_v11  ;;  %v3534_v24 = vld [vmem:[%s6257_s0 + $0x48] sm:$0xff]  ;;  %v3539_v25 = vld [vmem:[%s6257_s0 + $0x50] sm:$0xff]  ;;  %v467_v28 = vld [vmem:[%s6258_s1 + $0xd8] sm:$0xff]  ;;  %vm1265_vm5 = vcmask 982016   ;;  %vm1624_vm6 = vcmask 588800   ;;  %vm2683_vm7 = vcmask 1043456  }
   0xb   :  { %2749 = vmatmul.msk.f32.vlgmr.msra.gmra.mxu1 %vm353_vm0, %v3457_v4  ;;  %544 = vmatpush.msra.mxu0 %v468_v21  ;;  %v2886_v26 = vpack.i.bf16 %v3534_v24, %v3505_v16  ;;  %v2891_v27 = vpack.i.bf16 %v3539_v25, %v3534_v24  ;;  %v464_v29 = vld [vmem:[%s6258_s1 + $0xc0] sm:$0xff]  ;;  %v465_v30 = vld [vmem:[%s6258_s1 + $0xc8] sm:$0xff]  ;;  %v462_v31 = vld [vmem:[%s6258_s1 + $0xb0] sm:$0xff]  ;;  %vm2679_vm8 = vcmask 687104   ;;  %vm2707_vm9 = vcmask 80896  }
   0xc   :  { %2842 = vrot.lane.b32.xlu0 %v2841_v12, %s3372_s14  ;;  %746 = vmatpush.msra.mxu2 %v469_v22  ;;  %v463_v32 = vld [vmem:[%s6258_s1 + $0xb8] sm:$0xff]  ;;  %v460_v34 = vld [vmem:[%s6258_s1 + $0xa0] sm:$0xff]  ;;  %v461_v35 = vld [vmem:[%s6258_s1 + $0xa8] sm:$0xff] }
   0xd   :  { %2852 = vrot.lane.b32.xlu1 %v2846_v6, %s3370_s12  ;;  %2862 = vrot.lane.b32.xlu2 %v2861_v14, %s3371_s13  ;;  %v3568_v33 = vld [vmem:[%s6257_s0 + $0x58] sm:$0xff]  ;;  %v3579_v36 = vld [vmem:[%s6257_s0 + $0x60] sm:$0xff] }
   0xe   :  { %545 = vmatpush.msra.mxu0 %v466_v23  ;;  %747 = vmatpush.msra.mxu2 %v467_v28  ;;  %v2901_v37 = vpack.i.bf16 %v3568_v33, %v3539_v25  ;;  %v2906_v38 = vpack.i.bf16 %v3579_v36, %v3568_v33  ;;  %v458_v39 = vld [vmem:[%s6258_s1 + $0x90] sm:$0xff]  ;;  %v459_v40 = vld [vmem:[%s6258_s1 + $0x98] sm:$0xff]  ;;  %v456_v41 = vld [vmem:[%s6258_s1 + $0x80] sm:$0xff] }
   0xf   :  { %v457_v42 = vld [vmem:[%s6258_s1 + $0x88] sm:$0xff]  ;;  %v454_v43 = vld [vmem:[%s6258_s1 + $0x70] sm:$0xff]  ;;  %v455_v45 = vld [vmem:[%s6258_s1 + $0x78] sm:$0xff] }
  0x10   :  { %546 = vmatpush.msra.mxu0 %v464_v29  ;;  %748 = vmatpush.msra.mxu2 %v465_v30  ;;  %v3608_v44 = vld [vmem:[%s6257_s0 + $0x68] sm:$0xff]  ;;  %v452_v46 = vld [vmem:[%s6258_s1 + $0x60] sm:$0xff]  ;;  %v3619_v47 = vld [vmem:[%s6257_s0 + $0x70] sm:$0xff] }
  0x11   :  { %v2916_v48 = vpack.i.bf16 %v3608_v44, %v3579_v36  ;;  %v2921_v49 = vpack.i.bf16 %v3619_v47, %v3608_v44  ;;  %v453_v50 = vld [vmem:[%s6258_s1 + $0x68] sm:$0xff]  ;;  %v3636_v51 = vld [vmem:[%s6257_s0 + $0x78] sm:$0xff]  ;;  %v450_v53 = vld [vmem:[%s6258_s1 + $0x50] sm:$0xff] }
  0x12   :  { %547 = vmatpush.msra.mxu0 %v462_v31  ;;  %749 = vmatpush.msra.mxu2 %v463_v32  ;;  %v2931_v52 = vpack.i.bf16 %v3636_v51, %v3619_v47  ;;  %v451_v54 = vld [vmem:[%s6258_s1 + $0x58] sm:$0xff]  ;;  %v448_v55 = vld [vmem:[%s6258_s1 + $0x40] sm:$0xff]  ;;  %v449_v56 = vld [vmem:[%s6258_s1 + $0x48] sm:$0xff] }
  0x13   :  { %2750 = vmatmul.msk.f32.gmra.mxu1 %vm353_vm0, %v3462_v5  ;;  %v3667_v57 = vld [vmem:[%s6257_s0 + $0x80] sm:$0xff]  ;;  %v446_v59 = vld [vmem:[%s6258_s1 + $0x30] sm:$0xff]  ;;  %v447_v60 = vld [vmem:[%s6258_s1 + $0x38] sm:$0xff] }
  0x14   :  { %2867 = vrot.lane.b32.xlu0 %v2861_v14, %s3370_s12  ;;  %548 = vmatpush.msra.mxu0 %v460_v34  ;;  %v2941_v58 = vpack.i.bf16 %v3667_v57, %v3636_v51  ;;  %v3680_v61 = vld [vmem:[%s6257_s0 + $0x88] sm:$0xff]  ;;  %v479_v63 = vld [vmem:[%s6258_s1 + $0x138] sm:$0xff]  ;;  %v444_v3 = vld [vmem:[%s6258_s1 + $0x20] sm:$0xff] }
  0x15   :  { %2872 = vrot.lane.b32.xlu1 %v2871_v17, %s3372_s14  ;;  %2877 = vrot.lane.b32.xlu2 %v2876_v18, %s3371_s13  ;;  %v2946_v62 = vpack.i.bf16 %v3680_v61, %v3667_v57  ;;  %v445_v6 = vld [vmem:[%s6258_s1 + $0x28] sm:$0xff]  ;;  %v442_v7 = vld [vmem:[%s6258_s1 + $0x10] sm:$0xff] }
  0x16   :  { %750 = vmatpush.msra.mxu2 %v461_v35  ;;  %549 = vmatpush.msra.mxu0 %v458_v39  ;;  %v443_v8 = vld [vmem:[%s6258_s1 + $0x18] sm:$0xff]  ;;  %v477_v9 = vld [vmem:[%s6258_s1 + $0x128] sm:$0xff]  ;;  %v440_v10 = vld [vmem:[%s6258_s1] sm:$0xff] }
  0x17   :  { %858 = vmatpush.msra.mxu3 %v479_v63  ;;  %v441_v11 = vld [vmem:[%s6258_s1 + $0x8] sm:$0xff]  ;;  %v475_v12 = vld [vmem:[%s6258_s1 + $0x118] sm:$0xff]  ;;  %v3721_v17 = vld [vmem:[%s6257_s0 + $0x90] sm:$0xff] }
  0x18   :  { %751 = vmatpush.msra.mxu2 %v459_v40  ;;  %550 = vmatpush.msra.mxu0 %v456_v41  ;;  %v473_v14 = vld [vmem:[%s6258_s1 + $0x108] sm:$0xff]  ;;  %v3734_v19 = vld [vmem:[%s6257_s0 + $0x98] sm:$0xff]  ;;  %v3746_v21 = vld [vmem:[%s6257_s0 + $0xa0] sm:$0xff] }
  0x19   :  { %859 = vmatpush.msra.mxu3 %v477_v9  ;;  %v2961_v20 = vpack.i.bf16 %v3734_v19, %v3721_v17  ;;  %v2971_v22 = vpack.i.bf16 %v3746_v21, %v3734_v19  ;;  %v3766_v29 = vld [vmem:[%s6257_s0 + $0xb0] sm:$0xff]  ;;  %v39_v31 = vld [vmem:[%s6257_s0] sm:$0xff] }
  0x1a   :  { %752 = vmatpush.msra.mxu2 %v457_v42  ;;  %551 = vmatpush.msra.mxu0 %v454_v43  ;;  %v3815_v63 = vld [vmem:[%s6257_s0 + $0xc0] sm:$0xff] }
  0x1b   :  { %2751 = vmatmul.msk.f32.gmra.mxu1 %vm353_vm0, %v3488_v13  ;;  %860 = vmatpush.msra.mxu3 %v475_v12  ;;  %v3832_v12 = vld [vmem:[%s6257_s0 + $0xc8] sm:$0xff] }
  0x1c   :  { %2882 = vrot.lane.b32.xlu0 %v2876_v18, %s3370_s12  ;;  %753 = vmatpush.msra.mxu2 %v455_v45  ;;  %v2956_v18 = vpack.i.bf16 %v3721_v17, %v3680_v61 }
  0x1d   :  { %2887 = vrot.lane.b32.xlu1 %v2886_v26, %s3372_s14  ;;  %2892 = vrot.lane.b32.xlu2 %v2891_v27, %s3371_s13  ;;  %v3759_v26 = vld [vmem:[%s6257_s0 + $0xa8] sm:$0xff] }
  0x1e   :  { %552 = vmatpush.msra.mxu0 %v452_v46  ;;  %754 = vmatpush.msra.mxu2 %v453_v50  ;;  %v2981_v43 = vpack.i.bf16 %v3766_v29, %v3759_v26 }
  0x1f   :  { %861 = vmatpush.msra.mxu3 %v473_v14 }
  0x20   :  { %553 = vmatpush.msra.mxu0 %v450_v53  ;;  %755 = vmatpush.msra.mxu2 %v451_v54 }
  0x21   :  { %2777 = vmatmul.msk.f32.vlgmr.msra.gmra.mxu3 %vm353_vm0, %v3457_v4 }
  0x22   :  { %554 = vmatpush.msra.mxu0 %v448_v55  ;;  %756 = vmatpush.msra.mxu2 %v449_v56 }
  0x23   :  { %2752 = vmatmul.msk.f32.gmra.mxu1 %vm353_vm0, %v3500_v15 }
  0x24   :  { %2897 = vrot.lane.b32.xlu0 %v2891_v27, %s3370_s12  ;;  %555 = vmatpush.msra.mxu0 %v446_v59  ;;  %v2976_v27 = vpack.i.bf16 %v3759_v26, %v3746_v21 }
  0x25   :  { %2902 = vrot.lane.b32.xlu1 %v2901_v37, %s3372_s14  ;;  %2907 = vrot.lane.b32.xlu2 %v2906_v38, %s3371_s13 }
  0x26   :  { %757 = vmatpush.msra.mxu2 %v447_v60  ;;  %556 = vmatpush.msra.mxu0 %v444_v3 }
  0x28   :  { %758 = vmatpush.msra.mxu2 %v445_v6  ;;  %557 = vmatpush.msra.mxu0 %v442_v7 }
  0x29   :  { %2778 = vmatmul.msk.f32.gmra.mxu3 %vm353_vm0, %v3462_v5 }
  0x2a   :  { %759 = vmatpush.msra.mxu2 %v443_v8  ;;  %558 = vmatpush.msra.mxu0 %v440_v10 }
  0x2b   :  { %2753 = vmatmul.msk.f32.gmra.mxu1 %vm353_vm0, %v3505_v16 }
  0x2c   :  { %2912 = vrot.lane.b32.xlu0 %v2906_v38, %s3370_s12  ;;  %760 = vmatpush.msra.mxu2 %v441_v11 }
  0x2d   :  { %2917 = vrot.lane.b32.xlu1 %v2916_v48, %s3372_s14  ;;  %2922 = vrot.lane.b32.xlu2 %v2921_v49, %s3371_s13 }
  0x31   :  { %2779 = vmatmul.msk.f32.gmra.mxu3 %vm353_vm0, %v3488_v13 }
  0x33   :  { %2754 = vmatmul.msk.f32.gmra.mxu1 %vm353_vm0, %v3534_v24 }
  0x34   :  { %2927 = vrot.lane.b32.xlu0 %v2921_v49, %s3370_s12 }
  0x35   :  { %2932 = vrot.lane.b32.xlu1 %v2931_v52, %s3372_s14  ;;  %2937 = vrot.lane.b32.xlu2 %v2941_v58, %s3371_s13 }
  0x39   :  { %2780 = vmatmul.msk.f32.gmra.mxu3 %vm353_vm0, %v3500_v15 }
  0x3b   :  { %2755 = vmatmul.msk.f32.gmra.mxu1 %vm353_vm0, %v3539_v25 }
  0x3c   :  { %2942 = vrot.lane.b32.xlu0 %v2941_v58, %s3370_s12 }
  0x3d   :  { %2947 = vrot.lane.b32.xlu1 %v2946_v62, %s3372_s14  ;;  %2952 = vrot.lane.b32.xlu2 %v2956_v18, %s3371_s13 }
  0x41   :  { %2781 = vmatmul.msk.f32.gmra.mxu3 %vm353_vm0, %v3505_v16 }
  0x43   :  { %2756 = vmatmul.msk.f32.gmra.mxu1 %vm353_vm0, %v3568_v33 }
  0x44   :  { %2957 = vrot.lane.b32.xlu0 %v2956_v18, %s3370_s12 }
  0x45   :  { %2962 = vrot.lane.b32.xlu1 %v2961_v20, %s3372_s14  ;;  %2967 = vrot.lane.b32.xlu2 %v2971_v22, %s3371_s13  ;;  %v2991_v20 = vpack.i.bf16 %v3832_v12, %v3815_v63 }
  0x49   :  { %2782 = vmatmul.msk.f32.gmra.mxu3 %vm353_vm0, %v3534_v24 }
  0x4b   :  { %2757 = vmatmul.msk.f32.gmra.mxu1 %vm353_vm0, %v3579_v36 }
  0x4c   :  { %2972 = vrot.lane.b32.xlu0 %v2971_v22, %s3370_s12 }
  0x4d   :  { %2977 = vrot.lane.b32.xlu1 %v2976_v27, %s3372_s14  ;;  %305 = vrot.lane.b32.xlu2 %v3759_v26, %s3371_s13 }
  0x51   :  { %2783 = vmatmul.msk.f32.gmra.mxu3 %vm353_vm0, %v3539_v25 }
  0x53   :  { %2758 = vmatmul.msk.f32.gmra.mxu1 %vm353_vm0, %v3608_v44 }
  0x54   :  { %307 = vrot.lane.b32.xlu0 %v3766_v29, %s3371_s13 }
  0x55   :  { %2982 = vrot.lane.b32.xlu1 %v2981_v43, %s3370_s12  ;;  %224 = vrot.lane.b32.xlu2 %v3766_v29, %s3372_s14 }
  0x59   :  { %2784 = vmatmul.msk.f32.gmra.mxu3 %vm353_vm0, %v3568_v33 }
  0x5b   :  { %2759 = vmatmul.msk.f32.gmra.mxu1 %vm353_vm0, %v3619_v47 }
  0x5d   :  { %311 = vrot.lane.b32.xlu2 %v3815_v63, %s3371_s13 }
  0x5f   :  { %v2858_v38 = vpop.permute.xlu2 %2857 }
  0x60   :  { %v2859_v53 = vunpack.i.l.bf16 %v2858_v38  ;;  %v2860_v60 = vunpack.i.h.bf16 %v2858_v38 }
  0x61   :  { %2785 = vmatmul.msk.f32.gmra.mxu3 %vm353_vm0, %v3579_v36 }
  0x63   :  { %2760 = vmatmul.msk.f32.gmra.mxu1 %vm353_vm0, %v3636_v51 }
  0x67   :  { %v2863_v54 = vpop.permute.xlu2 %2862 }
  0x68   :  { %v2864_v56 = vunpack.i.l.bf16 %v2863_v54  ;;  %v2865_v7 = vunpack.i.h.bf16 %v2863_v54 }
  0x69   :  { %2786 = vmatmul.msk.f32.gmra.mxu3 %vm353_vm0, %v3608_v44 }
  0x6b   :  { %2761 = vmatmul.msk.f32.gmra.mxu1 %vm353_vm0, %v3667_v57 }
  0x6f   :  { %v2878_v11 = vpop.permute.xlu2 %2877 }
  0x70   :  { %v2879_v22 = vunpack.i.l.bf16 %v2878_v11 }
  0x71   :  { %2787 = vmatmul.msk.f32.gmra.mxu3 %vm353_vm0, %v3619_v47 }
  0x73   :  { %2762 = vmatmul.msk.f32.gmra.mxu1 %vm353_vm0, %v3680_v61 }
  0x76   :  { %v2838_v23 = vpop.permute.xlu0 %2837 }
  0x77   :  { %v2848_v28 = vpop.permute.xlu1 %2847  ;;  %v2839_v30 = vunpack.i.l.bf16 %v2838_v23  ;;  %v2840_v40 = vunpack.i.h.bf16 %v2838_v23 }
  0x78   :  { %v2849_v32 = vunpack.i.l.bf16 %v2848_v28  ;;  %v2850_v46 = vunpack.i.h.bf16 %v2848_v28 }
  0x79   :  { %v354_v37 = vsel %vm353_vm0, %v39_v31, %v2839_v30  ;;  %v355_v48 = vsel %vm353_vm0, %v3440_v0, %v2840_v40  ;;  %v3796_v0 = vld [vmem:[%s6257_s0 + $0xb8] sm:$0xff]  ;;  %v3851_v31 = vld [vmem:[%s6257_s0 + $0xd0] sm:$0xff]  ;;  %2788 = vmatmul.msk.f32.gmra.mxu3 %vm353_vm0, %v3636_v51 }
  0x7a   :  { %309 = vrot.lane.b32.xlu0 %v3796_v0, %s3371_s13  ;;  %226 = vrot.lane.b32.xlu1 %v3796_v0, %s3372_s14  ;;  %v2986_v6 = vpack.i.bf16 %v3815_v63, %v3796_v0 }
  0x7b   :  { %2763 = vmatmul.msk.f32.gmra.mxu1 %vm353_vm0, %v3721_v17 }
  0x7e   :  { %v2843_v34 = vpop.permute.xlu0 %2842 }
  0x7f   :  { %v2844_v35 = vunpack.i.l.bf16 %v2843_v34  ;;  %v2845_v42 = vunpack.i.h.bf16 %v2843_v34  ;;  %v2853_v45 = vpop.permute.xlu1 %2852  ;;  %v3001_v34 = vpack.i.bf16 %v3851_v31, %v3832_v12 }
  0x80   :  { %v2854_v50 = vunpack.i.l.bf16 %v2853_v45  ;;  %v2855_v59 = vunpack.i.h.bf16 %v2853_v45 }
  0x81   :  { %v383_v39 = vsel %vm382_vm1, %v354_v37, %v2844_v35  ;;  %v384_v49 = vsel %vm382_vm1, %v355_v48, %v2845_v42  ;;  %v2880_v35 = vunpack.i.h.bf16 %v2878_v11  ;;  %2997 = vrot.lane.b32.xlu2 %v3001_v34, %s3371_s13  ;;  %2789 = vmatmul.msk.f32.gmra.mxu3 %vm353_vm0, %v3667_v57 }
  0x82   :  { %v412_v41 = vsel %vm411_vm2, %v383_v39, %v2849_v32  ;;  %v413_v52 = vsel %vm411_vm2, %v384_v49, %v2850_v46  ;;  %v356_v55 = vsel %vm353_vm0, %v3445_v1, %v2854_v50  ;;  %v357_v3 = vsel %vm353_vm0, %v3450_v2, %v2855_v59  ;;  %2987 = vrot.lane.b32.xlu0 %v2986_v6, %s3370_s12 }
  0x83   :  { %559 = vmatmul.f32.vlgmr.msra.gmra.mxu0 %v412_v41  ;;  %761 = vmatmul.f32.vlgmr.msra.gmra.mxu2 %v412_v41  ;;  %v385_v58 = vsel %vm382_vm1, %v356_v55, %v2859_v53  ;;  %v386_v10 = vsel %vm382_vm1, %v357_v3, %v2860_v60  ;;  %v2893_v41 = vpop.permute.xlu2 %2892 }
  0x84   :  { %2764 = vmatmul.msk.f32.gmra.mxu1 %vm353_vm0, %v3734_v19  ;;  %v414_v1 = vsel %vm411_vm2, %v385_v58, %v2864_v56  ;;  %v415_v14 = vsel %vm411_vm2, %v386_v10, %v2865_v7  ;;  %2992 = vrot.lane.b32.xlu1 %v2991_v20, %s3372_s14  ;;  %v2894_v46 = vunpack.i.l.bf16 %v2893_v41  ;;  %v2895_v54 = vunpack.i.h.bf16 %v2893_v41 }
  0x86   :  { %v2868_v62 = vpop.permute.xlu0 %2867 }
  0x87   :  { %v2869_v8 = vunpack.i.l.bf16 %v2868_v62  ;;  %v2873_v9 = vpop.permute.xlu1 %2872 }
  0x88   :  { %v2874_v2 = vunpack.i.l.bf16 %v2873_v9  ;;  %v2875_v28 = vunpack.i.h.bf16 %v2873_v9 }
  0x89   :  { %v358_v18 = vsel %vm353_vm0, %v3457_v4, %v2869_v8  ;;  %v2870_v4 = vunpack.i.h.bf16 %v2868_v62  ;;  %v3900_v8 = vld [vmem:[%s6257_s0 + $0xe0] sm:$0xff]  ;;  %2790 = vmatmul.msk.f32.gmra.mxu3 %vm353_vm0, %v3680_v61 }
  0x8a   :  { %v387_v23 = vsel %vm382_vm1, %v358_v18, %v2874_v2  ;;  %3002 = vrot.lane.b32.xlu0 %v3001_v34, %s3370_s12 }
  0x8b   :  { %562 = vmatmul.f32.gmra.mxu0 %v413_v52  ;;  %764 = vmatmul.f32.gmra.mxu2 %v413_v52  ;;  %v416_v27 = vsel %vm411_vm2, %v387_v23, %v2879_v22  ;;  %v359_v32 = vsel %vm353_vm0, %v3462_v5, %v2870_v4  ;;  %v3866_v5 = vld [vmem:[%s6257_s0 + $0xd8] sm:$0xff] }
  0x8c   :  { %2765 = vmatmul.msk.f32.gmra.mxu1 %vm353_vm0, %v3746_v21  ;;  %v388_v39 = vsel %vm382_vm1, %v359_v32, %v2875_v28  ;;  %v3006_v45 = vpack.i.bf16 %v3866_v5, %v3851_v31  ;;  %v3011_v10 = vpack.i.bf16 %v3900_v8, %v3866_v5 }
  0x8d   :  { %v417_v42 = vsel %vm411_vm2, %v388_v39, %v2880_v35 }
  0x8e   :  { %v2883_v30 = vpop.permute.xlu0 %2882  ;;  %3007 = vrot.lane.b32.xlu1 %v3006_v45, %s3372_s14  ;;  %3012 = vrot.lane.b32.xlu2 %v3011_v10, %s3371_s13 }
  0x8f   :  { %v2884_v37 = vunpack.i.l.bf16 %v2883_v30  ;;  %v2888_v38 = vpop.permute.xlu1 %2887  ;;  %v2885_v49 = vunpack.i.h.bf16 %v2883_v30  ;;  %v3918_v30 = vpop.f32.mrf.mxu1 }
  0x90   :  { %v2889_v40 = vunpack.i.l.bf16 %v2888_v38 }
  0x91   :  { %v360_v43 = vsel %vm353_vm0, %v3488_v13, %v2884_v37  ;;  %v2890_v13 = vunpack.i.h.bf16 %v2888_v38  ;;  %v361_v53 = vsel %vm353_vm0, %v3500_v15, %v2885_v49  ;;  %v1438_v37 = vld [vmem:[%s6260_s3 + $0xf0] sm:$0xff]  ;;  %2791 = vmatmul.msk.f32.gmra.mxu3 %vm353_vm0, %v3721_v17 }
  0x92   :  { %v389_v48 = vsel %vm382_vm1, %v360_v43, %v2889_v40  ;;  %1645 = vmatpush.msrb.mxu1 %v1438_v37  ;;  %3017 = vrot.lane.b32.xlu0 %v3011_v10, %s3370_s12 }
  0x93   :  { %565 = vmatmul.f32.gmra.mxu0 %v414_v1  ;;  %767 = vmatmul.f32.gmra.mxu2 %v414_v1  ;;  %v418_v50 = vsel %vm411_vm2, %v389_v48, %v2894_v46  ;;  %v390_v58 = vsel %vm382_vm1, %v361_v53, %v2890_v13  ;;  %v2908_v1 = vpop.permute.xlu2 %2907  ;;  %v3945_v13 = vld [vmem:[%s6257_s0 + $0xe8] sm:$0xff] }
  0x94   :  { %2766 = vmatmul.msk.f32.gmra.mxu1 %vm353_vm0, %v3759_v26  ;;  %v419_v60 = vsel %vm411_vm2, %v390_v58, %v2895_v54  ;;  %v2909_v62 = vunpack.i.l.bf16 %v2908_v1  ;;  %v2910_v11 = vunpack.i.h.bf16 %v2908_v1  ;;  %v1432_v54 = vld [vmem:[%s6260_s3 + $0xc0] sm:$0xff]  ;;  %v1430_v58 = vld [vmem:[%s6260_s3 + $0xb0] sm:$0xff] }
  0x96   :  { %v2898_v52 = vpop.permute.xlu0 %2897 }
  0x97   :  { %v2899_v55 = vunpack.i.l.bf16 %v2898_v52  ;;  %v2903_v56 = vpop.permute.xlu1 %2902  ;;  %v2900_v6 = vunpack.i.h.bf16 %v2898_v52  ;;  %v3931_v46 = vpop.f32.mrf.mxu1 }
  0x98   :  { %v2904_v59 = vunpack.i.l.bf16 %v2903_v56 }
  0x99   :  { %v362_v15 = vsel %vm353_vm0, %v3505_v16, %v2899_v55  ;;  %v2905_v16 = vunpack.i.h.bf16 %v2903_v56  ;;  %v363_v2 = vsel %vm353_vm0, %v3534_v24, %v2900_v6  ;;  %2792 = vmatmul.msk.f32.gmra.mxu3 %vm353_vm0, %v3734_v19 }
  0x9a   :  { %v391_v3 = vsel %vm382_vm1, %v362_v15, %v2904_v59  ;;  %v1428_v59 = vld [vmem:[%s6260_s3 + $0xa0] sm:$0xff] }
  0x9b   :  { %568 = vmatmul.f32.gmra.mxu0 %v415_v14  ;;  %770 = vmatmul.f32.gmra.mxu2 %v415_v14  ;;  %v420_v7 = vsel %vm411_vm2, %v391_v3, %v2909_v62  ;;  %v392_v20 = vsel %vm382_vm1, %v363_v2, %v2905_v16  ;;  %v2923_v23 = vpop.permute.xlu2 %2922  ;;  %v1426_v3 = vld [vmem:[%s6260_s3 + $0x90] sm:$0xff] }
  0x9c   :  { %2767 = vmatmul.msk.f32.gmra.mxu1 %vm353_vm0, %v3766_v29  ;;  %v421_v4 = vsel %vm411_vm2, %v392_v20, %v2910_v11  ;;  %v2925_v39 = vunpack.i.h.bf16 %v2923_v23  ;;  %v1422_v2 = vld [vmem:[%s6260_s3 + $0x70] sm:$0xff] }
  0x9e   :  { %v2913_v9 = vpop.permute.xlu0 %2912 }
  0x9f   :  { %v2914_v14 = vunpack.i.l.bf16 %v2913_v9  ;;  %v2918_v18 = vpop.permute.xlu1 %2917  ;;  %v2915_v32 = vunpack.i.h.bf16 %v2913_v9  ;;  %v3966_v15 = vpop.f32.mrf.mxu1  ;;  %v1424_v9 = vld [vmem:[%s6260_s3 + $0x80] sm:$0xff] }
  0xa0   :  { %v2919_v22 = vunpack.i.l.bf16 %v2918_v18  ;;  %v2920_v35 = vunpack.i.h.bf16 %v2918_v18 }
  0xa1   :  { %v364_v24 = vsel %vm353_vm0, %v3539_v25, %v2914_v14  ;;  %v365_v38 = vsel %vm353_vm0, %v3568_v33, %v2915_v32  ;;  %v1436_v33 = vld [vmem:[%s6260_s3 + $0xe0] sm:$0xff]  ;;  %2793 = vmatmul.msk.f32.gmra.mxu3 %vm353_vm0, %v3746_v21  ;;  %v4011_v32 = vld [vmem:[%s6257_s0 + $0xf8] sm:$0xff] }
  0xa2   :  { %v393_v28 = vsel %vm382_vm1, %v364_v24, %v2919_v22  ;;  %1646 = vmatpush.msrb.mxu1 %v1436_v33  ;;  %v1418_v24 = vld [vmem:[%s6260_s3 + $0x50] sm:$0xff]  ;;  %v1408_v33 = vld [vmem:[%s6260_s3] sm:$0xff] }
  0xa3   :  { %571 = vmatmul.f32.gmra.mxu0 %v416_v27  ;;  %773 = vmatmul.f32.gmra.mxu2 %v416_v27  ;;  %v2924_v27 = vunpack.i.l.bf16 %v2923_v23  ;;  %v2938_v45 = vpop.permute.xlu2 %2937  ;;  %v1420_v23 = vld [vmem:[%s6260_s3 + $0x60] sm:$0xff] }
  0xa4   :  { %2768 = vmatmul.msk.f32.gmra.mxu1 %vm353_vm0, %v3796_v0  ;;  %v2939_v52 = vunpack.i.l.bf16 %v2938_v45  ;;  %v2940_v6 = vunpack.i.h.bf16 %v2938_v45  ;;  %v3989_v18 = vpop.f32.mrf.mxu3 }
  0xa5   :  { %v422_v34 = vsel %vm411_vm2, %v393_v28, %v2924_v27 }
  0xa6   :  { %v2928_v25 = vpop.permute.xlu0 %2927 }
  0xa7   :  { %v2929_v40 = vunpack.i.l.bf16 %v2928_v25  ;;  %v2933_v41 = vpop.permute.xlu1 %2932  ;;  %v2930_v55 = vunpack.i.h.bf16 %v2928_v25  ;;  %v4001_v28 = vpop.f32.mrf.mxu1  ;;  %v1414_v25 = vld [vmem:[%s6260_s3 + $0x30] sm:$0xff] }
  0xa8   :  { %v2934_v43 = vunpack.i.l.bf16 %v2933_v41  ;;  %v2935_v1 = vunpack.i.h.bf16 %v2933_v41 }
  0xa9   :  { %v366_v49 = vsel %vm353_vm0, %v3579_v36, %v2929_v40  ;;  %v3021_v36 = vpack.i.bf16 %v3945_v13, %v3900_v8  ;;  %v367_v62 = vsel %vm353_vm0, %v3608_v44, %v2930_v55  ;;  %v3982_v44 = vld [vmem:[%s6257_s0 + $0xf0] sm:$0xff]  ;;  %2794 = vmatmul.msk.f32.gmra.mxu3 %vm353_vm0, %v3759_v26  ;;  %s2740_s0 = sshll.u32 %s6268_s11, 4  ;;  %s2741_s0 = int_to_ptr.hbm [resolvable:$true] %s2740_s0 }
  0xaa   :  { %v395_v53 = vsel %vm382_vm1, %v366_v49, %v2934_v43  ;;  %v396_v10 = vsel %vm382_vm1, %v367_v62, %v2935_v1  ;;  %v1470_v43 = vld [vmem:[%s6260_s3 + $0x1f0] sm:$0xff] }
  0xab   :  { %574 = vmatmul.f32.gmra.mxu0 %v417_v42  ;;  %776 = vmatmul.f32.gmra.mxu2 %v417_v42  ;;  %v394_v42 = vsel %vm382_vm1, %v365_v38, %v2920_v35  ;;  %v424_v56 = vsel %vm411_vm2, %v395_v53, %v2939_v52  ;;  %v2953_v14 = vpop.permute.xlu2 %2952  ;;  %v425_v20 = vsel %vm411_vm2, %v396_v10, %v2940_v6  ;;  %v1412_v38 = vld [vmem:[%s6260_s3 + $0x20] sm:$0xff] }
  0xac   :  { %2769 = vmatmul.msk.f32.gmra.mxu1 %vm353_vm0, %v3815_v63  ;;  %v423_v48 = vsel %vm411_vm2, %v394_v42, %v2925_v39  ;;  %3022 = vrot.lane.b32.xlu1 %v3021_v36, %s3372_s14  ;;  %v4019_v37 = vpop.f32.mrf.mxu3  ;;  %v1410_v42 = vld [vmem:[%s6260_s3 + $0x10] sm:$0xff]  ;;  %v2955_v45 = vunpack.i.h.bf16 %v2953_v14 }
  0xad   :  { %1692 = vmatpush.msrb.mxu3 %v1470_v43 }
  0xaf   :  { %v2948_v16 = vpop.permute.xlu1 %2947  ;;  %v4040_v52 = vpop.f32.mrf.mxu1 }
  0xb0   :  { %v2949_v11 = vunpack.i.l.bf16 %v2948_v16  ;;  %v2950_v39 = vunpack.i.h.bf16 %v2948_v16 }
  0xb1   :  { %2795 = vmatmul.msk.f32.gmra.mxu3 %vm353_vm0, %v3766_v29 }
  0xb3   :  { %577 = vmatmul.f32.gmra.mxu0 %v418_v50  ;;  %779 = vmatmul.f32.gmra.mxu2 %v418_v50  ;;  %v1434_v50 = vld [vmem:[%s6260_s3 + $0xd0] sm:$0xff]  ;;  %v2968_v53 = vpop.permute.xlu2 %2967 }
  0xb4   :  { %2770 = vmatmul.msk.f32.gmra.mxu1 %vm353_vm0, %v3832_v12 }
  0xb5   :  { %1647 = vmatpush.msrb.mxu1 %v1434_v50  ;;  %v3026_v50 = vpack.i.bf16 %v3982_v44, %v3945_v13 }
  0xb7   :  { %1648 = vmatpush.msrb.mxu1 %v1432_v54  ;;  %v2963_v49 = vpop.permute.xlu1 %2962  ;;  %v4042_v54 = vpop.f32.mrf.mxu3  ;;  %3027 = vrot.lane.b32.xlu2 %v3026_v50, %s3371_s13 }
  0xb8   :  { %v2964_v36 = vunpack.i.l.bf16 %v2963_v49  ;;  %v4062_v16 = vpop.f32.mrf.mxu1 }
  0xb9   :  { %1649 = vmatpush.msrb.mxu1 %v1430_v58  ;;  %v2969_v58 = vunpack.i.l.bf16 %v2968_v53  ;;  %2796 = vmatmul.msk.f32.gmra.mxu3 %vm353_vm0, %v3796_v0 }
  0xbb   :  { %580 = vmatmul.f32.gmra.mxu0 %v419_v60  ;;  %782 = vmatmul.f32.gmra.mxu2 %v419_v60  ;;  %v2943_v60 = vpop.permute.xlu0 %2942 }
  0xbc   :  { %2771 = vmatmul.msk.f32.gmra.mxu1 %vm353_vm0, %v3851_v31 }
  0xbd   :  { %1650 = vmatpush.msrb.mxu1 %v1428_v59  ;;  %v480_v59 = vld [vmem:[%s6259_s2] sm:$0x3] }
  0xbe   :  { %v4064_v10 = vperm.slane %v480_v59, 1 }
  0xbf   :  { %1651 = vmatpush.msrb.mxu1 %v1426_v3  ;;  %v4057_v3 = vperm.slane %v480_v59, 0 }
  0xc1   :  { %1652 = vmatpush.msrb.mxu1 %v1424_v9  ;;  %v2965_v9 = vunpack.i.h.bf16 %v2963_v49  ;;  %2797 = vmatmul.msk.f32.gmra.mxu3 %vm353_vm0, %v3815_v63 }
  0xc3   :  { %583 = vmatmul.f32.gmra.mxu0 %v420_v7  ;;  %785 = vmatmul.f32.gmra.mxu2 %v420_v7  ;;  %v2944_v7 = vunpack.i.l.bf16 %v2943_v60  ;;  %v2958_v40 = vpop.permute.xlu0 %2957 }
  0xc4   :  { %2772 = vmatmul.msk.f32.gmra.mxu1 %vm353_vm0, %v3866_v5  ;;  %v2960_v62 = vunpack.i.h.bf16 %v2958_v40 }
  0xc5   :  { %v368_v22 = vsel %vm353_vm0, %v3619_v47, %v2944_v7  ;;  %1653 = vmatpush.msrb.mxu1 %v1422_v2  ;;  %v1416_v47 = vld [vmem:[%s6260_s3 + $0x40] sm:$0xff]  ;;  %v4060_v7 = vpop.f32.mrf.mxu3 }
  0xc6   :  { %v397_v27 = vsel %vm382_vm1, %v368_v22, %v2949_v11  ;;  %v371_v11 = vsel %vm353_vm0, %v3680_v61, %v2960_v62 }
  0xc7   :  { %1654 = vmatpush.msrb.mxu1 %v1420_v23 }
  0xc9   :  { %1655 = vmatpush.msrb.mxu1 %v1418_v24  ;;  %2798 = vmatmul.msk.f32.gmra.mxu3 %vm353_vm0, %v3832_v12 }
  0xcb   :  { %586 = vmatmul.f32.gmra.mxu0 %v421_v4  ;;  %788 = vmatmul.f32.gmra.mxu2 %v421_v4  ;;  %v2954_v4 = vunpack.i.l.bf16 %v2953_v14  ;;  %v2973_v14 = vpop.permute.xlu0 %2972 }
  0xcc   :  { %2773 = vmatmul.msk.f32.gmra.mxu1 %vm353_vm0, %v3900_v8  ;;  %v2974_v23 = vunpack.i.l.bf16 %v2973_v14 }
  0xcd   :  { %v426_v35 = vsel %vm411_vm2, %v397_v27, %v2954_v4  ;;  %1656 = vmatpush.msrb.mxu1 %v1416_v47  ;;  %v2978_v4 = vpop.permute.xlu1 %2977  ;;  %v400_v27 = vsel %vm382_vm1, %v371_v11, %v2965_v9 }
  0xce   :  { %v2979_v61 = vunpack.i.l.bf16 %v2978_v4 }
  0xcf   :  { %1657 = vmatpush.msrb.mxu1 %v1414_v25 }
  0xd1   :  { %1658 = vmatpush.msrb.mxu1 %v1412_v38  ;;  %v4076_v38 = vpop.f32.mrf.mxu3  ;;  %2799 = vmatmul.msk.f32.gmra.mxu3 %vm353_vm0, %v3851_v31 }
  0xd3   :  { %589 = vmatmul.f32.gmra.mxu0 %v422_v34  ;;  %791 = vmatmul.f32.gmra.mxu2 %v422_v34  ;;  %v2945_v34 = vunpack.i.h.bf16 %v2943_v60  ;;  %v1468_v60 = vld [vmem:[%s6260_s3 + $0x1e0] sm:$0xff] }
  0xd4   :  { %2774 = vmatmul.msk.f32.gmra.mxu1 %vm353_vm0, %v3945_v13  ;;  %1693 = vmatpush.msrb.mxu3 %v1468_v60 }
  0xd5   :  { %v369_v41 = vsel %vm353_vm0, %v3636_v51, %v2945_v34  ;;  %1659 = vmatpush.msrb.mxu1 %v1410_v42  ;;  %v4082_v42 = vpop.f32.mrf.mxu1 }
  0xd6   :  { %v398_v51 = vsel %vm382_vm1, %v369_v41, %v2950_v39 }
  0xd7   :  { %1660 = vmatpush.msrb.mxu1 %v1408_v33  ;;  %v427_v55 = vsel %vm411_vm2, %v398_v51, %v2955_v45 }
  0xd9   :  { %v4093_v51 = vpop.f32.mrf.mxu3  ;;  %2800 = vmatmul.msk.f32.gmra.mxu3 %vm353_vm0, %v3866_v5 }
  0xdb   :  { %592 = vmatmul.f32.gmra.mxu0 %v423_v48  ;;  %794 = vmatmul.f32.gmra.mxu2 %v423_v48  ;;  %v2959_v48 = vunpack.i.l.bf16 %v2958_v40  ;;  %v372_v40 = vsel %vm353_vm0, %v3721_v17, %v2974_v23  ;;  %v2975_v17 = vunpack.i.h.bf16 %v2973_v14 }
  0xdc   :  { %2775 = vmatmul.msk.f32.gmra.mxu1 %vm353_vm0, %v3982_v44  ;;  %v401_v43 = vsel %vm382_vm1, %v372_v40, %v2979_v61 }
  0xdd   :  { %v4098_v60 = vpop.f32.mrf.mxu1 }
  0xe1   :  { %2801 = vmatmul.msk.f32.gmra.mxu3 %vm353_vm0, %v3900_v8 }
  0xe3   :  { %595 = vmatmul.f32.gmra.mxu0 %v424_v56  ;;  %797 = vmatmul.f32.gmra.mxu2 %v424_v56  ;;  %v370_v56 = vsel %vm353_vm0, %v3667_v57, %v2959_v48 }
  0xe4   :  { %2776 = vmatmul.msk.f32.gmra.mxu1 %vm353_vm0, %v4011_v32  ;;  %v399_v1 = vsel %vm382_vm1, %v370_v56, %v2964_v36 }
  0xe5   :  { %v428_v6 = vsel %vm411_vm2, %v399_v1, %v2969_v58  ;;  %v2983_v58 = vpop.permute.xlu1 %2982  ;;  %v373_v1 = vsel %vm353_vm0, %v3734_v19, %v2975_v17 }
  0xe6   :  { %v2984_v62 = vunpack.i.l.bf16 %v2983_v58 }
  0xe8   :  { %v374_v23 = vsel %vm353_vm0, %v3746_v21, %v2984_v62  ;;  %v4123_v21 = vpop.f32.mrf.mxu1 }
  0xe9   :  { %2802 = vmatmul.msk.f32.gmra.mxu3 %vm353_vm0, %v3945_v13 }
  0xeb   :  { %598 = vmatmul.f32.gmra.mxu0 %v425_v20  ;;  %800 = vmatmul.f32.gmra.mxu2 %v425_v20  ;;  %v2970_v20 = vunpack.i.h.bf16 %v2968_v53  ;;  %v2980_v53 = vunpack.i.h.bf16 %v2978_v4 }
  0xed   :  { %v429_v39 = vsel %vm411_vm2, %v400_v27, %v2970_v20  ;;  %v402_v9 = vsel %vm382_vm1, %v373_v1, %v2980_v53 }
  0xf0   :  { %v4146_v1 = vpop.f32.mrf.mxu1 }
  0xf1   :  { %2803 = vmatmul.msk.f32.gmra.mxu3 %vm353_vm0, %v3982_v44  ;;  %v1460_v44 = vld [vmem:[%s6260_s3 + $0x1a0] sm:$0xff] }
  0xf3   :  { %601 = vmatmul.f32.gmra.mxu0 %v426_v35  ;;  %803 = vmatmul.f32.gmra.mxu2 %v426_v35 }
  0xf9   :  { %2804 = vmatmul.msk.f32.gmra.mxu3 %vm353_vm0, %v4011_v32  ;;  %v1534_v32 = vld [vmem:[%s6260_s3 + $0x3f0] sm:$0xff] }
  0xfa   :  { %1786 = vmatpush.msrb.mxu2 %v1534_v32 }
  0xfb   :  { %604 = vmatmul.f32.gmra.mxu0 %v427_v55  ;;  %806 = vmatmul.f32.gmra.mxu2 %v427_v55  ;;  %v308_v55 = vpop.permute.xlu0 %307 }
  0xfc   :  { %v431_v4 = vsel %vm411_vm2, %v402_v9, %v308_v55 }
 0x100   :  { %v560_v57 = vpop.f32.mrf.mxu0 }
 0x101   :  { %v561_v2 = vadd.f32 %v560_v57, %v4057_v3 }
 0x103   :  { %607 = vmatmul.f32.gmra.mxu0 %v428_v6  ;;  %809 = vmatmul.f32.gmra.mxu2 %v428_v6  ;;  %v662_v47 = vadd.f32 %v3918_v30, %v561_v2  ;;  %v306_v30 = vpop.permute.xlu2 %305 }
 0x104   :  { %v430_v49 = vsel %vm411_vm2, %v401_v43, %v306_v30 }
 0x105   :  { %3184 = vtanh.f32 %v662_v47 }
 0x106   :  { %v762_v22 = vpop.f32.mrf.mxu2 }
 0x107   :  { %v763_v24 = vadd.f32 %v762_v22, %v4064_v10  ;;  %v4110_v22 = vpop.f32.mrf.mxu3 }
 0x108   :  { %v563_v34 = vpop.f32.mrf.mxu0 }
 0x109   :  { %v564_v35 = vadd.f32 %v563_v34, %v4057_v3  ;;  %v864_v25 = vadd.f32 %v3989_v18, %v763_v24  ;;  %v1466_v18 = vld [vmem:[%s6260_s3 + $0x1d0] sm:$0xff] }
 0x10a   :  { %1694 = vmatpush.msrb.mxu3 %v1466_v18 }
 0x10b   :  { %v665_v41 = vadd.f32 %v3931_v46, %v564_v35  ;;  %610 = vmatmul.f32.gmra.mxu0 %v429_v39  ;;  %812 = vmatmul.f32.gmra.mxu2 %v429_v39  ;;  %v3185_v50 = vpop.eup %3184  ;;  %v225_v6 = vpop.permute.xlu2 %224 }
 0x10c   :  { %v403_v47 = vsel %vm382_vm1, %v374_v23, %v225_v6  ;;  %v227_v35 = vpop.permute.xlu1 %226 }
 0x10d   :  { %3186 = vtanh.f32 %v665_v41 }
 0x10e   :  { %v765_v45 = vpop.f32.mrf.mxu2  ;;  %3188 = vtanh.f32 %v864_v25  ;;  %v2985_v25 = vunpack.i.h.bf16 %v2983_v58 }
 0x10f   :  { %v766_v48 = vadd.f32 %v765_v45, %v4064_v10  ;;  %v4126_v40 = vpop.f32.mrf.mxu3 }
 0x110   :  { %v566_v46 = vpop.f32.mrf.mxu0  ;;  %v375_v18 = vsel %vm353_vm0, %v3759_v26, %v2985_v25 }
 0x111   :  { %v867_v33 = vadd.f32 %v4019_v37, %v766_v48  ;;  %v567_v56 = vadd.f32 %v566_v46, %v4057_v3 }
 0x113   :  { %v3187_v36 = vpop.eup %3186  ;;  %3190 = vtanh.f32 %v867_v33  ;;  %613 = vmatmul.f32.gmra.mxu0 %v430_v49  ;;  %815 = vmatmul.f32.gmra.mxu2 %v430_v49  ;;  %v668_v11 = vadd.f32 %v3966_v15, %v567_v56  ;;  %v310_v15 = vpop.permute.xlu0 %309 }
 0x114   :  { %v1003_v59 = vadd.f32 %v3187_v36, %v3185_v50  ;;  %v3189_v2 = vpop.eup %3188  ;;  %v432_v39 = vsel %vm411_vm2, %v403_v47, %v310_v15  ;;  %v2993_v33 = vpop.permute.xlu1 %2992  ;;  %v1464_v50 = vld [vmem:[%s6260_s3 + $0x1c0] sm:$0xff]  ;;  %v404_v36 = vsel %vm382_vm1, %v375_v18, %v227_v35 }
 0x115   :  { %3192 = vtanh.f32 %v668_v11  ;;  %1695 = vmatpush.msrb.mxu3 %v1464_v50  ;;  %v2994_v56 = vunpack.i.l.bf16 %v2993_v33  ;;  %v4162_v15 = vpop.f32.mrf.mxu1 }
 0x116   :  { %v4100_v37 = vpop.f32.mrf.mxu2  ;;  %v4102_v57 = vmul.f32 0.5, %v1003_v59 }
 0x117   :  { %v4144_v59 = vpop.f32.mrf.mxu3 }
 0x118   :  { %v569_v14 = vpop.f32.mrf.mxu0  ;;  %1661 = vmatmul.f32.vlgmr.msrb.gmra.mxu1 %v4102_v57 }
 0x119   :  { %v3191_v19 = vpop.eup %3190  ;;  %v570_v20 = vadd.f32 %v569_v14, %v4057_v3 }
 0x11a   :  { %v4115_v24 = vadd.f32 %v3191_v19, %v3189_v2 }
 0x11b   :  { %v671_v27 = vadd.f32 %v4001_v28, %v570_v20  ;;  %616 = vmatmul.f32.gmra.mxu0 %v431_v4  ;;  %818 = vmatmul.f32.gmra.mxu2 %v431_v4  ;;  %v312_v28 = vpop.permute.xlu2 %311  ;;  %v3193_v41 = vpop.eup %3192  ;;  %v2995_v20 = vunpack.i.h.bf16 %v2993_v33 }
 0x11c   :  { %v2988_v43 = vpop.permute.xlu0 %2987  ;;  %v433_v62 = vsel %vm411_vm2, %v404_v36, %v312_v28 }
 0x11d   :  { %3194 = vtanh.f32 %v671_v27  ;;  %v2989_v49 = vunpack.i.l.bf16 %v2988_v43  ;;  %v2990_v2 = vunpack.i.h.bf16 %v2988_v43 }
 0x11e   :  { %v4119_v34 = vpop.f32.mrf.mxu2 }
 0x11f   :  { %v376_v6 = vsel %vm353_vm0, %v3766_v29, %v2989_v49  ;;  %v4158_v29 = vpop.f32.mrf.mxu3  ;;  %v377_v23 = vsel %vm353_vm0, %v3796_v0, %v2990_v2  ;;  %v1462_v0 = vld [vmem:[%s6260_s3 + $0x1b0] sm:$0xff] }
 0x120   :  { %v572_v61 = vpop.f32.mrf.mxu0  ;;  %v405_v8 = vsel %vm382_vm1, %v376_v6, %v2994_v56  ;;  %1696 = vmatpush.msrb.mxu3 %v1462_v0 }
 0x121   :  { %v573_v45 = vadd.f32 %v572_v61, %v4057_v3  ;;  %v406_v61 = vsel %vm382_vm1, %v377_v23, %v2995_v20 }
 0x122   :  { %1697 = vmatpush.msrb.mxu3 %v1460_v44 }
 0x123   :  { %v3195_v30 = vpop.eup %3194  ;;  %619 = vmatmul.f32.gmra.mxu0 %v432_v39  ;;  %821 = vmatmul.f32.gmra.mxu2 %v432_v39  ;;  %v674_v53 = vadd.f32 %v4040_v52, %v573_v45  ;;  %v2998_v58 = vpop.permute.xlu2 %2997 }
 0x124   :  { %v1007_v48 = vadd.f32 %v3195_v30, %v3193_v41  ;;  %v2999_v9 = vunpack.i.l.bf16 %v2998_v58  ;;  %v3003_v27 = vpop.permute.xlu0 %3002  ;;  %v3000_v47 = vunpack.i.h.bf16 %v2998_v58  ;;  %v3008_v41 = vpop.permute.xlu1 %3007 }
 0x125   :  { %3196 = vtanh.f32 %v674_v53  ;;  %v3004_v28 = vunpack.i.l.bf16 %v3003_v27  ;;  %v3009_v49 = vunpack.i.l.bf16 %v3008_v41  ;;  %v3005_v56 = vunpack.i.h.bf16 %v3003_v27 }
 0x126   :  { %v4131_v17 = vpop.f32.mrf.mxu2  ;;  %v4133_v46 = vmul.f32 0.5, %v1007_v48  ;;  %v434_v19 = vsel %vm411_vm2, %v405_v8, %v2999_v9  ;;  %v435_v45 = vsel %vm411_vm2, %v406_v61, %v3000_v47  ;;  %v772_v27 = vadd.f32 %v4119_v34, %v4064_v10 }
 0x127   :  { %v4181_v50 = vpop.f32.mrf.mxu3  ;;  %v775_v61 = vadd.f32 %v4131_v17, %v4064_v10  ;;  %v1458_v17 = vld [vmem:[%s6260_s3 + $0x190] sm:$0xff] }
 0x128   :  { %v575_v55 = vpop.f32.mrf.mxu0  ;;  %1664 = vmatmul.f32.gmra.mxu1 %v4133_v46  ;;  %v873_v34 = vadd.f32 %v4060_v7, %v772_v27  ;;  %1698 = vmatpush.msrb.mxu3 %v1458_v17 }
 0x129   :  { %v576_v26 = vadd.f32 %v575_v55, %v4057_v3 }
 0x12b   :  { %v677_v52 = vadd.f32 %v4062_v16, %v576_v26  ;;  %622 = vmatmul.f32.gmra.mxu0 %v433_v62  ;;  %824 = vmatmul.f32.gmra.mxu2 %v433_v62  ;;  %v3197_v16 = vpop.eup %3196  ;;  %v3013_v33 = vpop.permute.xlu2 %3012  ;;  %v3010_v62 = vunpack.i.h.bf16 %v3008_v41 }
 0x12c   :  { %v3014_v53 = vunpack.i.l.bf16 %v3013_v33  ;;  %v4191_v26 = vpop.f32.mrf.mxu1 }
 0x12d   :  { %3198 = vtanh.f32 %v677_v52  ;;  %v379_v52 = vsel %vm353_vm0, %v3832_v12, %v3005_v56 }
 0x12e   :  { %v4153_v11 = vpop.f32.mrf.mxu2  ;;  %v408_v20 = vsel %vm382_vm1, %v379_v52, %v3010_v62  ;;  %v1500_v52 = vld [vmem:[%s6260_s3 + $0x2e0] sm:$0xff] }
 0x12f   :  { %v4200_v9 = vpop.f32.mrf.mxu3  ;;  %v778_v12 = vadd.f32 %v4153_v11, %v4064_v10  ;;  %v769_v11 = vadd.f32 %v4100_v37, %v4064_v10  ;;  %v876_v37 = vadd.f32 %v4076_v38, %v775_v61 }
 0x130   :  { %v578_v14 = vpop.f32.mrf.mxu0 }
 0x131   :  { %v579_v35 = vadd.f32 %v578_v14, %v4057_v3  ;;  %v3015_v14 = vunpack.i.h.bf16 %v3013_v33  ;;  %v879_v41 = vadd.f32 %v4093_v51, %v778_v12  ;;  %v870_v7 = vadd.f32 %v4042_v54, %v769_v11  ;;  %v1456_v11 = vld [vmem:[%s6260_s3 + $0x180] sm:$0xff] }
 0x132   :  { %1699 = vmatpush.msrb.mxu3 %v1456_v11 }
 0x133   :  { %v3199_v4 = vpop.eup %3198  ;;  %827 = vmatmul.f32.gmra.mxu2 %v434_v19  ;;  %625 = vmatmul.f32.gmra.mxu0 %v434_v19  ;;  %v680_v30 = vadd.f32 %v4082_v42, %v579_v35  ;;  %v378_v42 = vsel %vm353_vm0, %v3815_v63, %v3004_v28 }
 0x134   :  { %v1011_v25 = vadd.f32 %v3199_v4, %v3197_v16  ;;  %v407_v55 = vsel %vm382_vm1, %v378_v42, %v3009_v49  ;;  %v4213_v4 = vpop.f32.mrf.mxu1  ;;  %v3023_v49 = vpop.permute.xlu1 %3022 }
 0x135   :  { %3200 = vtanh.f32 %v680_v30  ;;  %v3024_v38 = vunpack.i.l.bf16 %v3023_v49  ;;  %v3028_v42 = vpop.permute.xlu2 %3027  ;;  %v3025_v61 = vunpack.i.h.bf16 %v3023_v49 }
 0x136   :  { %v4166_v13 = vpop.f32.mrf.mxu2  ;;  %v4168_v39 = vmul.f32 0.5, %v1011_v25  ;;  %v437_v25 = vsel %vm411_vm2, %v408_v20, %v3015_v14  ;;  %v3029_v44 = vunpack.i.l.bf16 %v3028_v42 }
 0x137   :  { %v4234_v30 = vpop.f32.mrf.mxu3 }
 0x138   :  { %v581_v43 = vpop.f32.mrf.mxu0  ;;  %1667 = vmatmul.f32.gmra.mxu1 %v4168_v39  ;;  %v3031_v18 = vpack.i.bf16 %v4168_v39, %v4133_v46 }
 0x139   :  { %v582_v48 = vadd.f32 %v581_v43, %v4057_v3  ;;  %v3018_v43 = vpop.permute.xlu0 %3017 }
 0x13a   :  { %3032 = vrot.lane.b32.xlu0 %v3031_v18, %s3373_s22 }
 0x13b   :  { %v683_v36 = vadd.f32 %v4098_v60, %v582_v48  ;;  %830 = vmatmul.f32.gmra.mxu2 %v435_v45  ;;  %628 = vmatmul.f32.gmra.mxu0 %v435_v45  ;;  %v436_v60 = vsel %vm411_vm2, %v407_v55, %v3014_v53  ;;  %v3201_v6 = vpop.eup %3200  ;;  %v3019_v48 = vunpack.i.l.bf16 %v3018_v43 }
 0x13c   :  { %v4240_v45 = vpop.f32.mrf.mxu1 }
 0x13d   :  { %3202 = vtanh.f32 %v683_v36  ;;  %v380_v54 = vsel %vm353_vm0, %v3851_v31, %v3019_v48 }
 0x13e   :  { %v4193_v58 = vpop.f32.mrf.mxu2  ;;  %v409_v56 = vsel %vm382_vm1, %v380_v54, %v3024_v38 }
 0x13f   :  { %v438_v31 = vsel %vm411_vm2, %v409_v56, %v3029_v44 }
 0x140   :  { %v584_v63 = vpop.f32.mrf.mxu0 }
 0x141   :  { %v585_v19 = vadd.f32 %v584_v63, %v4057_v3 }
 0x143   :  { %v3203_v8 = vpop.eup %3202  ;;  %833 = vmatmul.f32.gmra.mxu2 %v436_v60  ;;  %631 = vmatmul.f32.gmra.mxu0 %v436_v60  ;;  %v686_v47 = vadd.f32 %v4123_v21, %v585_v19  ;;  %v1502_v21 = vld [vmem:[%s6260_s3 + $0x2f0] sm:$0xff] }
 0x144   :  { %v1015_v2 = vadd.f32 %v3203_v8, %v3201_v6  ;;  %1739 = vmatpush.msrb.mxu0 %v1502_v21  ;;  %v1532_v6 = vld [vmem:[%s6260_s3 + $0x3e0] sm:$0xff]  ;;  %v4256_v8 = vpop.f32.mrf.mxu3 }
 0x145   :  { %3204 = vtanh.f32 %v686_v47  ;;  %1787 = vmatpush.msrb.mxu2 %v1532_v6  ;;  %v1528_v6 = vld [vmem:[%s6260_s3 + $0x3c0] sm:$0xff] }
 0x146   :  { %v4204_v16 = vmul.f32 0.5, %v1015_v2  ;;  %v4206_v23 = vpop.f32.mrf.mxu2  ;;  %1740 = vmatpush.msrb.mxu0 %v1500_v52 }
 0x148   :  { %v587_v35 = vpop.f32.mrf.mxu0  ;;  %1670 = vmatmul.f32.gmra.mxu1 %v4204_v16 }
 0x149   :  { %v588_v28 = vadd.f32 %v587_v35, %v4057_v3  ;;  %v3020_v35 = vunpack.i.h.bf16 %v3018_v43 }
 0x14b   :  { %v689_v0 = vadd.f32 %v4146_v1, %v588_v28  ;;  %836 = vmatmul.f32.gmra.mxu2 %v437_v25  ;;  %634 = vmatmul.f32.gmra.mxu0 %v437_v25  ;;  %v3205_v18 = vpop.eup %3204 }
 0x14d   :  { %3206 = vtanh.f32 %v689_v0  ;;  %v381_v0 = vsel %vm353_vm0, %v3866_v5, %v3020_v35 }
 0x14e   :  { %v4237_v51 = vpop.f32.mrf.mxu2  ;;  %3208 = vtanh.f32 %v879_v41  ;;  %v3030_v41 = vunpack.i.h.bf16 %v3028_v42  ;;  %v1530_v42 = vld [vmem:[%s6260_s3 + $0x3d0] sm:$0xff] }
 0x14f   :  { %3210 = vtanh.f32 %v873_v34  ;;  %v410_v34 = vsel %vm382_vm1, %v381_v0, %v3025_v61  ;;  %1788 = vmatpush.msrb.mxu2 %v1530_v42  ;;  %v781_v42 = vadd.f32 %v4166_v13, %v4064_v10 }
 0x150   :  { %v590_v1 = vpop.f32.mrf.mxu0  ;;  %3212 = vtanh.f32 %v876_v37  ;;  %v439_v17 = vsel %vm411_vm2, %v410_v34, %v3030_v41  ;;  %v1526_v34 = vld [vmem:[%s6260_s3 + $0x3b0] sm:$0xff] }
 0x151   :  { %3214 = vtanh.f32 %v870_v7  ;;  %v591_v53 = vadd.f32 %v590_v1, %v4057_v3  ;;  %v4281_v1 = vpop.f32.mrf.mxu3  ;;  %1789 = vmatpush.msrb.mxu2 %v1528_v6  ;;  %v882_v13 = vadd.f32 %v4110_v22, %v781_v42 }
 0x153   :  { %v3207_v33 = vpop.eup %3206  ;;  %v692_v14 = vadd.f32 %v4162_v15, %v591_v53  ;;  %637 = vmatmul.f32.gmra.mxu0 %v438_v31  ;;  %839 = vmatmul.f32.gmra.mxu2 %v438_v31  ;;  %v703_v15 = vpop.f32.mrf.mxu1 }
 0x154   :  { %v1019_v36 = vadd.f32 %v3207_v33, %v3205_v18  ;;  %v3209_v55 = vpop.eup %3208  ;;  %1790 = vmatpush.msrb.mxu2 %v1526_v34 }
 0x155   :  { %v3211_v63 = vpop.eup %3210  ;;  %3216 = vtanh.f32 %v692_v14 }
 0x156   :  { %v4246_v60 = vmul.f32 0.5, %v1019_v36  ;;  %v4248_v62 = vpop.f32.mrf.mxu2  ;;  %v3213_v2 = vpop.eup %3212  ;;  %v1498_v36 = vld [vmem:[%s6260_s3 + $0x2d0] sm:$0xff] }
 0x157   :  { %v1012_v32 = vadd.f32 %v3213_v2, %v3209_v55  ;;  %v3215_v12 = vpop.eup %3214  ;;  %1741 = vmatpush.msrb.mxu0 %v1498_v36 }
 0x158   :  { %v593_v19 = vpop.f32.mrf.mxu0  ;;  %1673 = vmatmul.f32.gmra.mxu1 %v4246_v60  ;;  %v3036_v20 = vpack.i.bf16 %v4246_v60, %v4204_v16  ;;  %v1008_v47 = vadd.f32 %v3215_v12, %v3211_v63  ;;  %v1454_v63 = vld [vmem:[%s6260_s3 + $0x170] sm:$0xff] }
 0x159   :  { %v594_v27 = vadd.f32 %v593_v19, %v4057_v3  ;;  %v4266_v28 = vmul.f32 0.5, %v1012_v32  ;;  %v4298_v55 = vpop.f32.mrf.mxu3  ;;  %1700 = vmatpush.msrb.mxu3 %v1454_v63 }
 0x15a   :  { %3037 = vrot.lane.b32.xlu1 %v3036_v20, %s3373_s22 }
 0x15b   :  { %v695_v25 = vadd.f32 %v4191_v26, %v594_v27  ;;  %v4276_v26 = vmul.f32 0.5, %v1008_v47  ;;  %640 = vmatmul.f32.gmra.mxu0 %v439_v17  ;;  %842 = vmatmul.f32.gmra.mxu2 %v439_v17  ;;  %v3217_v43 = vpop.eup %3216  ;;  %v706_v49 = vpop.f32.mrf.mxu1  ;;  %v1496_v27 = vld [vmem:[%s6260_s3 + $0x2c0] sm:$0xff] }
 0x15c   :  { %v1452_v47 = vld [vmem:[%s6260_s3 + $0x160] sm:$0xff]  ;;  %1742 = vmatpush.msrb.mxu0 %v1496_v27 }
 0x15d   :  { %3218 = vtanh.f32 %v695_v25  ;;  %v3061_v7 = vpack.i.bf16 %v4266_v28, %v4276_v26  ;;  %1701 = vmatpush.msrb.mxu3 %v1452_v47  ;;  %v1492_v27 = vld [vmem:[%s6260_s3 + $0x2a0] sm:$0xff]  ;;  %v1442_v47 = vld [vmem:[%s6260_s3 + $0x110] sm:$0xff] }
 0x15e   :  { %v4274_v21 = vpop.f32.mrf.mxu2 }
 0x160   :  { %v596_v37 = vpop.f32.mrf.mxu0 }
 0x161   :  { %v597_v48 = vadd.f32 %v596_v37, %v4057_v3  ;;  %v4308_v20 = vpop.f32.mrf.mxu3  ;;  %v790_v37 = vadd.f32 %v4237_v51, %v4064_v10 }
 0x162   :  { %3062 = vrot.lane.b32.xlu1 %v3061_v7, %s3373_s22  ;;  %v784_v7 = vadd.f32 %v4193_v58, %v4064_v10 }
 0x163   :  { %v3219_v5 = vpop.eup %3218  ;;  %v698_v53 = vadd.f32 %v4213_v4, %v597_v48  ;;  %v709_v52 = vpop.f32.mrf.mxu1  ;;  %v891_v51 = vadd.f32 %v4158_v29, %v790_v37  ;;  %v1448_v29 = vld [vmem:[%s6260_s3 + $0x140] sm:$0xff] }
 0x164   :  { %v1023_v18 = vadd.f32 %v3219_v5, %v3217_v43  ;;  %v3051_v5 = vpack.i.bf16 %v4266_v28, %v4168_v39  ;;  %v885_v36 = vadd.f32 %v4126_v40, %v784_v7  ;;  %v1494_v40 = vld [vmem:[%s6260_s3 + $0x2b0] sm:$0xff] }
 0x165   :  { %3220 = vtanh.f32 %v698_v53  ;;  %1743 = vmatpush.msrb.mxu0 %v1494_v40 }
 0x166   :  { %v4285_v33 = vmul.f32 0.5, %v1023_v18  ;;  %v4287_v38 = vpop.f32.mrf.mxu2  ;;  %v787_v18 = vadd.f32 %v4206_v23, %v4064_v10  ;;  %v1450_v23 = vld [vmem:[%s6260_s3 + $0x150] sm:$0xff] }
 0x167   :  { %1702 = vmatpush.msrb.mxu3 %v1450_v23  ;;  %v799_v22 = vadd.f32 %v4287_v38, %v4064_v10  ;;  %v1524_v38 = vld [vmem:[%s6260_s3 + $0x3a0] sm:$0xff]  ;;  %1744 = vmatpush.msrb.mxu0 %v1492_v27 }
 0x168   :  { %v599_v44 = vpop.f32.mrf.mxu0  ;;  %1676 = vmatmul.f32.gmra.mxu1 %v4285_v33  ;;  %1791 = vmatpush.msrb.mxu2 %v1524_v38 }
 0x169   :  { %v600_v54 = vadd.f32 %v599_v44, %v4057_v3  ;;  %v4328_v17 = vpop.f32.mrf.mxu3  ;;  %1703 = vmatpush.msrb.mxu3 %v1448_v29 }
 0x16b   :  { %v701_v56 = vadd.f32 %v4240_v45, %v600_v54  ;;  %v3221_v2 = vpop.eup %3220  ;;  %v712_v41 = vpop.f32.mrf.mxu1  ;;  %v888_v54 = vadd.f32 %v4144_v59, %v787_v18 }
 0x16d   :  { %3222 = vtanh.f32 %v701_v56 }
 0x16e   :  { %v801_v4 = vpop.f32.mrf.mxu2 }
 0x16f   :  { %v802_v6 = vadd.f32 %v801_v4, %v4064_v10  ;;  %v1444_v4 = vld [vmem:[%s6260_s3 + $0x120] sm:$0xff] }
 0x170   :  { %v602_v31 = vpop.f32.mrf.mxu0 }
 0x171   :  { %v603_v45 = vadd.f32 %v602_v31, %v4057_v3 }
 0x173   :  { %v3223_v14 = vpop.eup %3222  ;;  %v704_v35 = vadd.f32 %v703_v15, %v603_v45  ;;  %v4343_v58 = vpop.f32.mrf.mxu1 }
 0x174   :  { %v1027_v19 = vadd.f32 %v3223_v14, %v3221_v2  ;;  %v4363_v2 = vpop.f32.mrf.mxu3  ;;  %v1446_v14 = vld [vmem:[%s6260_s3 + $0x130] sm:$0xff] }
 0x175   :  { %3224 = vtanh.f32 %v704_v35  ;;  %1704 = vmatpush.msrb.mxu3 %v1446_v14 }
 0x176   :  { %v4310_v32 = vmul.f32 0.5, %v1027_v19  ;;  %v4312_v12 = vpop.f32.mrf.mxu2 }
 0x177   :  { %1705 = vmatpush.msrb.mxu3 %v1444_v4  ;;  %v1490_v4 = vld [vmem:[%s6260_s3 + $0x290] sm:$0xff] }
 0x178   :  { %v605_v25 = vpop.f32.mrf.mxu0  ;;  %1679 = vmatmul.f32.gmra.mxu1 %v4310_v32  ;;  %v3041_v61 = vpack.i.bf16 %v4310_v32, %v4285_v33  ;;  %1745 = vmatpush.msrb.mxu0 %v1490_v4 }
 0x179   :  { %v606_v11 = vadd.f32 %v605_v25, %v4057_v3  ;;  %v900_v25 = vadd.f32 %v4234_v30, %v799_v22  ;;  %1706 = vmatpush.msrb.mxu3 %v1442_v47  ;;  %v805_v30 = vadd.f32 %v4312_v12, %v4064_v10  ;;  %v1520_v47 = vld [vmem:[%s6260_s3 + $0x380] sm:$0xff] }
 0x17a   :  { %3042 = vrot.lane.b32.xlu2 %v3041_v61, %s3373_s22 }
 0x17b   :  { %v707_v0 = vadd.f32 %v706_v49, %v606_v11  ;;  %v3225_v48 = vpop.eup %3224  ;;  %v718_v61 = vpop.f32.mrf.mxu1 }
 0x17d   :  { %3226 = vtanh.f32 %v707_v0 }
 0x17e   :  { %v807_v15 = vpop.f32.mrf.mxu2  ;;  %3228 = vtanh.f32 %v891_v51 }
 0x17f   :  { %3230 = vtanh.f32 %v885_v36  ;;  %v808_v34 = vadd.f32 %v807_v15, %v4064_v10 }
 0x180   :  { %v608_v43 = vpop.f32.mrf.mxu0  ;;  %3232 = vtanh.f32 %v888_v54 }
 0x181   :  { %v609_v44 = vadd.f32 %v608_v43, %v4057_v3  ;;  %3234 = vtanh.f32 %v882_v13  ;;  %v909_v42 = vadd.f32 %v4298_v55, %v808_v34 }
 0x182   :  { %3052 = vrot.lane.b32.xlu2 %v3051_v5, %s3374_s16 }
 0x183   :  { %v3227_v49 = vpop.eup %3226  ;;  %v710_v59 = vadd.f32 %v709_v52, %v609_v44  ;;  %v903_v52 = vadd.f32 %v4256_v8, %v802_v6  ;;  %v906_v44 = vadd.f32 %v4281_v1, %v805_v30  ;;  %v721_v29 = vpop.f32.mrf.mxu1 }
 0x184   :  { %v1031_v53 = vadd.f32 %v3227_v49, %v3225_v48  ;;  %v3229_v35 = vpop.eup %3228  ;;  %v4395_v48 = vpop.f32.mrf.mxu3 }
 0x185   :  { %3236 = vtanh.f32 %v710_v59  ;;  %v3231_v8 = vpop.eup %3230 }
 0x186   :  { %v4350_v56 = vmul.f32 0.5, %v1031_v53  ;;  %v4352_v63 = vpop.f32.mrf.mxu2  ;;  %v3233_v0 = vpop.eup %3232 }
 0x187   :  { %v1020_v37 = vadd.f32 %v3233_v0, %v3229_v35  ;;  %v3235_v43 = vpop.eup %3234 }
 0x188   :  { %v611_v31 = vpop.f32.mrf.mxu0  ;;  %1682 = vmatmul.f32.gmra.mxu1 %v4350_v56  ;;  %v1016_v18 = vadd.f32 %v3235_v43, %v3231_v8 }
 0x189   :  { %v612_v19 = vadd.f32 %v611_v31, %v4057_v3  ;;  %v4398_v51 = vmul.f32 0.5, %v1020_v37 }
 0x18a   :  { %1308 = vrot.lane.b32.xlu2 %v4246_v60, %s3370_s12  ;;  %v4402_v23 = vmul.f32 0.5, %v1016_v18 }
 0x18b   :  { %v713_v45 = vadd.f32 %v712_v41, %v612_v19  ;;  %v1440_v41 = vld [vmem:[%s6260_s3 + $0x100] sm:$0xff]  ;;  %v3237_v5 = vpop.eup %3236  ;;  %v1522_v19 = vld [vmem:[%s6260_s3 + $0x390] sm:$0xff]  ;;  %v724_v34 = vpop.f32.mrf.mxu1 }
 0x18c   :  { %1707 = vmatpush.msrb.mxu3 %v1440_v41  ;;  %v3091_v59 = vpack.i.bf16 %v4398_v51, %v4402_v23  ;;  %1792 = vmatpush.msrb.mxu2 %v1522_v19  ;;  %v811_v41 = vadd.f32 %v4352_v63, %v4064_v10 }
 0x18d   :  { %3238 = vtanh.f32 %v713_v45 }
 0x18e   :  { %v813_v11 = vpop.f32.mrf.mxu2  ;;  %3240 = vtanh.f32 %v903_v52  ;;  %1793 = vmatpush.msrb.mxu2 %v1520_v47 }
 0x18f   :  { %3242 = vtanh.f32 %v900_v25  ;;  %v814_v27 = vadd.f32 %v813_v11, %v4064_v10 }
 0x190   :  { %v614_v7 = vpop.f32.mrf.mxu0  ;;  %3244 = vtanh.f32 %v909_v42 }
 0x191   :  { %v615_v36 = vadd.f32 %v614_v7, %v4057_v3  ;;  %3246 = vtanh.f32 %v906_v44  ;;  %v915_v37 = vadd.f32 %v4328_v17, %v814_v27  ;;  %v1488_v7 = vld [vmem:[%s6260_s3 + $0x280] sm:$0xff]  ;;  %v1518_v44 = vld [vmem:[%s6260_s3 + $0x370] sm:$0xff] }
 0x192   :  { %1312 = vrot.lane.b32.xlu2 %v4285_v33, %s3370_s12  ;;  %1746 = vmatpush.msrb.mxu0 %v1488_v7 }
 0x193   :  { %v3239_v49 = vpop.eup %3238  ;;  %v716_v55 = vadd.f32 %v4343_v58, %v615_v36  ;;  %v4419_v58 = vpop.f32.mrf.mxu3  ;;  %1794 = vmatpush.msrb.mxu2 %v1518_v44 }
 0x194   :  { %v1035_v15 = vadd.f32 %v3239_v49, %v3237_v5  ;;  %v3241_v53 = vpop.eup %3240  ;;  %v912_v5 = vadd.f32 %v4308_v20, %v811_v41 }
 0x195   :  { %v3243_v40 = vpop.eup %3242  ;;  %3248 = vtanh.f32 %v716_v55 }
 0x196   :  { %v4404_v12 = vmul.f32 0.5, %v1035_v15  ;;  %v4406_v54 = vpop.f32.mrf.mxu2  ;;  %v1028_v13 = vadd.f32 %v3243_v40, %v3241_v53  ;;  %v3245_v52 = vpop.eup %3244 }
 0x197   :  { %v3247_v38 = vpop.eup %3246  ;;  %v727_v40 = vpop.f32.mrf.mxu1 }
 0x198   :  { %v617_v6 = vpop.f32.mrf.mxu0  ;;  %1685 = vmatmul.f32.gmra.mxu1 %v4404_v12  ;;  %v3046_v1 = vpack.i.bf16 %v4404_v12, %v4350_v56  ;;  %v4417_v22 = vmul.f32 0.5, %v1028_v13  ;;  %v1032_v35 = vadd.f32 %v3247_v38, %v3245_v52  ;;  %v3081_v52 = vpack.i.bf16 %v4398_v51, %v4246_v60 }
 0x199   :  { %v618_v31 = vadd.f32 %v617_v6, %v4057_v3  ;;  %v1006_v6 = vmul.f32 0.5, %v4115_v24  ;;  %v793_v24 = vadd.f32 %v4248_v62, %v4064_v10  ;;  %v1484_v62 = vld [vmem:[%s6260_s3 + $0x260] sm:$0xff] }
 0x19a   :  { %3092 = vrot.lane.b32.xlu2 %v3091_v59, %s3373_s22  ;;  %3047 = vrot.lane.b32.xlu0 %v3046_v1, %s3373_s22  ;;  %v4435_v8 = vpack.i.bf16 %v4417_v22, %v4310_v32  ;;  %v4448_v43 = vmul.f32 0.5, %v1032_v35 }
 0x19b   :  { %v719_v14 = vadd.f32 %v718_v61, %v618_v31  ;;  %v3056_v61 = vpack.i.bf16 %v4402_v23, %v4204_v16  ;;  %v3249_v0 = vpop.eup %3248  ;;  %v4456_v42 = vpop.f32.mrf.mxu3  ;;  %v796_v31 = vadd.f32 %v4274_v21, %v4064_v10  ;;  %v1486_v21 = vld [vmem:[%s6260_s3 + $0x270] sm:$0xff] }
 0x19c   :  { %v3111_v36 = vpack.i.bf16 %v4448_v43, %v4350_v56  ;;  %1747 = vmatpush.msrb.mxu0 %v1486_v21 }
 0x19d   :  { %3250 = vtanh.f32 %v719_v14  ;;  %v897_v35 = vadd.f32 %v4200_v9, %v796_v31 }
 0x19e   :  { %v4427_v45 = vpop.f32.mrf.mxu2  ;;  %3252 = vtanh.f32 %v915_v37  ;;  %1748 = vmatpush.msrb.mxu0 %v1484_v62 }
 0x19f   :  { %3254 = vtanh.f32 %v912_v5  ;;  %v730_v9 = vpop.f32.mrf.mxu1  ;;  %v820_v44 = vadd.f32 %v4427_v45, %v4064_v10  ;;  %v1474_v45 = vld [vmem:[%s6260_s3 + $0x210] sm:$0xff] }
 0x1a0   :  { %v620_v25 = vpop.f32.mrf.mxu0 }
 0x1a1   :  { %v621_v63 = vadd.f32 %v620_v25, %v4057_v3 }
 0x1a2   :  { %3102 = vrot.lane.b32.xlu2 %v4435_v8, %s3375_s23  ;;  %3057 = vrot.lane.b32.xlu0 %v3056_v61, %s3375_s23 }
 0x1a3   :  { %v3251_v11 = vpop.eup %3250  ;;  %v722_v17 = vadd.f32 %v721_v29, %v621_v63  ;;  %v4483_v38 = vpop.f32.mrf.mxu3 }
 0x1a4   :  { %v1039_v30 = vadd.f32 %v3251_v11, %v3249_v0  ;;  %v3253_v13 = vpop.eup %3252  ;;  %v1482_v11 = vld [vmem:[%s6260_s3 + $0x250] sm:$0xff] }
 0x1a5   :  { %3256 = vtanh.f32 %v722_v17  ;;  %v3255_v1 = vpop.eup %3254  ;;  %1749 = vmatpush.msrb.mxu0 %v1482_v11 }
 0x1a6   :  { %v4452_v18 = vmul.f32 0.5, %v1039_v30  ;;  %v4454_v49 = vpop.f32.mrf.mxu2  ;;  %v1036_v19 = vadd.f32 %v3255_v1, %v3253_v13  ;;  %v1480_v30 = vld [vmem:[%s6260_s3 + $0x240] sm:$0xff]  ;;  %v817_v1 = vadd.f32 %v4406_v54, %v4064_v10 }
 0x1a7   :  { %1750 = vmatpush.msrb.mxu0 %v1480_v30  ;;  %v1476_v13 = vld [vmem:[%s6260_s3 + $0x220] sm:$0xff] }
 0x1a8   :  { %v623_v15 = vpop.f32.mrf.mxu0  ;;  %1688 = vmatmul.f32.gmra.mxu1 %v4452_v18  ;;  %v4498_v41 = vmul.f32 0.5, %v1036_v19  ;;  %v1472_v19 = vld [vmem:[%s6260_s3 + $0x200] sm:$0xff] }
 0x1a9   :  { %v624_v53 = vadd.f32 %v623_v15, %v4057_v3 }
 0x1aa   :  { %3112 = vrot.lane.b32.xlu2 %v3111_v36, %s3375_s23  ;;  %3067 = vrot.lane.b32.xlu0 %v3056_v61, %s3374_s16  ;;  %v4522_v15 = vpack.i.bf16 %v4498_v41, %v4404_v12 }
 0x1ab   :  { %v725_v20 = vadd.f32 %v724_v34, %v624_v53  ;;  %v3257_v27 = vpop.eup %3256  ;;  %v894_v34 = vadd.f32 %v4181_v50, %v793_v24  ;;  %v921_v24 = vadd.f32 %v4395_v48, %v820_v44 }
 0x1ac   :  { %v4467_v29 = vpop.permute.xlu0 %3032 }
 0x1ad   :  { %3258 = vtanh.f32 %v725_v20  ;;  %v3034_v55 = vunpack.i.l.bf16 %v4467_v29  ;;  %v3035_v25 = vunpack.i.h.bf16 %v4467_v29  ;;  %v4534_v20 = vpop.f32.mrf.mxu3  ;;  %v1437_v29 = vld [vmem:[%s6260_s3 + $0xe8] sm:$0xff] }
 0x1ae   :  { %v4471_v59 = vpop.f32.mrf.mxu2  ;;  %3260 = vtanh.f32 %v897_v35  ;;  %v918_v35 = vadd.f32 %v4363_v2, %v817_v1  ;;  %v1598_v1 = vld [vmem:[%s6260_s3 + $0x5f0] sm:$0xff] }
 0x1af   :  { %v4478_v14 = vsel %vm1119_vm3, %v1006_v6, %v3034_v55  ;;  %v4515_v50 = vsel %vm1119_vm3, %v4276_v26, %v3035_v25  ;;  %v1516_v26 = vld [vmem:[%s6260_s3 + $0x360] sm:$0xff]  ;;  %3262 = vtanh.f32 %v894_v34  ;;  %1880 = vmatpush.msra.mxu3 %v1598_v1 }
 0x1b0   :  { %1708 = vmatmul.f32.vlgmr.msrb.gmra.mxu3 %v4478_v14  ;;  %v626_v4 = vpop.f32.mrf.mxu0  ;;  %1795 = vmatpush.msrb.mxu2 %v1516_v26 }
 0x1b1   :  { %v627_v61 = vadd.f32 %v626_v4, %v4057_v3 }
 0x1b2   :  { %3122 = vrot.lane.b32.xlu2 %v3111_v36, %s3374_s16  ;;  %3082 = vrot.lane.b32.xlu0 %v3081_v52, %s3374_s16  ;;  %v1478_v36 = vld [vmem:[%s6260_s3 + $0x230] sm:$0xff] }
 0x1b3   :  { %v3259_v47 = vpop.eup %3258  ;;  %v728_v63 = vadd.f32 %v727_v40, %v627_v61  ;;  %1751 = vmatpush.msrb.mxu0 %v1478_v36 }
 0x1b4   :  { %v1043_v0 = vadd.f32 %v3259_v47, %v3257_v27  ;;  %v3261_v6 = vpop.eup %3260  ;;  %v733_v27 = vpop.f32.mrf.mxu1 }
 0x1b5   :  { %3264 = vtanh.f32 %v728_v63  ;;  %1752 = vmatpush.msrb.mxu0 %v1476_v13  ;;  %v3263_v4 = vpop.eup %3262 }
 0x1b6   :  { %v4504_v37 = vmul.f32 0.5, %v1043_v0  ;;  %v4506_v7 = vpop.f32.mrf.mxu2  ;;  %v1024_v21 = vadd.f32 %v3263_v4, %v3261_v6  ;;  %v935_v0 = vpop.f32.mrf.mxu3 }
 0x1b7   :  { %1753 = vmatpush.msrb.mxu0 %v1474_v45 }
 0x1b8   :  { %1711 = vmatmul.f32.gmra.mxu3 %v4515_v50  ;;  %v629_v5 = vpop.f32.mrf.mxu0  ;;  %v3071_v17 = vpack.i.bf16 %v4504_v37, %v4452_v18  ;;  %v4560_v62 = vmul.f32 0.5, %v1024_v21 }
 0x1b9   :  { %v630_v53 = vadd.f32 %v629_v5, %v4057_v3  ;;  %1754 = vmatpush.msrb.mxu0 %v1472_v19 }
 0x1ba   :  { %3072 = vrot.lane.b32.xlu1 %v3071_v17, %s3373_s22  ;;  %3132 = vrot.lane.b32.xlu2 %v4522_v15, %s3374_s16  ;;  %v3086_v30 = vpack.i.bf16 %v4560_v62, %v4285_v33  ;;  %v3116_v36 = vpack.i.bf16 %v4417_v22, %v4560_v62 }
 0x1bb   :  { %v731_v40 = vadd.f32 %v730_v9, %v630_v53  ;;  %1316 = vrot.lane.b32.xlu0 %v4310_v32, %s3370_s12  ;;  %v3265_v54 = vpop.eup %3264 }
 0x1bc   :  { %v736_v53 = vpop.f32.mrf.mxu1 }
 0x1bd   :  { %3266 = vtanh.f32 %v731_v40 }
 0x1be   :  { %v4548_v31 = vpop.f32.mrf.mxu2  ;;  %3268 = vtanh.f32 %v921_v24  ;;  %v938_v24 = vpop.f32.mrf.mxu3 }
 0x1bf   :  { %3270 = vtanh.f32 %v918_v35 }
 0x1c0   :  { %v632_v47 = vpop.f32.mrf.mxu0 }
 0x1c1   :  { %v633_v48 = vadd.f32 %v632_v47, %v4057_v3 }
 0x1c2   :  { %3077 = vrot.lane.b32.xlu1 %v3081_v52, %s3375_s23  ;;  %1332 = vrot.lane.b32.xlu2 %v4504_v37, %s3370_s12  ;;  %v1514_v52 = vld [vmem:[%s6260_s3 + $0x350] sm:$0xff] }
 0x1c3   :  { %v3267_v61 = vpop.eup %3266  ;;  %1320 = vrot.lane.b32.xlu0 %v4350_v56, %s3370_s12  ;;  %1796 = vmatpush.msrb.mxu2 %v1514_v52  ;;  %v734_v9 = vadd.f32 %v733_v27, %v633_v48  ;;  %v823_v48 = vadd.f32 %v4454_v49, %v4064_v10 }
 0x1c4   :  { %v1047_v34 = vadd.f32 %v3267_v61, %v3265_v54  ;;  %v3269_v5 = vpop.eup %3268  ;;  %v826_v54 = vadd.f32 %v4471_v59, %v4064_v10  ;;  %v1566_v59 = vld [vmem:[%s6260_s3 + $0x4f0] sm:$0xff] }
 0x1c5   :  { %v3271_v44 = vpop.eup %3270  ;;  %3272 = vtanh.f32 %v734_v9  ;;  %1833 = vmatpush.msra.mxu1 %v1566_v59  ;;  %v924_v49 = vadd.f32 %v4419_v58, %v823_v48  ;;  %v1596_v9 = vld [vmem:[%s6260_s3 + $0x5e0] sm:$0xff] }
 0x1c6   :  { %v834_v11 = vpop.f32.mrf.mxu2  ;;  %v4563_v2 = vmul.f32 0.5, %v1047_v34  ;;  %v1040_v13 = vadd.f32 %v3271_v44, %v3269_v5  ;;  %v927_v34 = vadd.f32 %v4456_v42, %v826_v54  ;;  %1881 = vmatpush.msra.mxu3 %v1596_v9  ;;  %v1564_v58 = vld [vmem:[%s6260_s3 + $0x4e0] sm:$0xff]  ;;  %v1594_v5 = vld [vmem:[%s6260_s3 + $0x5d0] sm:$0xff] }
 0x1c7   :  { %v835_v17 = vadd.f32 %v834_v11, %v4064_v10  ;;  %1834 = vmatpush.msra.mxu1 %v1564_v58  ;;  %v1510_v9 = vld [vmem:[%s6260_s3 + $0x330] sm:$0xff] }
 0x1c8   :  { %v635_v63 = vpop.f32.mrf.mxu0  ;;  %v4591_v47 = vmul.f32 0.5, %v1040_v13  ;;  %1882 = vmatpush.msra.mxu3 %v1594_v5 }
 0x1c9   :  { %v636_v26 = vadd.f32 %v635_v63, %v4057_v3  ;;  %v936_v45 = vadd.f32 %v935_v0, %v835_v17 }
 0x1ca   :  { %3087 = vrot.lane.b32.xlu1 %v3086_v30, %s3375_s23  ;;  %1336 = vrot.lane.b32.xlu2 %v4563_v2, %s3370_s12 }
 0x1cb   :  { %3117 = vrot.lane.b32.xlu0 %v3116_v36, %s3373_s22  ;;  %v737_v40 = vadd.f32 %v736_v53, %v636_v26  ;;  %v3273_v61 = vpop.eup %3272  ;;  %v3136_v36 = vpack.i.bf16 %v4591_v47, %v4452_v18 }
 0x1cc   :  { %v4578_v6 = vpop.permute.xlu1 %3037 }
 0x1cd   :  { %v3039_v19 = vunpack.i.l.bf16 %v4578_v6  ;;  %3274 = vtanh.f32 %v737_v40  ;;  %v3040_v0 = vunpack.i.h.bf16 %v4578_v6 }
 0x1ce   :  { %v837_v4 = vpop.f32.mrf.mxu2  ;;  %3276 = vtanh.f32 %v936_v45 }
 0x1cf   :  { %v838_v21 = vadd.f32 %v837_v4, %v4064_v10  ;;  %v4589_v27 = vsel %vm1119_vm3, %v4266_v28, %v3039_v19  ;;  %v4623_v42 = vsel %vm1119_vm3, %v4402_v23, %v3040_v0  ;;  %v1562_v4 = vld [vmem:[%s6260_s3 + $0x4d0] sm:$0xff] }
 0x1d0   :  { %1714 = vmatmul.f32.gmra.mxu3 %v4589_v27  ;;  %1835 = vmatpush.msra.mxu1 %v1562_v4 }
 0x1d1   :  { %v939_v35 = vadd.f32 %v938_v24, %v838_v21 }
 0x1d2   :  { %3097 = vrot.lane.b32.xlu1 %v3086_v30, %s3374_s16  ;;  %1113 = vrot.lane.b32.xlu2 %v4591_v47, %s3373_s22 }
 0x1d3   :  { %v3275_v28 = vpop.eup %3274  ;;  %3278 = vtanh.f32 %v939_v35  ;;  %3127 = vrot.lane.b32.xlu0 %v4522_v15, %s3375_s23  ;;  %v1512_v15 = vld [vmem:[%s6260_s3 + $0x340] sm:$0xff]  ;;  %v941_v35 = vpop.f32.mrf.mxu3 }
 0x1d4   :  { %v4608_v11 = vpop.permute.xlu2 %3042  ;;  %v1051_v52 = vadd.f32 %v3275_v28, %v3273_v61  ;;  %v3277_v30 = vpop.eup %3276  ;;  %1797 = vmatpush.msrb.mxu2 %v1512_v15  ;;  %3280 = vtanh.f32 %v927_v34  ;;  %v1560_v61 = vld [vmem:[%s6260_s3 + $0x4c0] sm:$0xff]  ;;  %v1590_v15 = vld [vmem:[%s6260_s3 + $0x5b0] sm:$0xff] }
 0x1d5   :  { %v4617_v63 = vpop.permute.xlu1 %3062  ;;  %3282 = vtanh.f32 %v924_v49  ;;  %v3044_v44 = vunpack.i.l.bf16 %v4608_v11  ;;  %1836 = vmatpush.msra.mxu1 %v1560_v61  ;;  %v3045_v49 = vunpack.i.h.bf16 %v4608_v11  ;;  %v1544_v61 = vld [vmem:[%s6260_s3 + $0x440] sm:$0xff] }
 0x1d6   :  { %v3064_v23 = vunpack.i.l.bf16 %v4617_v63  ;;  %v4637_v53 = vmul.f32 0.5, %v1051_v52  ;;  %v840_v1 = vpop.f32.mrf.mxu2  ;;  %v1556_v52 = vld [vmem:[%s6260_s3 + $0x4a0] sm:$0xff]  ;;  %1798 = vmatpush.msrb.mxu2 %v1510_v9 }
 0x1d7   :  { %v4664_v48 = vsel %vm1119_vm3, %v4398_v51, %v3044_v44 }
 0x1d8   :  { %1717 = vmatmul.f32.gmra.mxu3 %v4623_v42  ;;  %v1120_v54 = vsel %vm1119_vm3, %v3034_v55, %v3064_v23  ;;  %v1558_v55 = vld [vmem:[%s6260_s3 + $0x4b0] sm:$0xff]  ;;  %v841_v23 = vadd.f32 %v840_v1, %v4064_v10 }
 0x1d9   :  { %v3279_v17 = vpop.eup %3278  ;;  %1837 = vmatpush.msra.mxu1 %v1558_v55  ;;  %v1542_v55 = vld [vmem:[%s6260_s3 + $0x430] sm:$0xff] }
 0x1da   :  { %3107 = vrot.lane.b32.xlu1 %v4435_v8, %s3374_s16  ;;  %v1052_v26 = vadd.f32 %v3279_v17, %v3277_v30  ;;  %v1592_v8 = vld [vmem:[%s6260_s3 + $0x5c0] sm:$0xff]  ;;  %v3281_v24 = vpop.eup %3280  ;;  %v829_v30 = vadd.f32 %v4506_v7, %v4064_v10  ;;  %v832_v17 = vadd.f32 %v4548_v31, %v4064_v10  ;;  %v4710_v31 = vsel %vm1119_vm3, %v4560_v62, %v3045_v49 }
 0x1db   :  { %3137 = vrot.lane.b32.xlu0 %v3136_v36, %s3375_s23  ;;  %1883 = vmatpush.msra.mxu3 %v1592_v8  ;;  %v3283_v59 = vpop.eup %3282  ;;  %v1588_v7 = vld [vmem:[%s6260_s3 + $0x5a0] sm:$0xff]  ;;  %v944_v8 = vpop.f32.mrf.mxu3 }
 0x1dc   :  { %v4641_v40 = vpop.permute.xlu2 %3052  ;;  %v4643_v13 = vmul.f32 0.5, %v1052_v26  ;;  %v1044_v34 = vadd.f32 %v3283_v59, %v3281_v24  ;;  %1838 = vmatpush.msra.mxu1 %v1556_v52  ;;  %v1552_v26 = vld [vmem:[%s6260_s3 + $0x480] sm:$0xff]  ;;  %v930_v1 = vadd.f32 %v4483_v38, %v829_v30  ;;  %v1550_v24 = vld [vmem:[%s6260_s3 + $0x470] sm:$0xff]  ;;  %v3141_v59 = vpack.i.bf16 %v4498_v41, %v4448_v43 }
 0x1dd   :  { %v3054_v45 = vunpack.i.l.bf16 %v4641_v40  ;;  %1884 = vmatpush.msra.mxu3 %v1590_v15  ;;  %v1548_v38 = vld [vmem:[%s6260_s3 + $0x460] sm:$0xff] }
 0x1de   :  { %v3171_v21 = vpack.i.bf16 %v4643_v13, %v4637_v53  ;;  %v843_v58 = vpop.f32.mrf.mxu2  ;;  %v4692_v5 = vmul.f32 0.5, %v1044_v34  ;;  %3284 = vtanh.f32 %v930_v1  ;;  %v1508_v34 = vld [vmem:[%s6260_s3 + $0x320] sm:$0xff] }
 0x1df   :  { %v4669_v28 = vsel %vm1192_vm4, %v1120_v54, %v3054_v45  ;;  %v844_v4 = vadd.f32 %v843_v58, %v4064_v10  ;;  %1885 = vmatpush.msra.mxu3 %v1588_v7  ;;  %v942_v10 = vadd.f32 %v941_v35, %v841_v23  ;;  %v638_v35 = vpop.f32.mrf.mxu0  ;;  %1799 = vmatpush.msrb.mxu2 %v1508_v34  ;;  %v1540_v15 = vld [vmem:[%s6260_s3 + $0x420] sm:$0xff]  ;;  %v1506_v23 = vld [vmem:[%s6260_s3 + $0x310] sm:$0xff] }
 0x1e0   :  { %3172 = vrot.lane.b32.xlu2 %v3171_v21, %s3375_s23  ;;  %1720 = vmatmul.f32.gmra.mxu3 %v4664_v48  ;;  %v933_v21 = vadd.f32 %v4534_v20, %v832_v17  ;;  %v3156_v54 = vpack.i.bf16 %v4692_v5, %v4504_v37  ;;  %v1546_v37 = vld [vmem:[%s6260_s3 + $0x450] sm:$0xff]  ;;  %v1584_v30 = vld [vmem:[%s6260_s3 + $0x580] sm:$0xff]  ;;  %v739_v17 = vpop.f32.mrf.mxu1 }
 0x1e1   :  { %1755 = vmatmul.f32.vlgmr.msrb.gmra.mxu0 %v4669_v28  ;;  %v1586_v20 = vld [vmem:[%s6260_s3 + $0x590] sm:$0xff]  ;;  %1800 = vmatpush.msrb.mxu2 %v1506_v23  ;;  %v1536_v7 = vld [vmem:[%s6260_s3 + $0x400] sm:$0xff] }
 0x1e2   :  { %1324 = vrot.lane.b32.xlu1 %v4404_v12, %s3370_s12  ;;  %3286 = vtanh.f32 %v933_v21  ;;  %1886 = vmatpush.msra.mxu3 %v1586_v20  ;;  %v639_v21 = vadd.f32 %v638_v35, %v4057_v3 }
 0x1e3   :  { %3147 = vrot.lane.b32.xlu0 %v3136_v36, %s3374_s16  ;;  %v1554_v36 = vld [vmem:[%s6260_s3 + $0x490] sm:$0xff]  ;;  %3288 = vtanh.f32 %v942_v10 }
 0x1e4   :  { %1839 = vmatpush.msra.mxu1 %v1554_v36  ;;  %v3285_v52 = vpop.eup %3284  ;;  %1887 = vmatpush.msra.mxu3 %v1584_v30  ;;  %v4797_v34 = vpop.permute.xlu2 %1308 }
 0x1e6   :  { %1840 = vmatpush.msra.mxu1 %v1552_v26  ;;  %v1504_v26 = vld [vmem:[%s6260_s3 + $0x300] sm:$0xff] }
 0x1e7   :  { %1801 = vmatpush.msrb.mxu2 %v1504_v26 }
 0x1e8   :  { %1310 = vrot.lane.b32.xlu2 %v4398_v51, %s3370_s12  ;;  %1723 = vmatmul.f32.gmra.mxu3 %v4710_v31  ;;  %v945_v51 = vadd.f32 %v944_v8, %v844_v4  ;;  %v3287_v9 = vpop.eup %3286  ;;  %v641_v4 = vpop.f32.mrf.mxu0 }
 0x1e9   :  { %1841 = vmatpush.msra.mxu1 %v1550_v24  ;;  %v3289_v58 = vpop.eup %3288  ;;  %v1048_v1 = vadd.f32 %v3287_v9, %v3285_v52  ;;  %v1582_v24 = vld [vmem:[%s6260_s3 + $0x570] sm:$0xff]  ;;  %v642_v10 = vadd.f32 %v641_v4, %v4057_v3  ;;  %v742_v20 = vpop.f32.mrf.mxu1  ;;  %v1576_v3 = vld [vmem:[%s6260_s3 + $0x540] sm:$0xff] }
 0x1ea   :  { %1328 = vrot.lane.b32.xlu1 %v4452_v18, %s3370_s12  ;;  %3290 = vtanh.f32 %v945_v51  ;;  %1888 = vmatpush.msra.mxu3 %v1582_v24  ;;  %v1570_v4 = vld [vmem:[%s6260_s3 + $0x510] sm:$0xff] }
 0x1eb   :  { %3157 = vrot.lane.b32.xlu0 %v3156_v54, %s3374_s16  ;;  %1842 = vmatpush.msra.mxu1 %v1548_v38  ;;  %v1050_v51 = vmul.f32 0.5, %v1048_v1 }
 0x1ed   :  { %1843 = vmatpush.msra.mxu1 %v1546_v37  ;;  %v1580_v37 = vld [vmem:[%s6260_s3 + $0x560] sm:$0xff]  ;;  %v3161_v35 = vpack.i.bf16 %v1050_v51, %v4563_v2 }
 0x1ee   :  { %1889 = vmatpush.msra.mxu3 %v1580_v37  ;;  %v1616_v37 = vld [vmem:[%s6260_s3 + $0x680] sm:$0xff] }
 0x1ef   :  { %1844 = vmatpush.msra.mxu1 %v1544_v61  ;;  %v740_v61 = vadd.f32 %v739_v17, %v639_v21  ;;  %v3055_v17 = vunpack.i.h.bf16 %v4641_v40  ;;  %v3065_v40 = vunpack.i.h.bf16 %v4617_v63  ;;  %1934 = vmatpush.msra.mxu0 %v1616_v37 }
 0x1f0   :  { %1322 = vrot.lane.b32.xlu2 %v4448_v43, %s3370_s12  ;;  %v3291_v36 = vpop.eup %3290 }
 0x1f1   :  { %1845 = vmatpush.msra.mxu1 %v1542_v55  ;;  %v1056_v8 = vadd.f32 %v3291_v36, %v3289_v58  ;;  %3292 = vtanh.f32 %v740_v61  ;;  %v1574_v55 = vld [vmem:[%s6260_s3 + $0x530] sm:$0xff]  ;;  %v1572_v58 = vld [vmem:[%s6260_s3 + $0x520] sm:$0xff]  ;;  %v1193_v1 = vsel %vm1192_vm4, %v3054_v45, %v3055_v17 }
 0x1f2   :  { %3142 = vrot.lane.b32.xlu1 %v3141_v59, %s3373_s22  ;;  %v743_v59 = vadd.f32 %v742_v20, %v642_v10  ;;  %v1568_v45 = vld [vmem:[%s6260_s3 + $0x500] sm:$0xff]  ;;  %v1439_v10 = vld [vmem:[%s6260_s3 + $0xf8] sm:$0xff] }
 0x1f3   :  { %1340 = vrot.lane.b32.xlu0 %v4637_v53, %s3370_s12  ;;  %1846 = vmatpush.msra.mxu1 %v1540_v15  ;;  %v1538_v53 = vld [vmem:[%s6260_s3 + $0x410] sm:$0xff]  ;;  %v1058_v38 = vmul.f32 0.5, %v1056_v8  ;;  %v1503_v20 = vld [vmem:[%s6260_s3 + $0x2f8] sm:$0xff] }
 0x1f4   :  { %3294 = vtanh.f32 %v743_v59  ;;  %1974 = vmatpush.msra.mxu2 %v1439_v10 }
 0x1f5   :  { %1847 = vmatpush.msra.mxu1 %v1538_v53  ;;  %v4820_v53 = vpop.permute.xlu2 %1312 }
 0x1f6   :  { %1975 = vmatpush.msra.mxu2 %v1437_v29 }
 0x1f7   :  { %1848 = vmatpush.msra.mxu1 %v1536_v7  ;;  %v3293_v2 = vpop.eup %3292 }
 0x1f8   :  { %1334 = vrot.lane.b32.xlu2 %v4692_v5, %s3370_s12 }
 0x1fa   :  { %3152 = vrot.lane.b32.xlu1 %v3156_v54, %s3375_s23  ;;  %v3295_v54 = vpop.eup %3294 }
 0x1fb   :  { %1117 = vrot.lane.b32.xlu0 %v4692_v5, %s3373_s22  ;;  %v1578_v5 = vld [vmem:[%s6260_s3 + $0x550] sm:$0xff]  ;;  %v1055_v52 = vadd.f32 %v3295_v54, %v3293_v2  ;;  %v1435_v2 = vld [vmem:[%s6260_s3 + $0xd8] sm:$0xff] }
 0x1fc   :  { %1890 = vmatpush.msra.mxu3 %v1578_v5  ;;  %v1471_v5 = vld [vmem:[%s6260_s3 + $0x1f8] sm:$0xff]  ;;  %1976 = vmatpush.msra.mxu2 %v1435_v2 }
 0x1fd   :  { %v1057_v30 = vmul.f32 0.5, %v1055_v52  ;;  %v4859_v63 = vpop.permute.xlu2 %3092  ;;  %2021 = vmatpush.msrb.mxu1 %v1471_v5  ;;  %v1499_v52 = vld [vmem:[%s6260_s3 + $0x2d8] sm:$0xff] }
 0x1fe   :  { %1891 = vmatpush.msra.mxu3 %v1576_v3  ;;  %v1501_v3 = vld [vmem:[%s6260_s3 + $0x2e8] sm:$0xff]  ;;  %v1495_v5 = vld [vmem:[%s6260_s3 + $0x2b8] sm:$0xff] }
 0x200   :  { %1346 = vrot.lane.b32.xlu2 %v1058_v38, %s3370_s12  ;;  %1892 = vmatpush.msra.mxu3 %v1574_v55  ;;  %v1121_v38 = vsel %vm1119_vm3, %v3035_v25, %v3065_v40  ;;  %v3094_v25 = vunpack.i.l.bf16 %v4859_v63  ;;  %v1469_v55 = vld [vmem:[%s6260_s3 + $0x1e8] sm:$0xff]  ;;  %v1431_v40 = vld [vmem:[%s6260_s3 + $0xb8] sm:$0xff] }
 0x201   :  { %2022 = vmatpush.msrb.mxu1 %v1469_v55 }
 0x202   :  { %3162 = vrot.lane.b32.xlu1 %v3161_v35, %s3375_s23  ;;  %1893 = vmatpush.msra.mxu3 %v1572_v58 }
 0x203   :  { %1314 = vrot.lane.b32.xlu0 %v4560_v62, %s3370_s12 }
 0x204   :  { %1894 = vmatpush.msra.mxu3 %v1570_v4  ;;  %v1497_v4 = vld [vmem:[%s6260_s3 + $0x2c8] sm:$0xff] }
 0x206   :  { %1895 = vmatpush.msra.mxu3 %v1568_v45  ;;  %v1612_v45 = vld [vmem:[%s6260_s3 + $0x660] sm:$0xff] }
 0x208   :  { %2068 = vmatpush.msrb.mxu3 %v1503_v20 }
 0x20a   :  { %3167 = vrot.lane.b32.xlu1 %v3161_v35, %s3374_s16  ;;  %v1122_v35 = vsel %vm1119_vm3, %v3039_v19, %v3094_v25  ;;  %2069 = vmatpush.msrb.mxu3 %v1501_v3  ;;  %v1614_v19 = vld [vmem:[%s6260_s3 + $0x670] sm:$0xff]  ;;  %v1429_v3 = vld [vmem:[%s6260_s3 + $0xa8] sm:$0xff] }
 0x20b   :  { %1326 = vrot.lane.b32.xlu0 %v4498_v41, %s3370_s12  ;;  %1935 = vmatpush.msra.mxu0 %v1614_v19 }
 0x20c   :  { %v4801_v62 = vpop.permute.xlu0 %3047  ;;  %2070 = vmatpush.msrb.mxu3 %v1499_v52  ;;  %v1427_v52 = vld [vmem:[%s6260_s3 + $0x98] sm:$0xff] }
 0x20d   :  { %v6272_v9 = vunpack.i.l.bf16 %v4801_v62  ;;  %v6271_v36 = vunpack.i.h.bf16 %v4801_v62  ;;  %1936 = vmatpush.msra.mxu0 %v1612_v45 }
 0x20e   :  { %2071 = vmatpush.msrb.mxu3 %v1497_v4  ;;  %v1610_v4 = vld [vmem:[%s6260_s3 + $0x650] sm:$0xff] }
 0x20f   :  { %v4808_v15 = vsel %vm1119_vm3, %v4417_v22, %v6272_v9  ;;  %v4834_v8 = vsel %vm1119_vm3, %v4448_v43, %v6271_v36  ;;  %1937 = vmatpush.msra.mxu0 %v1610_v4 }
 0x210   :  { %1726 = vmatmul.f32.gmra.mxu3 %v4808_v15 }
 0x211   :  { %2072 = vmatpush.msrb.mxu3 %v1495_v5  ;;  %v1425_v5 = vld [vmem:[%s6260_s3 + $0x88] sm:$0xff] }
 0x212   :  { %1344 = vrot.lane.b32.xlu1 %v1057_v30, %s3370_s12  ;;  %v1433_v30 = vld [vmem:[%s6260_s3 + $0xc8] sm:$0xff] }
 0x213   :  { %1338 = vrot.lane.b32.xlu0 %v1050_v51, %s3370_s12  ;;  %1977 = vmatpush.msra.mxu2 %v1433_v30 }
 0x214   :  { %v4818_v23 = vpop.permute.xlu0 %3057 }
 0x215   :  { %v3060_v26 = vunpack.i.h.bf16 %v4818_v23  ;;  %v3059_v7 = vunpack.i.l.bf16 %v4818_v23  ;;  %1978 = vmatpush.msra.mxu2 %v1431_v40  ;;  %v1459_v23 = vld [vmem:[%s6260_s3 + $0x198] sm:$0xff] }
 0x217   :  { %v4837_v24 = vsel %vm1265_vm5, %v1193_v1, %v3059_v7  ;;  %v4842_v21 = vsel %vm1265_vm5, %v3059_v7, %v3060_v26  ;;  %1979 = vmatpush.msra.mxu2 %v1429_v3 }
 0x218   :  { %1729 = vmatmul.f32.gmra.mxu3 %v4834_v8  ;;  %1802 = vmatmul.f32.vlgmr.msrb.gmra.mxu2 %v4837_v24 }
 0x219   :  { %1849 = vmatmul.f32.vlgmr.msra.gmra.mxu1 %v4842_v21  ;;  %1980 = vmatpush.msra.mxu2 %v1427_v52 }
 0x21a   :  { %1318 = vrot.lane.b32.xlu1 %v4417_v22, %s3370_s12 }
 0x21b   :  { %1981 = vmatpush.msra.mxu2 %v1425_v5 }
 0x21c   :  { %v3068_v43 = vpop.permute.xlu0 %3067 }
 0x21d   :  { %v3069_v51 = vunpack.i.l.bf16 %v3068_v43  ;;  %v3070_v10 = vunpack.i.h.bf16 %v3068_v43 }
 0x21f   :  { %v4862_v22 = vsel %vm1192_vm4, %v1121_v38, %v3069_v51  ;;  %v1194_v43 = vsel %vm1192_vm4, %v3069_v51, %v3070_v10  ;;  %v1463_v51 = vld [vmem:[%s6260_s3 + $0x1b8] sm:$0xff] }
 0x220   :  { %1758 = vmatmul.f32.gmra.mxu0 %v4862_v22 }
 0x222   :  { %1330 = vrot.lane.b32.xlu1 %v4591_v47, %s3370_s12 }
 0x224   :  { %v4877_v61 = vpop.permute.xlu0 %3082 }
 0x225   :  { %v3084_v59 = vunpack.i.l.bf16 %v4877_v61  ;;  %v3085_v30 = vunpack.i.h.bf16 %v4877_v61  ;;  %v1461_v61 = vld [vmem:[%s6260_s3 + $0x1a8] sm:$0xff] }
 0x227   :  { %v4895_v54 = vsel %vm1192_vm4, %v1122_v35, %v3084_v59  ;;  %v4946_v35 = vpop.permute.xlu2 %3102  ;;  %v1195_v10 = vsel %vm1192_vm4, %v3084_v59, %v3085_v30  ;;  %v1491_v59 = vld [vmem:[%s6260_s3 + $0x298] sm:$0xff]  ;;  %v1489_v30 = vld [vmem:[%s6260_s3 + $0x288] sm:$0xff] }
 0x228   :  { %1761 = vmatmul.f32.gmra.mxu0 %v4895_v54 }
 0x22a   :  { %1342 = vrot.lane.b32.xlu1 %v4643_v13, %s3370_s12  ;;  %v1467_v13 = vld [vmem:[%s6260_s3 + $0x1d8] sm:$0xff] }
 0x22b   :  { %2023 = vmatpush.msrb.mxu1 %v1467_v13 }
 0x22c   :  { %v4912_v58 = vpop.permute.xlu1 %3072 }
 0x22d   :  { %v6270_v17 = vunpack.i.l.bf16 %v4912_v58  ;;  %v4915_v7 = vpop.permute.xlu0 %1316  ;;  %v6269_v38 = vunpack.i.h.bf16 %v4912_v58 }
 0x22f   :  { %v4927_v1 = vsel %vm1119_vm3, %v4498_v41, %v6270_v17  ;;  %v1465_v41 = vld [vmem:[%s6260_s3 + $0x1c8] sm:$0xff]  ;;  %v4959_v2 = vsel %vm1119_vm3, %v4591_v47, %v6269_v38  ;;  %v5013_v3 = vpop.permute.xlu2 %3112 }
 0x230   :  { %1732 = vmatmul.f32.gmra.mxu3 %v4927_v1  ;;  %2024 = vmatpush.msrb.mxu1 %v1465_v41  ;;  %v1493_v47 = vld [vmem:[%s6260_s3 + $0x2a8] sm:$0xff] }
 0x231   :  { %2073 = vmatpush.msrb.mxu3 %v1493_v47  ;;  %v3104_v47 = vunpack.i.l.bf16 %v4946_v35 }
 0x232   :  { %2025 = vmatpush.msrb.mxu1 %v1463_v51  ;;  %v6274_v51 = vunpack.i.h.bf16 %v4946_v35 }
 0x233   :  { %2074 = vmatpush.msrb.mxu3 %v1491_v59 }
 0x234   :  { %v4937_v37 = vpop.permute.xlu1 %3077  ;;  %2026 = vmatpush.msrb.mxu1 %v1461_v61 }
 0x235   :  { %v3080_v20 = vunpack.i.h.bf16 %v4937_v37  ;;  %v3079_v29 = vunpack.i.l.bf16 %v4937_v37  ;;  %v4944_v25 = vpop.permute.xlu0 %1320  ;;  %2075 = vmatpush.msrb.mxu3 %v1489_v30 }
 0x236   :  { %2027 = vmatpush.msrb.mxu1 %v1459_v23 }
 0x237   :  { %v4962_v19 = vsel %vm1265_vm5, %v1194_v43, %v3079_v29  ;;  %v4965_v55 = vsel %vm1265_vm5, %v3079_v29, %v3080_v20  ;;  %v5002_v43 = vsel %vm353_vm0, %v3060_v26, %v4797_v34  ;;  %v3095_v26 = vunpack.i.h.bf16 %v4859_v63  ;;  %v1423_v63 = vld [vmem:[%s6260_s3 + $0x78] sm:$0xff]  ;;  %v3123_v30 = vpop.permute.xlu2 %3122 }
 0x238   :  { %1735 = vmatmul.f32.gmra.mxu3 %v4959_v2  ;;  %1805 = vmatmul.f32.gmra.mxu2 %v4962_v19  ;;  %v5044_v5 = vsel %vm353_vm0, %v3080_v20, %v4820_v53 }
 0x239   :  { %1852 = vmatmul.f32.gmra.mxu1 %v4965_v55  ;;  %v1123_v61 = vsel %vm1119_vm3, %v3040_v0, %v3095_v26  ;;  %1982 = vmatpush.msra.mxu2 %v1423_v63  ;;  %v1487_v0 = vld [vmem:[%s6260_s3 + $0x278] sm:$0xff]  ;;  %v1421_v26 = vld [vmem:[%s6260_s3 + $0x68] sm:$0xff]  ;;  %v3114_v63 = vunpack.i.l.bf16 %v5013_v3 }
 0x23a   :  { %2076 = vmatpush.msrb.mxu3 %v1487_v0  ;;  %v1606_v0 = vld [vmem:[%s6260_s3 + $0x630] sm:$0xff] }
 0x23b   :  { %1983 = vmatpush.msra.mxu2 %v1421_v26 }
 0x23c   :  { %v4980_v13 = vpop.permute.xlu1 %3087 }
 0x23d   :  { %v3090_v40 = vunpack.i.h.bf16 %v4980_v13  ;;  %v3089_v45 = vunpack.i.l.bf16 %v4980_v13  ;;  %v4990_v37 = vpop.permute.xlu0 %3117  ;;  %v1608_v13 = vld [vmem:[%s6260_s3 + $0x640] sm:$0xff] }
 0x23e   :  { %1938 = vmatpush.msra.mxu0 %v1608_v13  ;;  %v3119_v13 = vunpack.i.l.bf16 %v4990_v37  ;;  %v3120_v17 = vunpack.i.h.bf16 %v4990_v37  ;;  %v1453_v37 = vld [vmem:[%s6260_s3 + $0x168] sm:$0xff] }
 0x23f   :  { %v4993_v41 = vsel %vm1265_vm5, %v1195_v10, %v3089_v45  ;;  %v4996_v29 = vsel %vm1265_vm5, %v3089_v45, %v3090_v40  ;;  %v1457_v10 = vld [vmem:[%s6260_s3 + $0x188] sm:$0xff]  ;;  %v5084_v38 = vsel %vm353_vm0, %v3090_v40, %v4915_v7 }
 0x240   :  { %1808 = vmatmul.f32.gmra.mxu2 %v4993_v41  ;;  %1896 = vmatmul.f32.vlgmr.msra.gmra.mxu3 %v5002_v43 }
 0x241   :  { %1855 = vmatmul.f32.gmra.mxu1 %v4996_v29  ;;  %1939 = vmatpush.msra.mxu0 %v1606_v0 }
 0x242   :  { %2028 = vmatpush.msrb.mxu1 %v1457_v10 }
 0x244   :  { %v3098_v52 = vpop.permute.xlu1 %3097 }
 0x245   :  { %v3100_v4 = vunpack.i.h.bf16 %v3098_v52  ;;  %v3099_v45 = vunpack.i.l.bf16 %v3098_v52  ;;  %v5051_v52 = vsel %vm1265_vm5, %v3104_v47, %v6274_v51  ;;  %v5060_v20 = vpop.permute.xlu0 %3127  ;;  %v1125_v51 = vsel %vm1119_vm3, %v3045_v49, %v3120_v17  ;;  %v1481_v17 = vld [vmem:[%s6260_s3 + $0x248] sm:$0xff] }
 0x246   :  { %6293 = vst [vmem:[#allocation5_spill] sm:$0xff] %v5051_v52  ;;  %v3130_v36 = vunpack.i.h.bf16 %v5060_v20  ;;  %v3129_v9 = vunpack.i.l.bf16 %v5060_v20  ;;  %v6297_v20 = vunpack.i.h.bf16 %v4946_v35 }
 0x247   :  { %v5040_v59 = vsel %vm1192_vm4, %v1123_v61, %v3099_v45  ;;  %v1196_v23 = vsel %vm1192_vm4, %v3099_v45, %v3100_v4  ;;  %v1124_v61 = vsel %vm1119_vm3, %v3044_v44, %v3119_v13  ;;  %v1485_v44 = vld [vmem:[%s6260_s3 + $0x268] sm:$0xff]  ;;  %v1419_v13 = vld [vmem:[%s6260_s3 + $0x58] sm:$0xff] }
 0x248   :  { %1764 = vmatmul.f32.gmra.mxu0 %v5040_v59  ;;  %1899 = vmatmul.f32.gmra.mxu3 %v5044_v5  ;;  %v5055_v6 = vsel %vm1265_vm5, %v1196_v23, %v3104_v47  ;;  %v6273_v47 = vunpack.i.h.bf16 %v5013_v3  ;;  %v1455_v23 = vld [vmem:[%s6260_s3 + $0x178] sm:$0xff]  ;;  %v5139_v11 = vsel %vm353_vm0, %v6297_v20, %v4944_v25  ;;  %v5169_v20 = vpop.f32.mrf.mxu1 }
 0x249   :  { %6294 = vst [vmem:[#allocation6_spill] sm:$0xff] %v5055_v6  ;;  %1858 = vmatmul.f32.gmra.mxu1 %v5051_v52  ;;  %1811 = vmatmul.f32.gmra.mxu2 %v5055_v6 }
 0x24a   :  { %2029 = vmatpush.msrb.mxu1 %v1455_v23  ;;  %v5098_v40 = vsel %vm1265_vm5, %v3114_v63, %v6273_v47  ;;  %2077 = vmatpush.msrb.mxu3 %v1485_v44  ;;  %v3124_v23 = vunpack.i.l.bf16 %v3123_v30  ;;  %v1451_v44 = vld [vmem:[%s6260_s3 + $0x158] sm:$0xff]  ;;  %6298 = vst [vmem:[#allocation9_spill] sm:$0xff] %v5139_v11 }
 0x24b   :  { %6295 = vst [vmem:[#allocation7_spill] sm:$0xff] %v5098_v40  ;;  %1984 = vmatpush.msra.mxu2 %v1419_v13 }
 0x24c   :  { %v3108_v4 = vpop.permute.xlu1 %3107  ;;  %2030 = vmatpush.msrb.mxu1 %v1453_v37  ;;  %v5133_v13 = vsel %vm1192_vm4, %v1125_v51, %v3124_v23  ;;  %v5147_v37 = vsel %vm1265_vm5, %v3129_v9, %v3130_v36  ;;  %v1415_v51 = vld [vmem:[%s6260_s3 + $0x38] sm:$0xff]  ;;  %6301 = vst [vmem:[#allocation12_spill] sm:$0xff] %v5169_v20 }
 0x24d   :  { %v3110_v45 = vunpack.i.h.bf16 %v3108_v4  ;;  %v3109_v10 = vunpack.i.l.bf16 %v3108_v4  ;;  %v5115_v0 = vpop.permute.xlu0 %3137  ;;  %6299 = vst [vmem:[#allocation10_spill] sm:$0xff] %v5147_v37 }
 0x24e   :  { %2031 = vmatpush.msrb.mxu1 %v1451_v44 }
 0x24f   :  { %v5080_v26 = vsel %vm1192_vm4, %v1124_v61, %v3109_v10  ;;  %v1197_v4 = vsel %vm1192_vm4, %v3109_v10, %v3110_v45  ;;  %v1483_v10 = vld [vmem:[%s6260_s3 + $0x258] sm:$0xff]  ;;  %v1417_v61 = vld [vmem:[%s6260_s3 + $0x48] sm:$0xff] }
 0x250   :  { %1767 = vmatmul.f32.gmra.mxu0 %v5080_v26  ;;  %1902 = vmatmul.f32.gmra.mxu3 %v5084_v38  ;;  %v5102_v45 = vsel %vm1265_vm5, %v1197_v4, %v3114_v63  ;;  %v3125_v63 = vunpack.i.h.bf16 %v3123_v30  ;;  %v5117_v4 = vpop.permute.xlu2 %3132  ;;  %v1604_v30 = vld [vmem:[%s6260_s3 + $0x620] sm:$0xff] }
 0x251   :  { %6296 = vst [vmem:[#allocation8_spill] sm:$0xff] %v5102_v45  ;;  %1861 = vmatmul.f32.gmra.mxu1 %v5098_v40  ;;  %1814 = vmatmul.f32.gmra.mxu2 %v5102_v45 }
 0x252   :  { %2078 = vmatpush.msrb.mxu3 %v1483_v10  ;;  %1985 = vmatpush.msra.mxu2 %v1417_v61  ;;  %v1198_v49 = vsel %vm1192_vm4, %v3124_v23, %v3125_v63  ;;  %v1449_v10 = vld [vmem:[%s6260_s3 + $0x148] sm:$0xff]  ;;  %v3135_v61 = vunpack.i.h.bf16 %v5117_v4  ;;  %v3134_v63 = vunpack.i.l.bf16 %v5117_v4  ;;  %v3139_v23 = vunpack.i.l.bf16 %v5115_v0 }
 0x253   :  { %1940 = vmatpush.msra.mxu0 %v1604_v30  ;;  %v5151_v35 = vsel %vm1265_vm5, %v1198_v49, %v3129_v9  ;;  %2032 = vmatpush.msrb.mxu1 %v1449_v10  ;;  %v1413_v4 = vld [vmem:[%s6260_s3 + $0x28] sm:$0xff]  ;;  %v6302_v10 = vunpack.i.h.bf16 %v5013_v3  ;;  %v1447_v3 = vld [vmem:[%s6260_s3 + $0x138] sm:$0xff] }
 0x254   :  { %v5121_v47 = vpop.permute.xlu1 %1324  ;;  %6300 = vst [vmem:[#allocation11_spill] sm:$0xff] %v5151_v35  ;;  %2079 = vmatpush.msrb.mxu3 %v1481_v17  ;;  %1986 = vmatpush.msra.mxu2 %v1415_v51  ;;  %v1479_v17 = vld [vmem:[%s6260_s3 + $0x238] sm:$0xff]  ;;  %v1602_v51 = vld [vmem:[%s6260_s3 + $0x610] sm:$0xff] }
 0x255   :  { %v5167_v44 = vpop.permute.xlu0 %3147  ;;  %v5186_v9 = vsel %vm353_vm0, %v6302_v10, %v5121_v47  ;;  %1941 = vmatpush.msra.mxu0 %v1602_v51  ;;  %2033 = vmatpush.msrb.mxu1 %v1447_v3  ;;  %v1443_v51 = vld [vmem:[%s6260_s3 + $0x118] sm:$0xff]  ;;  %v1409_v3 = vld [vmem:[%s6260_s3 + $0x8] sm:$0xff] }
 0x256   :  { %6303 = vst [vmem:[#allocation13_spill] sm:$0xff] %v5186_v9  ;;  %2080 = vmatpush.msrb.mxu3 %v1479_v17  ;;  %1987 = vmatpush.msra.mxu2 %v1413_v4  ;;  %v5212_v4 = vpop.f32.mrf.mxu1  ;;  %v1475_v10 = vld [vmem:[%s6260_s3 + $0x218] sm:$0xff] }
 0x257   :  { %6307 = vst [vmem:[#allocation16_spill] sm:$0xff] %v5212_v4 }
 0x258   :  { %1770 = vmatmul.f32.gmra.mxu0 %v5133_v13  ;;  %1905 = vmatmul.f32.gmra.mxu3 %v5139_v11  ;;  %v5171_v49 = vpop.permute.xlu2 %1332  ;;  %v6322_v11 = vunpack.i.h.bf16 %v4912_v58 }
 0x259   :  { %1864 = vmatmul.f32.gmra.mxu1 %v5147_v37  ;;  %1817 = vmatmul.f32.gmra.mxu2 %v5151_v35  ;;  %v1199_v37 = vsel %vm1192_vm4, %v3134_v63, %v3135_v61  ;;  %v6304_v35 = vunpack.i.h.bf16 %v5115_v0  ;;  %v1411_v61 = vld [vmem:[%s6260_s3 + $0x18] sm:$0xff] }
 0x25a   :  { %v5196_v40 = vsel %vm1265_vm5, %v1199_v37, %v3139_v23  ;;  %v1445_v37 = vld [vmem:[%s6260_s3 + $0x128] sm:$0xff]  ;;  %1988 = vmatpush.msra.mxu2 %v1411_v61  ;;  %v6309_v61 = vunpack.i.l.bf16 %v4801_v62 }
 0x25b   :  { %v5192_v20 = vsel %vm1265_vm5, %v3139_v23, %v6304_v35  ;;  %6306 = vst [vmem:[#allocation15_spill] sm:$0xff] %v5196_v40  ;;  %v1477_v35 = vld [vmem:[%s6260_s3 + $0x228] sm:$0xff]  ;;  %2034 = vmatpush.msrb.mxu1 %v1445_v37 }
 0x25c   :  { %v5165_v30 = vpop.permute.xlu1 %1328  ;;  %6305 = vst [vmem:[#allocation14_spill] sm:$0xff] %v5192_v20  ;;  %2081 = vmatpush.msrb.mxu3 %v1477_v35  ;;  %1989 = vmatpush.msra.mxu2 %v1409_v3 }
 0x25d   :  { %v5227_v35 = vsel %vm353_vm0, %v3130_v36, %v5165_v30  ;;  %2035 = vmatpush.msrb.mxu1 %v1443_v51  ;;  %v5241_v36 = vpop.f32.mrf.mxu3  ;;  %v3150_v51 = vunpack.i.h.bf16 %v5167_v44 }
 0x25e   :  { %6308 = vst [vmem:[#allocation17_spill] sm:$0xff] %v5227_v35  ;;  %2082 = vmatpush.msrb.mxu3 %v1475_v10  ;;  %v3149_v10 = vunpack.i.l.bf16 %v5167_v44 }
 0x25f   :  { %6310 = vst [vmem:[#allocation18_spill] sm:$0xff] %v5241_v36  ;;  %v5258_v36 = vpop.f32.mrf.mxu1 }
 0x260   :  { %1908 = vmatmul.f32.gmra.mxu3 %v5186_v9  ;;  %v5235_v4 = vpop.permute.xlu2 %1336  ;;  %6312 = vst [vmem:[#allocation19_spill] sm:$0xff] %v5258_v36  ;;  %v1200_v44 = vsel %vm1192_vm4, %v3149_v10, %v3150_v51  ;;  %v1535_v51 = vld [vmem:[%s6260_s3 + $0x3f8] sm:$0xff] }
 0x261   :  { %1867 = vmatmul.f32.gmra.mxu1 %v5192_v20  ;;  %1820 = vmatmul.f32.gmra.mxu2 %v5196_v40  ;;  %v5223_v20 = vpop.permute.xlu0 %3157  ;;  %v1441_v40 = vld [vmem:[%s6260_s3 + $0x108] sm:$0xff]  ;;  %v1599_v36 = vld [vmem:[%s6260_s3 + $0x5f8] sm:$0xff] }
 0x262   :  { %2036 = vmatpush.msrb.mxu1 %v1441_v40 }
 0x264   :  { %v3143_v23 = vpop.permute.xlu1 %3142  ;;  %2209 = vmatpush.msra.mxu1 %v1599_v36 }
 0x265   :  { %v3144_v17 = vunpack.i.l.bf16 %v3143_v23  ;;  %v3145_v9 = vunpack.i.h.bf16 %v3143_v23 }
 0x267   :  { %v1126_v37 = vsel %vm1119_vm3, %v6309_v61, %v3144_v17  ;;  %v1600_v17 = vld [vmem:[%s6260_s3 + $0x600] sm:$0xff] }
 0x268   :  { %1911 = vmatmul.f32.gmra.mxu3 %v5227_v35  ;;  %v5239_v45 = vsel %vm1192_vm4, %v1126_v37, %v3134_v63  ;;  %1942 = vmatpush.msra.mxu0 %v1600_v17  ;;  %v1473_v63 = vld [vmem:[%s6260_s3 + $0x208] sm:$0xff]  ;;  %v6311_v37 = vunpack.i.h.bf16 %v4801_v62  ;;  %v1567_v35 = vld [vmem:[%s6260_s3 + $0x4f8] sm:$0xff]  ;;  %v6315_v62 = vunpack.i.h.bf16 %v5115_v0 }
 0x269   :  { %1773 = vmatmul.f32.gmra.mxu0 %v5239_v45  ;;  %2083 = vmatpush.msrb.mxu3 %v1473_v63  ;;  %v1617_v0 = vld [vmem:[%s6260_s3 + $0x688] sm:$0xff] }
 0x26a   :  { %v1127_v40 = vsel %vm1119_vm3, %v6311_v37, %v3145_v9  ;;  %2162 = vmatpush.msrb.mxu2 %v1567_v35  ;;  %v5273_v9 = vsel %vm353_vm0, %v6315_v62, %v5171_v49  ;;  %v5278_v35 = vpop.permute.xlu0 %1340  ;;  %v3160_v37 = vunpack.i.h.bf16 %v5223_v20  ;;  %2115 = vmatpush.msrb.mxu0 %v1535_v51  ;;  %v1533_v51 = vld [vmem:[%s6260_s3 + $0x3e8] sm:$0xff] }
 0x26b   :  { %6316 = vst [vmem:[#allocation22_spill] sm:$0xff] %v5273_v9  ;;  %2263 = vmatpush.msra.mxu3 %v1617_v0  ;;  %v1563_v0 = vld [vmem:[%s6260_s3 + $0x4d8] sm:$0xff] }
 0x26c   :  { %v3153_v3 = vpop.permute.xlu1 %3152  ;;  %2116 = vmatpush.msrb.mxu0 %v1533_v51 }
 0x26d   :  { %v3155_v61 = vunpack.i.h.bf16 %v3153_v3  ;;  %v3154_v23 = vunpack.i.l.bf16 %v3153_v3  ;;  %v5276_v3 = vsel %vm1192_vm4, %v1127_v40, %v3149_v10  ;;  %v3159_v10 = vunpack.i.l.bf16 %v5223_v20  ;;  %v1565_v40 = vld [vmem:[%s6260_s3 + $0x4e8] sm:$0xff] }
 0x26e   :  { %2163 = vmatpush.msrb.mxu2 %v1565_v40  ;;  %v6318_v40 = vunpack.i.l.bf16 %v4912_v58 }
 0x26f   :  { %v5262_v17 = vsel %vm1265_vm5, %v1200_v44, %v3154_v23  ;;  %v5265_v63 = vsel %vm1265_vm5, %v3154_v23, %v3155_v61  ;;  %v1114_v23 = vpop.permute.xlu2 %1113  ;;  %v5293_v44 = vpop.f32.mrf.mxu3  ;;  %v1201_v20 = vsel %vm1192_vm4, %v3159_v10, %v3160_v37  ;;  %v5320_v36 = vsel %vm353_vm0, %v3155_v61, %v5235_v4  ;;  %v1531_v61 = vld [vmem:[%s6260_s3 + $0x3d8] sm:$0xff] }
 0x270   :  { %6313 = vst [vmem:[#allocation20_spill] sm:$0xff] %v5262_v17  ;;  %1823 = vmatmul.f32.gmra.mxu2 %v5262_v17  ;;  %1870 = vmatmul.f32.gmra.mxu1 %v5265_v63 }
 0x271   :  { %6314 = vst [vmem:[#allocation21_spill] sm:$0xff] %v5265_v63  ;;  %1914 = vmatmul.f32.gmra.mxu3 %v5273_v9  ;;  %1776 = vmatmul.f32.gmra.mxu0 %v5276_v3  ;;  %v5298_v9 = vpop.f32.mrf.mxu1 }
 0x272   :  { %6317 = vst [vmem:[#allocation23_spill] sm:$0xff] %v5293_v44  ;;  %2164 = vmatpush.msrb.mxu2 %v1563_v0  ;;  %2117 = vmatpush.msrb.mxu0 %v1531_v61 }
 0x273   :  { %6321 = vst [vmem:[#allocation26_spill] sm:$0xff] %v5320_v36 }
 0x274   :  { %v3163_v62 = vpop.permute.xlu1 %3162 }
 0x275   :  { %v3165_v63 = vunpack.i.h.bf16 %v3163_v62  ;;  %v3164_v17 = vunpack.i.l.bf16 %v3163_v62  ;;  %v1128_v62 = vsel %vm1119_vm3, %v6318_v40, %v1114_v23  ;;  %v1118_v40 = vpop.permute.xlu0 %1117 }
 0x276   :  { %v5323_v37 = vsel %vm1192_vm4, %v1128_v62, %v3159_v10 }
 0x277   :  { %v5311_v44 = vsel %vm1265_vm5, %v1201_v20, %v3164_v17  ;;  %v5314_v52 = vsel %vm1265_vm5, %v3164_v17, %v3165_v63  ;;  %v3173_v23 = vpop.permute.xlu2 %3172  ;;  %v1597_v17 = vld [vmem:[%s6260_s3 + $0x5e8] sm:$0xff]  ;;  %v1615_v20 = vld [vmem:[%s6260_s3 + $0x678] sm:$0xff]  ;;  %v5336_v0 = vpop.f32.mrf.mxu3  ;;  %v5362_v58 = vsel %vm353_vm0, %v3165_v63, %v5278_v35 }
 0x278   :  { %6319 = vst [vmem:[#allocation24_spill] sm:$0xff] %v5311_v44  ;;  %1826 = vmatmul.f32.gmra.mxu2 %v5311_v44  ;;  %1873 = vmatmul.f32.gmra.mxu1 %v5314_v52  ;;  %v3175_v51 = vunpack.i.h.bf16 %v3173_v23  ;;  %v3174_v10 = vunpack.i.l.bf16 %v3173_v23  ;;  %v1129_v23 = vsel %vm1119_vm3, %v6322_v11, %v1118_v40  ;;  %v1559_v40 = vld [vmem:[%s6260_s3 + $0x4b8] sm:$0xff]  ;;  %v1593_v63 = vld [vmem:[%s6260_s3 + $0x5c8] sm:$0xff] }
 0x279   :  { %6320 = vst [vmem:[#allocation25_spill] sm:$0xff] %v5314_v52  ;;  %1917 = vmatmul.f32.gmra.mxu3 %v5320_v36  ;;  %1779 = vmatmul.f32.gmra.mxu0 %v5323_v37  ;;  %v1561_v52 = vld [vmem:[%s6260_s3 + $0x4c8] sm:$0xff]  ;;  %v5341_v6 = vpop.f32.mrf.mxu1 }
 0x27a   :  { %2210 = vmatpush.msra.mxu1 %v1597_v17  ;;  %2264 = vmatpush.msra.mxu3 %v1615_v20  ;;  %v1595_v17 = vld [vmem:[%s6260_s3 + $0x5d8] sm:$0xff]  ;;  %v1529_v20 = vld [vmem:[%s6260_s3 + $0x3c8] sm:$0xff]  ;;  %v5353_v61 = vsel %vm1265_vm5, %v3174_v10, %v3175_v51 }
 0x27b   :  { %2165 = vmatpush.msrb.mxu2 %v1561_v52  ;;  %6323 = vst [vmem:[#allocation27_spill] sm:$0xff] %v5353_v61  ;;  %2118 = vmatpush.msrb.mxu0 %v1529_v20 }
 0x27c   :  { %v3168_v62 = vpop.permute.xlu1 %3167  ;;  %2211 = vmatpush.msra.mxu1 %v1595_v17 }
 0x27d   :  { %v3170_v44 = vunpack.i.h.bf16 %v3168_v62  ;;  %v3169_v36 = vunpack.i.l.bf16 %v3168_v62  ;;  %2166 = vmatpush.msrb.mxu2 %v1559_v40 }
 0x27e   :  { %2212 = vmatpush.msra.mxu1 %v1593_v63  ;;  %v1589_v63 = vld [vmem:[%s6260_s3 + $0x5a8] sm:$0xff] }
 0x27f   :  { %v5356_v62 = vsel %vm1192_vm4, %v1129_v23, %v3169_v36  ;;  %v1202_v52 = vsel %vm1192_vm4, %v3169_v36, %v3170_v44  ;;  %v1613_v44 = vld [vmem:[%s6260_s3 + $0x668] sm:$0xff]  ;;  %v1527_v36 = vld [vmem:[%s6260_s3 + $0x3b8] sm:$0xff]  ;;  %v5382_v23 = vpop.f32.mrf.mxu3 }
 0x280   :  { %1876 = vmatmul.f32.gmra.mxu1 %v5353_v61  ;;  %v5365_v11 = vsel %vm1265_vm5, %v1202_v52, %v3174_v10  ;;  %2265 = vmatpush.msra.mxu3 %v1613_v44  ;;  %v1311_v10 = vpop.permute.xlu2 %1310  ;;  %v1557_v52 = vld [vmem:[%s6260_s3 + $0x4a8] sm:$0xff]  ;;  %v1591_v44 = vld [vmem:[%s6260_s3 + $0x5b8] sm:$0xff] }
 0x281   :  { %1920 = vmatmul.f32.gmra.mxu3 %v5362_v58  ;;  %1782 = vmatmul.f32.gmra.mxu0 %v5356_v62  ;;  %v5386_v20 = vpop.f32.mrf.mxu1  ;;  %v5393_v61 = vsel %vm353_vm0, %v4797_v34, %v1311_v10  ;;  %v1525_v34 = vld [vmem:[%s6260_s3 + $0x3a8] sm:$0xff]  ;;  %v1315_v10 = vpop.permute.xlu0 %1314 }
 0x282   :  { %1829 = vmatmul.f32.gmra.mxu2 %v5365_v11  ;;  %2119 = vmatpush.msrb.mxu0 %v1527_v36  ;;  %v1553_v36 = vld [vmem:[%s6260_s3 + $0x488] sm:$0xff] }
 0x283   :  { %2167 = vmatpush.msrb.mxu2 %v1557_v52  ;;  %2213 = vmatpush.msra.mxu1 %v1591_v44 }
 0x284   :  { %v5384_v17 = vpop.permute.xlu1 %1344  ;;  %2120 = vmatpush.msrb.mxu0 %v1525_v34  ;;  %v5431_v34 = vsel %vm353_vm0, %v4820_v53, %v1315_v10  ;;  %v1519_v10 = vld [vmem:[%s6260_s3 + $0x378] sm:$0xff] }
 0x285   :  { %v5397_v40 = vsel %vm353_vm0, %v3175_v51, %v5384_v17  ;;  %v1611_v51 = vld [vmem:[%s6260_s3 + $0x658] sm:$0xff]  ;;  %2214 = vmatpush.msra.mxu1 %v1589_v63  ;;  %v1585_v63 = vld [vmem:[%s6260_s3 + $0x588] sm:$0xff] }
 0x286   :  { %2266 = vmatpush.msra.mxu3 %v1611_v51  ;;  %v1521_v51 = vld [vmem:[%s6260_s3 + $0x388] sm:$0xff] }
 0x287   :  { %v5427_v44 = vpop.f32.mrf.mxu3 }
 0x288   :  { %2037 = vmatmul.f32.vlgmr.msrb.gmra.mxu1 %v4478_v14  ;;  %v1555_v14 = vld [vmem:[%s6260_s3 + $0x498] sm:$0xff] }
 0x289   :  { %1923 = vmatmul.f32.gmra.mxu3 %v5397_v40  ;;  %2805 = vmatmul.msk.f32.vlgmr.msra.gmra.mxu0 %vm1624_vm6, %v5393_v61  ;;  %v5425_v52 = vpop.f32.mrf.mxu1 }
 0x28a   :  { %1990 = vmatmul.f32.vlgmr.msra.gmra.mxu2 %v4102_v57  ;;  %v1523_v57 = vld [vmem:[%s6260_s3 + $0x398] sm:$0xff]  ;;  %6324 = vst [vmem:[#allocation28_spill] sm:$0xff] %v5425_v52 }
 0x28b   :  { %2168 = vmatpush.msrb.mxu2 %v1555_v14  ;;  %2121 = vmatpush.msrb.mxu0 %v1523_v57  ;;  %v1587_v14 = vld [vmem:[%s6260_s3 + $0x598] sm:$0xff] }
 0x28c   :  { %2215 = vmatpush.msra.mxu1 %v1587_v14  ;;  %v1319_v53 = vpop.permute.xlu1 %1318 }
 0x28d   :  { %2169 = vmatpush.msrb.mxu2 %v1553_v36  ;;  %2122 = vmatpush.msrb.mxu0 %v1521_v51  ;;  %v5457_v57 = vsel %vm353_vm0, %v4915_v7, %v1319_v53  ;;  %v1549_v7 = vld [vmem:[%s6260_s3 + $0x468] sm:$0xff] }
 0x28e   :  { %2216 = vmatpush.msra.mxu1 %v1585_v63  ;;  %v1517_v51 = vld [vmem:[%s6260_s3 + $0x368] sm:$0xff] }
 0x28f   :  { %v5460_v36 = vpop.f32.mrf.mxu3  ;;  %2123 = vmatpush.msrb.mxu0 %v1519_v10  ;;  %v1581_v63 = vld [vmem:[%s6260_s3 + $0x568] sm:$0xff] }
 0x290   :  { %2040 = vmatmul.f32.gmra.mxu1 %v4515_v50  ;;  %v1551_v50 = vld [vmem:[%s6260_s3 + $0x478] sm:$0xff] }
 0x291   :  { %2084 = vmatmul.f32.vlgmr.msrb.gmra.mxu3 %v4669_v28  ;;  %2806 = vmatmul.msk.f32.gmra.mxu0 %vm1624_vm6, %v5431_v34  ;;  %v1609_v28 = vld [vmem:[%s6260_s3 + $0x648] sm:$0xff] }
 0x292   :  { %1993 = vmatmul.f32.gmra.mxu2 %v4133_v46  ;;  %v5450_v46 = vpop.f32.mrf.mxu1  ;;  %2267 = vmatpush.msra.mxu3 %v1609_v28 }
 0x293   :  { %2170 = vmatpush.msrb.mxu2 %v1551_v50  ;;  %v1547_v50 = vld [vmem:[%s6260_s3 + $0x458] sm:$0xff]  ;;  %2124 = vmatpush.msrb.mxu0 %v1517_v51 }
 0x294   :  { %v1543_v51 = vld [vmem:[%s6260_s3 + $0x438] sm:$0xff] }
 0x295   :  { %2171 = vmatpush.msrb.mxu2 %v1549_v7  ;;  %v1605_v7 = vld [vmem:[%s6260_s3 + $0x628] sm:$0xff] }
 0x297   :  { %2172 = vmatpush.msrb.mxu2 %v1547_v50  ;;  %v5491_v53 = vpop.f32.mrf.mxu3  ;;  %v5537_v50 = vpop.f32.mrf.mxu0 }
 0x298   :  { %2043 = vmatmul.f32.gmra.mxu1 %v4589_v27  ;;  %v1583_v27 = vld [vmem:[%s6260_s3 + $0x578] sm:$0xff]  ;;  %6325 = vst [vmem:[#allocation29_spill] sm:$0xff] %v5491_v53 }
 0x299   :  { %2087 = vmatmul.f32.gmra.mxu3 %v4862_v22  ;;  %2807 = vmatmul.msk.f32.gmra.mxu0 %vm1624_vm6, %v5457_v57  ;;  %v1323_v22 = vpop.permute.xlu2 %1322 }
 0x29a   :  { %1996 = vmatmul.f32.gmra.mxu2 %v4168_v39  ;;  %2217 = vmatpush.msra.mxu1 %v1583_v27  ;;  %v5475_v14 = vpop.f32.mrf.mxu1  ;;  %v1607_v39 = vld [vmem:[%s6260_s3 + $0x638] sm:$0xff]  ;;  %v5488_v28 = vsel %vm353_vm0, %v4944_v25, %v1323_v22  ;;  %v1513_v27 = vld [vmem:[%s6260_s3 + $0x348] sm:$0xff] }
 0x29b   :  { %2268 = vmatpush.msra.mxu3 %v1607_v39  ;;  %v1515_v25 = vld [vmem:[%s6260_s3 + $0x358] sm:$0xff] }
 0x29c   :  { %2218 = vmatpush.msra.mxu1 %v1581_v63  ;;  %2125 = vmatpush.msrb.mxu0 %v1515_v25  ;;  %v1603_v25 = vld [vmem:[%s6260_s3 + $0x618] sm:$0xff] }
 0x29d   :  { %2269 = vmatpush.msra.mxu3 %v1605_v7  ;;  %v1573_v7 = vld [vmem:[%s6260_s3 + $0x528] sm:$0xff] }
 0x29e   :  { %2126 = vmatpush.msrb.mxu0 %v1513_v27 }
 0x29f   :  { %v5529_v39 = vpop.f32.mrf.mxu3  ;;  %2270 = vmatpush.msra.mxu3 %v1603_v25  ;;  %v5572_v27 = vpop.f32.mrf.mxu0 }
 0x2a0   :  { %2046 = vmatmul.f32.gmra.mxu1 %v4623_v42  ;;  %v1545_v42 = vld [vmem:[%s6260_s3 + $0x448] sm:$0xff] }
 0x2a1   :  { %2090 = vmatmul.f32.gmra.mxu3 %v4895_v54  ;;  %2808 = vmatmul.msk.f32.gmra.mxu0 %vm1624_vm6, %v5488_v28  ;;  %v1327_v54 = vpop.permute.xlu0 %1326 }
 0x2a2   :  { %1999 = vmatmul.f32.gmra.mxu2 %v4204_v16  ;;  %v5506_v10 = vpop.f32.mrf.mxu1  ;;  %v1579_v16 = vld [vmem:[%s6260_s3 + $0x558] sm:$0xff]  ;;  %v5519_v22 = vsel %vm353_vm0, %v5121_v47, %v1327_v54  ;;  %v1577_v47 = vld [vmem:[%s6260_s3 + $0x548] sm:$0xff] }
 0x2a3   :  { %2173 = vmatpush.msrb.mxu2 %v1545_v42  ;;  %2219 = vmatpush.msra.mxu1 %v1579_v16  ;;  %v1575_v54 = vld [vmem:[%s6260_s3 + $0x538] sm:$0xff]  ;;  %v1509_v16 = vld [vmem:[%s6260_s3 + $0x328] sm:$0xff] }
 0x2a5   :  { %2174 = vmatpush.msrb.mxu2 %v1543_v51  ;;  %2220 = vmatpush.msra.mxu1 %v1577_v47  ;;  %v1571_v47 = vld [vmem:[%s6260_s3 + $0x518] sm:$0xff] }
 0x2a7   :  { %2221 = vmatpush.msra.mxu1 %v1575_v54  ;;  %v1505_v54 = vld [vmem:[%s6260_s3 + $0x308] sm:$0xff] }
 0x2a8   :  { %2049 = vmatmul.f32.gmra.mxu1 %v4664_v48  ;;  %v1331_v48 = vpop.permute.xlu1 %1330 }
 0x2a9   :  { %2093 = vmatmul.f32.gmra.mxu3 %v5040_v59  ;;  %2809 = vmatmul.msk.f32.gmra.mxu0 %vm1624_vm6, %v5519_v22  ;;  %v1511_v59 = vld [vmem:[%s6260_s3 + $0x338] sm:$0xff]  ;;  %v5549_v42 = vsel %vm353_vm0, %v5165_v30, %v1331_v48  ;;  %v5565_v30 = vpop.f32.mrf.mxu2 }
 0x2aa   :  { %2002 = vmatmul.f32.gmra.mxu2 %v4246_v60  ;;  %v5539_v63 = vpop.f32.mrf.mxu1  ;;  %2127 = vmatpush.msrb.mxu0 %v1511_v59  ;;  %v1541_v60 = vld [vmem:[%s6260_s3 + $0x428] sm:$0xff]  ;;  %v1507_v48 = vld [vmem:[%s6260_s3 + $0x318] sm:$0xff] }
 0x2ab   :  { %2175 = vmatpush.msrb.mxu2 %v1541_v60  ;;  %2222 = vmatpush.msra.mxu1 %v1573_v7  ;;  %v1537_v59 = vld [vmem:[%s6260_s3 + $0x408] sm:$0xff] }
 0x2ac   :  { %2128 = vmatpush.msrb.mxu0 %v1509_v16  ;;  %v1569_v60 = vld [vmem:[%s6260_s3 + $0x508] sm:$0xff] }
 0x2ad   :  { %2223 = vmatpush.msra.mxu1 %v1571_v47  ;;  %v1601_v16 = vld [vmem:[%s6260_s3 + $0x608] sm:$0xff] }
 0x2ae   :  { %2129 = vmatpush.msrb.mxu0 %v1507_v48  ;;  %2271 = vmatpush.msra.mxu3 %v1601_v16 }
 0x2af   :  { %2224 = vmatpush.msra.mxu1 %v1569_v60 }
 0x2b0   :  { %2052 = vmatmul.f32.gmra.mxu1 %v4710_v31  ;;  %v1539_v31 = vld [vmem:[%s6260_s3 + $0x418] sm:$0xff]  ;;  %2130 = vmatpush.msrb.mxu0 %v1505_v54 }
 0x2b1   :  { %2096 = vmatmul.f32.gmra.mxu3 %v5080_v26  ;;  %2810 = vmatmul.msk.f32.gmra.mxu0 %vm1624_vm6, %v5549_v42 }
 0x2b2   :  { %2005 = vmatmul.f32.gmra.mxu2 %v4285_v33  ;;  %v1335_v33 = vpop.permute.xlu2 %1334 }
 0x2b3   :  { %v5567_v26 = vpop.f32.mrf.mxu3  ;;  %2176 = vmatpush.msrb.mxu2 %v1539_v31  ;;  %v5590_v25 = vsel %vm353_vm0, %v5171_v49, %v1335_v33  ;;  %v5613_v33 = vpop.f32.mrf.mxu0 }
 0x2b5   :  { %2177 = vmatpush.msrb.mxu2 %v1537_v59 }
 0x2b6   :  { %v5574_v51 = vpop.f32.mrf.mxu1 }
 0x2b8   :  { %2055 = vmatmul.f32.gmra.mxu1 %v4808_v15 }
 0x2b9   :  { %2099 = vmatmul.f32.gmra.mxu3 %v5133_v13  ;;  %2811 = vmatmul.msk.f32.gmra.mxu0 %vm1624_vm6, %v5590_v25  ;;  %v1339_v13 = vpop.permute.xlu0 %1338 }
 0x2ba   :  { %2008 = vmatmul.f32.gmra.mxu2 %v4310_v32  ;;  %v5611_v7 = vsel %vm353_vm0, %v5235_v4, %v1339_v13  ;;  %v5622_v32 = vld [vmem:[%s6261_s4] sm:$0x3]  ;;  %v1347_v52 = vpop.permute.xlu2 %1346 }
 0x2bb   :  { %v5603_v49 = vpop.f32.mrf.mxu3  ;;  %v5605_v15 = vpop.f32.mrf.mxu2  ;;  %v5630_v48 = vperm.slane %v5622_v32, 0 }
 0x2be   :  { %v5607_v31 = vpop.f32.mrf.mxu1 }
 0x2c0   :  { %2058 = vmatmul.f32.gmra.mxu1 %v4834_v8  ;;  %v1343_v8 = vpop.permute.xlu1 %1342 }
 0x2c1   :  { %2102 = vmatmul.f32.gmra.mxu3 %v5239_v45  ;;  %2812 = vmatmul.msk.f32.gmra.mxu0 %vm1624_vm6, %v5611_v7  ;;  %v1672_v45 = vadd.f32 %v5298_v9, %v5630_v48  ;;  %v5636_v60 = vsel %vm353_vm0, %v5278_v35, %v1343_v8  ;;  %v5648_v8 = vsel %vm353_vm0, %v5384_v17, %v1347_v52 }
 0x2c2   :  { %2011 = vmatmul.f32.gmra.mxu2 %v4350_v56 }
 0x2c3   :  { %v5625_v47 = vpop.f32.mrf.mxu2  ;;  %v5627_v4 = vpop.f32.mrf.mxu3  ;;  %v1719_v56 = vadd.f32 %v5382_v23, %v1672_v45  ;;  %v2385_v45 = vld [vmem:[%s6262_s5 + $0x60] sm:$0xff] }
 0x2c5   :  { %v1765_v54 = vpop.f32.mrf.mxu0 }
 0x2c6   :  { %v1859_v59 = vpop.f32.mrf.mxu1  ;;  %v1766_v16 = vadd.f32 %v1765_v54, %v1719_v56 }
 0x2c8   :  { %2061 = vmatmul.f32.gmra.mxu1 %v4927_v1 }
 0x2c9   :  { %2105 = vmatmul.f32.gmra.mxu3 %v5276_v3  ;;  %2813 = vmatmul.msk.f32.gmra.mxu0 %vm1624_vm6, %v5636_v60 }
 0x2ca   :  { %2014 = vmatmul.f32.gmra.mxu2 %v4404_v12 }
 0x2cb   :  { %v5644_v13 = vpop.f32.mrf.mxu3 }
 0x2cc   :  { %v1812_v9 = vpop.f32.mrf.mxu2 }
 0x2cd   :  { %v1813_v53 = vadd.f32 %v1812_v9, %v1766_v16  ;;  %v5659_v3 = vpop.f32.mrf.mxu0  ;;  %v2384_v16 = vld [vmem:[%s6262_s5 + $0x58] sm:$0xff] }
 0x2ce   :  { %v5651_v1 = vpop.f32.mrf.mxu1 }
 0x2cf   :  { %v1860_v35 = vadd.f32 %v1859_v59, %v1813_v53  ;;  %v6327_v53 = vld [vmem:[#allocation6_spill] sm:$0xff]  ;;  %v6328_v59 = vld [vmem:[#allocation5_spill] sm:$0xff] }
 0x2d0   :  { %2064 = vmatmul.f32.gmra.mxu1 %v4959_v2 }
 0x2d1   :  { %2108 = vmatmul.f32.gmra.mxu3 %v5323_v37  ;;  %2814 = vmatmul.msk.f32.gmra.mxu0 %vm1624_vm6, %v5648_v8 }
 0x2d2   :  { %2017 = vmatmul.f32.gmra.mxu2 %v4452_v18 }
 0x2d3   :  { %v5657_v12 = vpop.f32.mrf.mxu3 }
 0x2d4   :  { %v5661_v23 = vpop.f32.mrf.mxu2 }
 0x2d5   :  { %v5671_v18 = vpop.f32.mrf.mxu0 }
 0x2d6   :  { %v5667_v2 = vpop.f32.mrf.mxu1 }
 0x2d8   :  { %2225 = vmatmul.f32.vlgmr.msra.gmra.mxu1 %v5002_v43 }
 0x2d9   :  { %2111 = vmatmul.f32.gmra.mxu3 %v5356_v62  ;;  %2131 = vmatmul.f32.vlgmr.msrb.gmra.mxu0 %v4837_v24 }
 0x2da   :  { %2178 = vmatmul.f32.vlgmr.msrb.gmra.mxu2 %v4842_v21 }
 0x2db   :  { %v1906_v37 = vpop.f32.mrf.mxu3 }
 0x2dc   :  { %v5669_v17 = vadd.f32 %v1906_v37, %v1860_v35  ;;  %v5674_v52 = vpop.f32.mrf.mxu2  ;;  %v2383_v35 = vld [vmem:[%s6262_s5 + $0x50] sm:$0xff]  ;;  %v1687_v37 = vadd.f32 %v5475_v14, %v5630_v48  ;;  %v2381_v14 = vld [vmem:[%s6262_s5 + $0x40] sm:$0xff] }
 0x2de   :  { %v5682_v21 = vpop.f32.mrf.mxu1 }
 0x2e0   :  { %2228 = vmatmul.f32.gmra.mxu1 %v5044_v5 }
 0x2e1   :  { %2815 = vmatmul.msk.f32.vlgmr.msra.gmra.mxu3 %vm1624_vm6, %v5393_v61  ;;  %2134 = vmatmul.f32.gmra.mxu0 %v4962_v19  ;;  %v2388_v19 = vld [vmem:[%s6262_s5 + $0x78] sm:$0xff] }
 0x2e2   :  { %2181 = vmatmul.f32.gmra.mxu2 %v4965_v55  ;;  %2480 = vmatpush.msra.mxu0 %v2388_v19 }
 0x2e3   :  { %v5680_v24 = vpop.f32.mrf.mxu3 }
 0x2e4   :  { %v5694_v55 = vpop.f32.mrf.mxu2 }
 0x2e6   :  { %v5684_v43 = vpop.f32.mrf.mxu0 }
 0x2e8   :  { %2231 = vmatmul.f32.gmra.mxu1 %v5084_v38  ;;  %v2387_v38 = vld [vmem:[%s6262_s5 + $0x70] sm:$0xff] }
 0x2e9   :  { %2816 = vmatmul.msk.f32.gmra.mxu3 %vm1624_vm6, %v5431_v34  ;;  %2137 = vmatmul.f32.gmra.mxu0 %v4993_v41  ;;  %v2386_v41 = vld [vmem:[%s6262_s5 + $0x68] sm:$0xff]  ;;  %v1684_v34 = vadd.f32 %v5450_v46, %v5630_v48 }
 0x2ea   :  { %2184 = vmatmul.f32.gmra.mxu2 %v4996_v29  ;;  %2481 = vmatpush.msra.mxu0 %v2387_v38  ;;  %v6326_v29 = vld [vmem:[#allocation9_spill] sm:$0xff] }
 0x2eb   :  { %v5696_v5 = vpop.f32.mrf.mxu3  ;;  %v1731_v54 = vadd.f32 %v5529_v39, %v1684_v34  ;;  %v2382_v38 = vld [vmem:[%s6262_s5 + $0x48] sm:$0xff] }
 0x2ec   :  { %2482 = vmatpush.msra.mxu0 %v2386_v41  ;;  %v1734_v41 = vadd.f32 %v5567_v26, %v1687_v37  ;;  %v2380_v26 = vld [vmem:[%s6262_s5 + $0x38] sm:$0xff] }
 0x2ed   :  { %v1871_v61 = vpop.f32.mrf.mxu1 }
 0x2ee   :  { %v1777_v62 = vpop.f32.mrf.mxu0  ;;  %2483 = vmatpush.msra.mxu0 %v2385_v45 }
 0x2f0   :  { %2234 = vmatmul.f32.gmra.mxu1 %v6326_v29  ;;  %2484 = vmatpush.msra.mxu0 %v2384_v16  ;;  %v6329_v29 = vld [vmem:[#allocation13_spill] sm:$0xff] }
 0x2f1   :  { %2817 = vmatmul.msk.f32.gmra.mxu3 %vm1624_vm6, %v5457_v57  ;;  %2140 = vmatmul.f32.gmra.mxu0 %v6327_v53  ;;  %v1778_v57 = vadd.f32 %v1777_v62, %v1731_v54  ;;  %v6330_v62 = vld [vmem:[#allocation8_spill] sm:$0xff]  ;;  %v6331_v53 = vld [vmem:[#allocation7_spill] sm:$0xff] }
 0x2f2   :  { %2187 = vmatmul.f32.gmra.mxu2 %v6328_v59  ;;  %2485 = vmatpush.msra.mxu0 %v2383_v35  ;;  %v6332_v35 = vld [vmem:[#allocation12_spill] sm:$0xff] }
 0x2f3   :  { %v1824_v56 = vpop.f32.mrf.mxu2  ;;  %v1663_v37 = vadd.f32 %v6332_v35, %v5630_v48 }
 0x2f4   :  { %v5718_v46 = vpop.f32.mrf.mxu3  ;;  %v1825_v39 = vadd.f32 %v1824_v56, %v1778_v57  ;;  %2486 = vmatpush.msra.mxu0 %v2382_v38  ;;  %v2379_v57 = vld [vmem:[%s6262_s5 + $0x30] sm:$0xff] }
 0x2f5   :  { %v1874_v9 = vpop.f32.mrf.mxu1 }
 0x2f6   :  { %v1780_v19 = vpop.f32.mrf.mxu0  ;;  %2487 = vmatpush.msra.mxu0 %v2381_v14  ;;  %v1872_v59 = vadd.f32 %v1871_v61, %v1825_v39  ;;  %v2378_v61 = vld [vmem:[%s6262_s5 + $0x28] sm:$0xff]  ;;  %v1690_v39 = vadd.f32 %v5506_v10, %v5630_v48  ;;  %v6335_v14 = vld [vmem:[#allocation16_spill] sm:$0xff] }
 0x2f7   :  { %v1781_v34 = vadd.f32 %v1780_v19, %v1734_v41  ;;  %v6333_v41 = vld [vmem:[#allocation18_spill] sm:$0xff] }
 0x2f8   :  { %2237 = vmatmul.f32.gmra.mxu1 %v6329_v29  ;;  %2488 = vmatpush.msra.mxu0 %v2380_v26  ;;  %v1710_v29 = vadd.f32 %v6333_v41, %v1663_v37  ;;  %v1737_v10 = vadd.f32 %v5603_v49, %v1690_v39  ;;  %v2375_v39 = vld [vmem:[%s6262_s5 + $0x10] sm:$0xff] }
 0x2f9   :  { %2818 = vmatmul.msk.f32.gmra.mxu3 %vm1624_vm6, %v5488_v28  ;;  %2143 = vmatmul.f32.gmra.mxu0 %v6330_v62  ;;  %v6334_v62 = vld [vmem:[#allocation17_spill] sm:$0xff] }
 0x2fa   :  { %2190 = vmatmul.f32.gmra.mxu2 %v6331_v53  ;;  %2489 = vmatpush.msra.mxu0 %v2379_v57  ;;  %v2377_v53 = vld [vmem:[%s6262_s5 + $0x20] sm:$0xff]  ;;  %v1757_v26 = vadd.f32 %v5537_v50, %v1710_v29 }
 0x2fb   :  { %v1827_v45 = vpop.f32.mrf.mxu2 }
 0x2fc   :  { %v1828_v54 = vadd.f32 %v1827_v45, %v1781_v34  ;;  %v1918_v56 = vpop.f32.mrf.mxu3  ;;  %2490 = vmatpush.msra.mxu0 %v2378_v61  ;;  %v1666_v34 = vadd.f32 %v6335_v14, %v5630_v48  ;;  %v6337_v45 = vld [vmem:[#allocation10_spill] sm:$0xff]  ;;  %v6340_v14 = vld [vmem:[#allocation15_spill] sm:$0xff] }
 0x2fd   :  { %v5740_v28 = vadd.f32 %v1918_v56, %v1872_v59  ;;  %v1877_v16 = vpop.f32.mrf.mxu1  ;;  %v2376_v59 = vld [vmem:[%s6262_s5 + $0x18] sm:$0xff] }
 0x2fe   :  { %v1783_v19 = vpop.f32.mrf.mxu0  ;;  %v1875_v38 = vadd.f32 %v1874_v9, %v1828_v54  ;;  %v6336_v9 = vld [vmem:[#allocation11_spill] sm:$0xff]  ;;  %2491 = vmatpush.msra.mxu0 %v2377_v53  ;;  %v5791_v53 = vperm.slane %v5622_v32, 1 }
 0x2ff   :  { %v6338_v54 = vld [vmem:[#allocation23_spill] sm:$0xff]  ;;  %v1784_v57 = vadd.f32 %v1783_v19, %v1737_v10 }
 0x300   :  { %2240 = vmatmul.f32.gmra.mxu1 %v6334_v62  ;;  %v1713_v56 = vadd.f32 %v6338_v54, %v1666_v34  ;;  %2492 = vmatpush.msra.mxu0 %v2376_v59  ;;  %v2373_v34 = vld [vmem:[%s6262_s5] sm:$0xff]  ;;  %v6342_v54 = vld [vmem:[#allocation19_spill] sm:$0xff] }
 0x301   :  { %2819 = vmatmul.msk.f32.gmra.mxu3 %vm1624_vm6, %v5519_v22  ;;  %2146 = vmatmul.f32.gmra.mxu0 %v6336_v9  ;;  %v1804_v22 = vadd.f32 %v5565_v30, %v1757_v26  ;;  %v2374_v30 = vld [vmem:[%s6262_s5 + $0x8] sm:$0xff]  ;;  %v6341_v9 = vld [vmem:[#allocation14_spill] sm:$0xff] }
 0x302   :  { %2193 = vmatmul.f32.gmra.mxu2 %v6337_v45  ;;  %v1760_v37 = vadd.f32 %v5572_v27, %v1713_v56  ;;  %2493 = vmatpush.msra.mxu0 %v2375_v39  ;;  %v6339_v27 = vld [vmem:[#allocation22_spill] sm:$0xff]  ;;  %v1669_v56 = vadd.f32 %v6342_v54, %v5630_v48  ;;  %v1678_v54 = vadd.f32 %v5386_v20, %v5630_v48  ;;  %v2465_v20 = vld [vmem:[%s6262_s5 + $0x2e0] sm:$0xff] }
 0x303   :  { %v1851_v19 = vadd.f32 %v5539_v63, %v1804_v22 }
 0x304   :  { %v1921_v35 = vpop.f32.mrf.mxu3  ;;  %v1807_v62 = vadd.f32 %v5605_v15, %v1760_v37  ;;  %2494 = vmatpush.msra.mxu0 %v2374_v30  ;;  %v1716_v32 = vadd.f32 %v5336_v0, %v1669_v56 }
 0x305   :  { %v5771_v61 = vadd.f32 %v1921_v35, %v1875_v38  ;;  %v1830_v50 = vpop.f32.mrf.mxu2  ;;  %v2038_v49 = vpop.f32.mrf.mxu1  ;;  %v1898_v15 = vadd.f32 %v5627_v4, %v1851_v19  ;;  %v6343_v35 = vld [vmem:[#allocation26_spill] sm:$0xff] }
 0x306   :  { %v1831_v41 = vadd.f32 %v1830_v50, %v1784_v57  ;;  %v1944_v29 = vpop.f32.mrf.mxu0  ;;  %2495 = vmatpush.msra.mxu0 %v2373_v34  ;;  %v1854_v63 = vadd.f32 %v5574_v51, %v1807_v62  ;;  %v1763_v37 = vadd.f32 %v5613_v33, %v1716_v32  ;;  %v6345_v50 = vld [vmem:[#allocation21_spill] sm:$0xff] }
 0x308   :  { %2243 = vmatmul.f32.gmra.mxu1 %v6339_v27  ;;  %v1878_v38 = vadd.f32 %v1877_v16, %v1831_v41  ;;  %v1945_v16 = vadd.f32 %v1944_v29, %v1898_v15  ;;  %v1810_v39 = vadd.f32 %v5625_v47, %v1763_v37  ;;  %v6346_v47 = vld [vmem:[#allocation24_spill] sm:$0xff]  ;;  %v6347_v15 = vld [vmem:[#allocation25_spill] sm:$0xff] }
 0x309   :  { %2820 = vmatmul.msk.f32.gmra.mxu3 %vm1624_vm6, %v5549_v42  ;;  %2149 = vmatmul.f32.gmra.mxu0 %v6340_v14  ;;  %v1901_v42 = vadd.f32 %v5644_v13, %v1854_v63  ;;  %v6344_v13 = vld [vmem:[#allocation20_spill] sm:$0xff]  ;;  %v1675_v14 = vadd.f32 %v5341_v6, %v5630_v48 }
 0x30a   :  { %2196 = vmatmul.f32.gmra.mxu2 %v6341_v9  ;;  %3296 = vtanh.f32 %v1945_v16 }
 0x30b   :  { %v1722_v9 = vadd.f32 %v5427_v44, %v1675_v14  ;;  %v6350_v14 = vld [vmem:[#allocation29_spill] sm:$0xff] }
 0x30c   :  { %v1924_v26 = vpop.f32.mrf.mxu3 }
 0x30d   :  { %v5795_v10 = vadd.f32 %v1924_v26, %v1878_v38  ;;  %v1991_v45 = vpop.f32.mrf.mxu2  ;;  %v2041_v59 = vpop.f32.mrf.mxu1  ;;  %v1769_v16 = vadd.f32 %v5659_v3, %v1722_v9  ;;  %v2467_v3 = vld [vmem:[%s6262_s5 + $0x2f0] sm:$0xff] }
 0x30e   :  { %v1992_v4 = vadd.f32 %v1991_v45, %v5791_v53  ;;  %v1947_v22 = vpop.f32.mrf.mxu0 }
 0x30f   :  { %v1948_v57 = vadd.f32 %v1947_v22, %v1901_v42 }
 0x310   :  { %2246 = vmatmul.f32.gmra.mxu1 %v6343_v35  ;;  %v2039_v51 = vadd.f32 %v2038_v49, %v1992_v4  ;;  %v3297_v30 = vpop.eup %3296 }
 0x311   :  { %3298 = vtanh.f32 %v1948_v57  ;;  %2821 = vmatmul.msk.f32.gmra.mxu3 %vm1624_vm6, %v5590_v25  ;;  %2152 = vmatmul.f32.gmra.mxu0 %v6344_v13  ;;  %v1857_v25 = vadd.f32 %v5607_v31, %v1810_v39 }
 0x312   :  { %2199 = vmatmul.f32.gmra.mxu2 %v6345_v50 }
 0x313   :  { %v1904_v34 = vadd.f32 %v5657_v12, %v1857_v25  ;;  %v1816_v12 = vadd.f32 %v5661_v23, %v1769_v16  ;;  %v2466_v23 = vld [vmem:[%s6262_s5 + $0x2e8] sm:$0xff] }
 0x314   :  { %v2085_v41 = vpop.f32.mrf.mxu3 }
 0x315   :  { %v5808_v29 = vadd.f32 %v2085_v41, %v2039_v51  ;;  %v1994_v0 = vpop.f32.mrf.mxu2  ;;  %v2044_v62 = vpop.f32.mrf.mxu1  ;;  %v1863_v56 = vadd.f32 %v5651_v1, %v1816_v12  ;;  %v2464_v1 = vld [vmem:[%s6262_s5 + $0x2d8] sm:$0xff]  ;;  %v2463_v41 = vld [vmem:[%s6262_s5 + $0x2d0] sm:$0xff] }
 0x316   :  { %v1995_v49 = vadd.f32 %v1994_v0, %v5791_v53  ;;  %v1950_v19 = vpop.f32.mrf.mxu0  ;;  %v2462_v0 = vld [vmem:[%s6262_s5 + $0x2c8] sm:$0xff] }
 0x317   :  { %v3299_v27 = vpop.eup %3298  ;;  %v1951_v63 = vadd.f32 %v1950_v19, %v1904_v34 }
 0x318   :  { %v2323_v38 = vadd.f32 %v3299_v27, %v3297_v30  ;;  %2249 = vmatmul.f32.gmra.mxu1 %v5362_v58  ;;  %v2042_v33 = vadd.f32 %v2041_v59, %v1995_v49  ;;  %v6349_v30 = vld [vmem:[#allocation28_spill] sm:$0xff] }
 0x319   :  { %2822 = vmatmul.msk.f32.gmra.mxu3 %vm1624_vm6, %v5611_v7  ;;  %2155 = vmatmul.f32.gmra.mxu0 %v6346_v47  ;;  %v2468_v7 = vld [vmem:[%s6262_s5 + $0x2f8] sm:$0xff]  ;;  %3300 = vtanh.f32 %v1951_v63  ;;  %v1681_v49 = vadd.f32 %v6349_v30, %v5630_v48 }
 0x31a   :  { %2202 = vmatmul.f32.gmra.mxu2 %v6347_v15  ;;  %2580 = vmatpush.msrb.mxu3 %v2468_v7  ;;  %v2325_v50 = vmul.f32 0.5, %v2323_v38  ;;  %v2460_v48 = vld [vmem:[%s6262_s5 + $0x2b8] sm:$0xff] }
 0x31b   :  { %v1728_v47 = vadd.f32 %v6350_v14, %v1681_v49 }
 0x31c   :  { %v2088_v31 = vpop.f32.mrf.mxu3  ;;  %2581 = vmatpush.msrb.mxu3 %v2467_v3 }
 0x31d   :  { %v5822_v58 = vadd.f32 %v2088_v31, %v2042_v33  ;;  %v1997_v26 = vpop.f32.mrf.mxu2  ;;  %v2047_v42 = vpop.f32.mrf.mxu1  ;;  %v1775_v9 = vadd.f32 %v5684_v43, %v1728_v47  ;;  %v2458_v31 = vld [vmem:[%s6262_s5 + $0x2a8] sm:$0xff]  ;;  %v2457_v43 = vld [vmem:[%s6262_s5 + $0x2a0] sm:$0xff] }
 0x31e   :  { %v1998_v6 = vadd.f32 %v1997_v26, %v5791_v53  ;;  %v1953_v45 = vpop.f32.mrf.mxu0  ;;  %2582 = vmatpush.msrb.mxu3 %v2466_v23  ;;  %v2455_v23 = vld [vmem:[%s6262_s5 + $0x290] sm:$0xff] }
 0x31f   :  { %v1954_v59 = vadd.f32 %v1953_v45, %v5669_v17  ;;  %v6348_v17 = vld [vmem:[#allocation27_spill] sm:$0xff]  ;;  %v3301_v35 = vpop.eup %3300  ;;  %v1822_v16 = vadd.f32 %v5694_v55, %v1775_v9 }
 0x320   :  { %2252 = vmatmul.f32.gmra.mxu1 %v5397_v40  ;;  %v2045_v44 = vadd.f32 %v2044_v62, %v1998_v6  ;;  %v1725_v40 = vadd.f32 %v5460_v36, %v1678_v54  ;;  %2583 = vmatpush.msrb.mxu3 %v2465_v20 }
 0x321   :  { %3302 = vtanh.f32 %v1954_v59  ;;  %2823 = vmatmul.msk.f32.gmra.mxu3 %vm1624_vm6, %v5636_v60  ;;  %2158 = vmatmul.f32.gmra.mxu0 %v5365_v11  ;;  %v1910_v11 = vadd.f32 %v5680_v24, %v1863_v56  ;;  %v1869_v3 = vadd.f32 %v5682_v21, %v1822_v16  ;;  %v2454_v56 = vld [vmem:[%s6262_s5 + $0x288] sm:$0xff]  ;;  %v2453_v21 = vld [vmem:[%s6262_s5 + $0x280] sm:$0xff] }
 0x322   :  { %2205 = vmatmul.f32.gmra.mxu2 %v6348_v17  ;;  %v1772_v60 = vadd.f32 %v5671_v18, %v1725_v40  ;;  %2584 = vmatpush.msrb.mxu3 %v2464_v1 }
 0x323   :  { %v1916_v40 = vadd.f32 %v5718_v46, %v1869_v3 }
 0x324   :  { %v2091_v4 = vpop.f32.mrf.mxu3  ;;  %v1819_v37 = vadd.f32 %v5674_v52, %v1772_v60  ;;  %2585 = vmatpush.msrb.mxu3 %v2463_v41 }
 0x325   :  { %v5850_v22 = vadd.f32 %v2091_v4, %v2045_v44  ;;  %v2000_v57 = vpop.f32.mrf.mxu2  ;;  %v2050_v32 = vpop.f32.mrf.mxu1  ;;  %v2456_v44 = vld [vmem:[%s6262_s5 + $0x298] sm:$0xff] }
 0x326   :  { %v2001_v51 = vadd.f32 %v2000_v57, %v5791_v53  ;;  %v1956_v36 = vpop.f32.mrf.mxu0  ;;  %v1866_v52 = vadd.f32 %v5667_v2, %v1819_v37  ;;  %2586 = vmatpush.msrb.mxu3 %v2462_v0 }
 0x327   :  { %v3303_v13 = vpop.eup %3302  ;;  %v1957_v18 = vadd.f32 %v1956_v36, %v1910_v11 }
 0x328   :  { %v2048_v39 = vadd.f32 %v2047_v42, %v2001_v51  ;;  %v2327_v24 = vadd.f32 %v3303_v13, %v3301_v35  ;;  %v1913_v27 = vadd.f32 %v5696_v5, %v1866_v52  ;;  %v2459_v5 = vld [vmem:[%s6262_s5 + $0x2b0] sm:$0xff] }
 0x329   :  { %2824 = vmatmul.msk.f32.gmra.mxu3 %vm1624_vm6, %v5648_v8  ;;  %2496 = vmatmul.f32.vlgmr.msra.gmra.mxu0 %v2325_v50  ;;  %v2461_v8 = vld [vmem:[%s6262_s5 + $0x2c0] sm:$0xff]  ;;  %3304 = vtanh.f32 %v1957_v18 }
 0x32a   :  { %v2329_v62 = vmul.f32 0.5, %v2327_v24  ;;  %2587 = vmatpush.msrb.mxu3 %v2461_v8 }
 0x32c   :  { %v2094_v19 = vpop.f32.mrf.mxu3  ;;  %2345 = vrot.lane.b32.xlu0 %v2329_v62, %s3370_s12  ;;  %2588 = vmatpush.msrb.mxu3 %v2460_v48 }
 0x32d   :  { %v5873_v25 = vadd.f32 %v2094_v19, %v2048_v39  ;;  %v2003_v38 = vpop.f32.mrf.mxu2  ;;  %v2053_v33 = vpop.f32.mrf.mxu1 }
 0x32e   :  { %v2004_v2 = vadd.f32 %v2003_v38, %v5791_v53  ;;  %v1959_v34 = vpop.f32.mrf.mxu0  ;;  %2589 = vmatpush.msrb.mxu3 %v2459_v5 }
 0x32f   :  { %v1960_v15 = vadd.f32 %v1959_v34, %v1913_v27  ;;  %v3305_v7 = vpop.eup %3304 }
 0x330   :  { %v2051_v63 = vadd.f32 %v2050_v32, %v2004_v2  ;;  %2590 = vmatpush.msrb.mxu3 %v2458_v31 }
 0x331   :  { %3306 = vtanh.f32 %v1960_v15 }
 0x332   :  { %2591 = vmatpush.msrb.mxu3 %v2457_v43 }
 0x334   :  { %v2097_v26 = vpop.f32.mrf.mxu3  ;;  %2592 = vmatpush.msrb.mxu3 %v2456_v44 }
 0x335   :  { %v5891_v42 = vadd.f32 %v2097_v26, %v2051_v63  ;;  %v2006_v6 = vpop.f32.mrf.mxu2  ;;  %v2056_v45 = vpop.f32.mrf.mxu1 }
 0x336   :  { %v2007_v12 = vadd.f32 %v2006_v6, %v5791_v53  ;;  %v1962_v59 = vpop.f32.mrf.mxu0  ;;  %2593 = vmatpush.msrb.mxu3 %v2455_v23  ;;  %v2402_v23 = vld [vmem:[%s6262_s5 + $0xe8] sm:$0xff] }
 0x337   :  { %v3307_v55 = vpop.eup %3306  ;;  %v1963_v4 = vadd.f32 %v1962_v59, %v1916_v40  ;;  %v2403_v59 = vld [vmem:[%s6262_s5 + $0xf0] sm:$0xff] }
 0x338   :  { %v2054_v54 = vadd.f32 %v2053_v33, %v2007_v12  ;;  %v5901_v17 = vadd.f32 %v3307_v55, %v3305_v7  ;;  %2594 = vmatpush.msrb.mxu3 %v2454_v56 }
 0x339   :  { %3308 = vtanh.f32 %v1963_v4  ;;  %v2400_v4 = vld [vmem:[%s6262_s5 + $0xd8] sm:$0xff] }
 0x33a   :  { %2595 = vmatpush.msrb.mxu3 %v2453_v21 }
 0x33c   :  { %v2100_v20 = vpop.f32.mrf.mxu3 }
 0x33d   :  { %v5910_v60 = vadd.f32 %v2100_v20, %v2054_v54  ;;  %v2009_v11 = vpop.f32.mrf.mxu2  ;;  %v2059_v57 = vpop.f32.mrf.mxu1 }
 0x33e   :  { %v2010_v32 = vadd.f32 %v2009_v11, %v5791_v53  ;;  %v1965_v35 = vpop.f32.mrf.mxu0  ;;  %v2399_v11 = vld [vmem:[%s6262_s5 + $0xd0] sm:$0xff] }
 0x33f   :  { %v1966_v46 = vadd.f32 %v1965_v35, %v5740_v28  ;;  %v3309_v50 = vpop.eup %3308 }
 0x340   :  { %v2057_v51 = vadd.f32 %v2056_v45, %v2010_v32  ;;  %v2404_v45 = vld [vmem:[%s6262_s5 + $0xf8] sm:$0xff] }
 0x341   :  { %3310 = vtanh.f32 %v1966_v46  ;;  %2500 = vmatpush.msra.mxu2 %v2404_v45 }
 0x343   :  { %2501 = vmatpush.msra.mxu2 %v2403_v59 }
 0x344   :  { %v2103_v36 = vpop.f32.mrf.mxu3 }
 0x345   :  { %v5914_v1 = vadd.f32 %v2103_v36, %v2057_v51  ;;  %v2012_v13 = vpop.f32.mrf.mxu2  ;;  %v2062_v37 = vpop.f32.mrf.mxu1  ;;  %2502 = vmatpush.msra.mxu2 %v2402_v23  ;;  %v2398_v51 = vld [vmem:[%s6262_s5 + $0xc8] sm:$0xff]  ;;  %v2397_v36 = vld [vmem:[%s6262_s5 + $0xc0] sm:$0xff] }
 0x346   :  { %v2013_v18 = vadd.f32 %v2012_v13, %v5791_v53  ;;  %v1968_v39 = vpop.f32.mrf.mxu0  ;;  %v2396_v13 = vld [vmem:[%s6262_s5 + $0xb8] sm:$0xff] }
 0x347   :  { %v3311_v24 = vpop.eup %3310  ;;  %v1969_v52 = vadd.f32 %v1968_v39, %v5771_v61 }
 0x348   :  { %v2060_v41 = vadd.f32 %v2059_v57, %v2013_v18  ;;  %v2335_v0 = vadd.f32 %v3311_v24, %v3309_v50  ;;  %v2395_v24 = vld [vmem:[%s6262_s5 + $0xb0] sm:$0xff] }
 0x349   :  { %3312 = vtanh.f32 %v1969_v52 }
 0x34a   :  { %v2337_v62 = vmul.f32 0.5, %v2335_v0 }
 0x34c   :  { %v2106_v30 = vpop.f32.mrf.mxu3  ;;  %2363 = vrot.lane.b32.xlu2 %v2337_v62, %s3371_s13 }
 0x34d   :  { %v5919_v28 = vadd.f32 %v2106_v30, %v2060_v41  ;;  %v2015_v49 = vpop.f32.mrf.mxu2  ;;  %v2065_v19 = vpop.f32.mrf.mxu1  ;;  %v2394_v30 = vld [vmem:[%s6262_s5 + $0xa8] sm:$0xff] }
 0x34e   :  { %v2016_v8 = vadd.f32 %v2015_v49, %v5791_v53  ;;  %v1971_v27 = vpop.f32.mrf.mxu0 }
 0x34f   :  { %v1972_v38 = vadd.f32 %v1971_v27, %v5795_v10  ;;  %v3313_v34 = vpop.eup %3312 }
 0x350   :  { %v2063_v33 = vadd.f32 %v2062_v37, %v2016_v8 }
 0x351   :  { %3314 = vtanh.f32 %v1972_v38 }
 0x354   :  { %v2109_v14 = vpop.f32.mrf.mxu3 }
 0x355   :  { %v5923_v47 = vadd.f32 %v2109_v14, %v2063_v33  ;;  %v2018_v2 = vpop.f32.mrf.mxu2  ;;  %v2226_v61 = vpop.f32.mrf.mxu1 }
 0x356   :  { %v2019_v48 = vadd.f32 %v2018_v2, %v5791_v53  ;;  %v2132_v15 = vpop.f32.mrf.mxu0  ;;  %v2391_v2 = vld [vmem:[%s6262_s5 + $0x90] sm:$0xff] }
 0x357   :  { %v3315_v9 = vpop.eup %3314  ;;  %v2133_v7 = vadd.f32 %v2132_v15, %v5808_v29  ;;  %v2401_v29 = vld [vmem:[%s6262_s5 + $0xe0] sm:$0xff]  ;;  %v2390_v15 = vld [vmem:[%s6262_s5 + $0x88] sm:$0xff] }
 0x358   :  { %v2339_v63 = vadd.f32 %v3315_v9, %v3313_v34  ;;  %v2066_v5 = vadd.f32 %v2065_v19, %v2019_v48  ;;  %2503 = vmatpush.msra.mxu2 %v2401_v29  ;;  %v2393_v19 = vld [vmem:[%s6262_s5 + $0xa0] sm:$0xff] }
 0x359   :  { %v2389_v9 = vld [vmem:[%s6262_s5 + $0x80] sm:$0xff] }
 0x35a   :  { %v2341_v31 = vmul.f32 0.5, %v2339_v63  ;;  %2504 = vmatpush.msra.mxu2 %v2400_v4 }
 0x35c   :  { %v2112_v16 = vpop.f32.mrf.mxu3  ;;  %2596 = vmatmul.f32.vlgmr.msrb.gmra.mxu3 %v2341_v31  ;;  %2505 = vmatpush.msra.mxu2 %v2399_v11 }
 0x35d   :  { %v5926_v26 = vadd.f32 %v2112_v16, %v2066_v5  ;;  %v2179_v10 = vpop.f32.mrf.mxu2  ;;  %v2229_v43 = vpop.f32.mrf.mxu1 }
 0x35e   :  { %v2135_v6 = vpop.f32.mrf.mxu0  ;;  %v2180_v53 = vadd.f32 %v2179_v10, %v2133_v7  ;;  %2506 = vmatpush.msra.mxu2 %v2398_v51 }
 0x35f   :  { %v2136_v44 = vadd.f32 %v2135_v6, %v5822_v58 }
 0x360   :  { %v2227_v56 = vadd.f32 %v2226_v61, %v2180_v53  ;;  %2507 = vmatpush.msra.mxu2 %v2397_v36  ;;  %v2333_v36 = vmul.f32 0.5, %v5901_v17  ;;  %v2449_v17 = vld [vmem:[%s6262_s5 + $0x260] sm:$0xff] }
 0x362   :  { %2508 = vmatpush.msra.mxu2 %v2396_v13 }
 0x364   :  { %v2273_v12 = vpop.f32.mrf.mxu3  ;;  %2509 = vmatpush.msra.mxu2 %v2395_v24 }
 0x365   :  { %v2182_v55 = vpop.f32.mrf.mxu2  ;;  %v2232_v3 = vpop.f32.mrf.mxu1  ;;  %v2274_v58 = vadd.f32 %v2273_v12, %v2227_v56 }
 0x366   :  { %v2138_v54 = vpop.f32.mrf.mxu0  ;;  %v2183_v40 = vadd.f32 %v2182_v55, %v2136_v44  ;;  %2510 = vmatpush.msra.mxu2 %v2394_v30 }
 0x367   :  { %3316 = vtanh.f32 %v2274_v58  ;;  %v2139_v37 = vadd.f32 %v2138_v54, %v5850_v22 }
 0x368   :  { %v2230_v20 = vadd.f32 %v2229_v43, %v2183_v40  ;;  %2511 = vmatpush.msra.mxu2 %v2393_v19 }
 0x36c   :  { %v2276_v21 = vpop.f32.mrf.mxu3 }
 0x36d   :  { %v2277_v57 = vadd.f32 %v2276_v21, %v2230_v20  ;;  %v2185_v32 = vpop.f32.mrf.mxu2  ;;  %v2235_v35 = vpop.f32.mrf.mxu1 }
 0x36e   :  { %v2141_v46 = vpop.f32.mrf.mxu0  ;;  %v3317_v50 = vpop.eup %3316  ;;  %v2186_v18 = vadd.f32 %v2185_v32, %v2139_v37  ;;  %v2452_v37 = vld [vmem:[%s6262_s5 + $0x278] sm:$0xff] }
 0x36f   :  { %3318 = vtanh.f32 %v2277_v57  ;;  %v2142_v0 = vadd.f32 %v2141_v46, %v5873_v25  ;;  %v2392_v25 = vld [vmem:[%s6262_s5 + $0x98] sm:$0xff]  ;;  %2560 = vmatpush.msrb.mxu1 %v2452_v37  ;;  %v2426_v37 = vld [vmem:[%s6262_s5 + $0x1a8] sm:$0xff] }
 0x370   :  { %v2233_v8 = vadd.f32 %v2232_v3, %v2186_v18  ;;  %2512 = vmatpush.msra.mxu2 %v2392_v25  ;;  %v2450_v18 = vld [vmem:[%s6262_s5 + $0x268] sm:$0xff] }
 0x372   :  { %2513 = vmatpush.msra.mxu2 %v2391_v2 }
 0x374   :  { %v2279_v39 = vpop.f32.mrf.mxu3  ;;  %2514 = vmatpush.msra.mxu2 %v2390_v15 }
 0x375   :  { %v3319_v41 = vpop.eup %3318  ;;  %v2188_v62 = vpop.f32.mrf.mxu2  ;;  %v2280_v38 = vadd.f32 %v2279_v39, %v2233_v8 }
 0x376   :  { %v2144_v52 = vpop.f32.mrf.mxu0  ;;  %v5965_v49 = vadd.f32 %v3319_v41, %v3317_v50  ;;  %v2189_v22 = vadd.f32 %v2188_v62, %v2142_v0  ;;  %v2238_v27 = vpop.f32.mrf.mxu1  ;;  %2515 = vmatpush.msra.mxu2 %v2389_v9 }
 0x377   :  { %3320 = vtanh.f32 %v2280_v38  ;;  %v2145_v63 = vadd.f32 %v2144_v52, %v5891_v42 }
 0x378   :  { %v2236_v33 = vadd.f32 %v2235_v35, %v2189_v22  ;;  %v2326_v62 = vmul.f32 0.5, %v5965_v49 }
 0x37c   :  { %v2282_v14 = vpop.f32.mrf.mxu3 }
 0x37d   :  { %v2283_v61 = vadd.f32 %v2282_v14, %v2236_v33  ;;  %v2191_v34 = vpop.f32.mrf.mxu2  ;;  %v3321_v31 = vpop.eup %3320 }
 0x37e   :  { %v2147_v48 = vpop.f32.mrf.mxu0  ;;  %v2241_v5 = vpop.f32.mrf.mxu1  ;;  %v2192_v16 = vadd.f32 %v2191_v34, %v2145_v63 }
 0x37f   :  { %3322 = vtanh.f32 %v2283_v61  ;;  %v2148_v6 = vadd.f32 %v2147_v48, %v5910_v60 }
 0x380   :  { %v2239_v59 = vadd.f32 %v2238_v27, %v2192_v16 }
 0x384   :  { %v2285_v10 = vpop.f32.mrf.mxu3 }
 0x385   :  { %v3323_v43 = vpop.eup %3322  ;;  %v2194_v45 = vpop.f32.mrf.mxu2  ;;  %v2286_v55 = vadd.f32 %v2285_v10, %v2239_v59  ;;  %v2418_v59 = vld [vmem:[%s6262_s5 + $0x168] sm:$0xff] }
 0x386   :  { %v2150_v7 = vpop.f32.mrf.mxu0  ;;  %v2328_v53 = vadd.f32 %v3323_v43, %v3321_v31  ;;  %v2195_v12 = vadd.f32 %v2194_v45, %v2148_v6  ;;  %v2244_v54 = vpop.f32.mrf.mxu1  ;;  %v2447_v43 = vld [vmem:[%s6262_s5 + $0x250] sm:$0xff]  ;;  %v2420_v6 = vld [vmem:[%s6262_s5 + $0x178] sm:$0xff] }
 0x387   :  { %3324 = vtanh.f32 %v2286_v55  ;;  %v2151_v56 = vadd.f32 %v2150_v7, %v5914_v1  ;;  %v2451_v1 = vld [vmem:[%s6262_s5 + $0x270] sm:$0xff]  ;;  %v2436_v45 = vld [vmem:[%s6262_s5 + $0x1f8] sm:$0xff]  ;;  %v2446_v7 = vld [vmem:[%s6262_s5 + $0x248] sm:$0xff]  ;;  %2520 = vmatpush.msrb.mxu0 %v2420_v6 }
 0x388   :  { %v2330_v44 = vmul.f32 0.5, %v2328_v53  ;;  %v2242_v3 = vadd.f32 %v2241_v5, %v2195_v12  ;;  %2561 = vmatpush.msrb.mxu1 %v2451_v1  ;;  %2540 = vmatpush.msrb.mxu2 %v2436_v45  ;;  %v2419_v53 = vld [vmem:[%s6262_s5 + $0x170] sm:$0xff]  ;;  %v2445_v55 = vld [vmem:[%s6262_s5 + $0x240] sm:$0xff]  ;;  %v2628_v45 = vld [vmem:[%s6264_s7 + $0x38] sm:$0xff] }
 0x389   :  { %v2435_v12 = vld [vmem:[%s6262_s5 + $0x1f0] sm:$0xff]  ;;  %2521 = vmatpush.msrb.mxu0 %v2419_v53  ;;  %v2409_v1 = vld [vmem:[%s6262_s5 + $0x120] sm:$0xff]  ;;  %v2626_v53 = vld [vmem:[%s6264_s7 + $0x28] sm:$0xff] }
 0x38a   :  { %2347 = vrot.lane.b32.xlu0 %v2330_v44, %s3370_s12  ;;  %2562 = vmatpush.msrb.mxu1 %v2450_v18  ;;  %v2434_v44 = vld [vmem:[%s6262_s5 + $0x1e8] sm:$0xff]  ;;  %v2424_v18 = vld [vmem:[%s6262_s5 + $0x198] sm:$0xff]  ;;  %v2629_v6 = vld [vmem:[%s6264_s7 + $0x40] sm:$0xff] }
 0x38b   :  { %2541 = vmatpush.msrb.mxu2 %v2435_v12  ;;  %2522 = vmatpush.msrb.mxu0 %v2418_v59  ;;  %v2625_v12 = vld [vmem:[%s6264_s7 + $0x20] sm:$0xff]  ;;  %v2624_v59 = vld [vmem:[%s6264_s7 + $0x18] sm:$0xff] }
 0x38c   :  { %v2288_v23 = vpop.f32.mrf.mxu3  ;;  %2563 = vmatpush.msrb.mxu1 %v2449_v17  ;;  %v2406_v17 = vld [vmem:[%s6262_s5 + $0x108] sm:$0xff] }
 0x38d   :  { %v2289_v42 = vadd.f32 %v2288_v23, %v2242_v3  ;;  %v2197_v40 = vpop.f32.mrf.mxu2  ;;  %v3325_v60 = vpop.eup %3324  ;;  %v2417_v3 = vld [vmem:[%s6262_s5 + $0x160] sm:$0xff]  ;;  %v2444_v23 = vld [vmem:[%s6262_s5 + $0x238] sm:$0xff]  ;;  %2542 = vmatpush.msrb.mxu2 %v2434_v44  ;;  %v2623_v44 = vld [vmem:[%s6264_s7 + $0x10] sm:$0xff] }
 0x38e   :  { %v2153_v29 = vpop.f32.mrf.mxu0  ;;  %v2198_v4 = vadd.f32 %v2197_v40, %v2151_v56  ;;  %v2247_v57 = vpop.f32.mrf.mxu1  ;;  %v2432_v40 = vld [vmem:[%s6262_s5 + $0x1d8] sm:$0xff]  ;;  %2523 = vmatpush.msrb.mxu0 %v2417_v3  ;;  %v2415_v56 = vld [vmem:[%s6262_s5 + $0x150] sm:$0xff]  ;;  %v2621_v3 = vld [vmem:[%s6264_s7] sm:$0xff] }
 0x38f   :  { %3326 = vtanh.f32 %v2289_v42  ;;  %v2154_v21 = vadd.f32 %v2153_v29, %v5919_v28  ;;  %v2416_v42 = vld [vmem:[%s6262_s5 + $0x158] sm:$0xff]  ;;  %v2443_v29 = vld [vmem:[%s6262_s5 + $0x230] sm:$0xff] }
 0x390   :  { %v2245_v46 = vadd.f32 %v2244_v54, %v2198_v4  ;;  %v2433_v54 = vld [vmem:[%s6262_s5 + $0x1e0] sm:$0xff]  ;;  %2524 = vmatpush.msrb.mxu0 %v2416_v42  ;;  %v2414_v4 = vld [vmem:[%s6262_s5 + $0x148] sm:$0xff] }
 0x391   :  { %2543 = vmatpush.msrb.mxu2 %v2433_v54  ;;  %v2674_v54 = vld [vmem:[%s6266_s9 + $0x50] sm:$0xf]  ;;  %v2672_v42 = vld [vmem:[%s6266_s9 + $0x40] sm:$0xff] }
 0x392   :  { %2525 = vmatpush.msrb.mxu0 %v2415_v56 }
 0x393   :  { %2544 = vmatpush.msrb.mxu2 %v2432_v40 }
 0x394   :  { %v2291_v58 = vpop.f32.mrf.mxu3  ;;  %2526 = vmatpush.msrb.mxu0 %v2414_v4  ;;  %v3181_v4 = vld [vmem:[%s6263_s6] ss:$0 sm:$0xff] }
 0x395   :  { %v3327_v20 = vpop.eup %3326  ;;  %v2200_v11 = vpop.f32.mrf.mxu2  ;;  %v2292_v50 = vadd.f32 %v2291_v58, %v2245_v46  ;;  %v2430_v58 = vld [vmem:[%s6262_s5 + $0x1c8] sm:$0xff]  ;;  %v2440_v46 = vld [vmem:[%s6262_s5 + $0x218] sm:$0xff] }
 0x396   :  { %v2332_v32 = vadd.f32 %v3327_v20, %v3325_v60  ;;  %v2201_v35 = vadd.f32 %v2200_v11, %v2154_v21  ;;  %v2156_v51 = vpop.f32.mrf.mxu0  ;;  %v2250_v22 = vpop.f32.mrf.mxu1  ;;  %v2431_v60 = vld [vmem:[%s6262_s5 + $0x1d0] sm:$0xff]  ;;  %v2442_v20 = vld [vmem:[%s6262_s5 + $0x228] sm:$0xff]  ;;  %v2413_v21 = vld [vmem:[%s6262_s5 + $0x140] sm:$0xff] }
 0x397   :  { %3328 = vtanh.f32 %v2292_v50  ;;  %v2157_v19 = vadd.f32 %v2156_v51, %v5923_v47  ;;  %2545 = vmatpush.msrb.mxu2 %v2431_v60  ;;  %v2429_v11 = vld [vmem:[%s6262_s5 + $0x1c0] sm:$0xff]  ;;  %2527 = vmatpush.msrb.mxu0 %v2413_v21  ;;  %v2411_v51 = vld [vmem:[%s6262_s5 + $0x130] sm:$0xff] }
 0x398   :  { %v2334_v13 = vmul.f32 0.5, %v2332_v32  ;;  %v2248_v39 = vadd.f32 %v2247_v57, %v2201_v35  ;;  %v2441_v57 = vld [vmem:[%s6262_s5 + $0x220] sm:$0xff]  ;;  %v2412_v32 = vld [vmem:[%s6262_s5 + $0x138] sm:$0xff]  ;;  %v2670_v60 = vld [vmem:[%s6266_s9 + $0x30] sm:$0xff] }
 0x399   :  { %2546 = vmatpush.msrb.mxu2 %v2430_v58  ;;  %v2428_v35 = vld [vmem:[%s6262_s5 + $0x1b8] sm:$0xff]  ;;  %2528 = vmatpush.msrb.mxu0 %v2412_v32  ;;  %v2425_v50 = vld [vmem:[%s6262_s5 + $0x1a0] sm:$0xff]  ;;  %v2669_v58 = vld [vmem:[%s6266_s9 + $0x28] sm:$0xff] }
 0x39a   :  { %v3176_v28 = vpack.i.bf16 %v2334_v13, %v2333_v36  ;;  %v2427_v36 = vld [vmem:[%s6262_s5 + $0x1b0] sm:$0xff]  ;;  %v2410_v13 = vld [vmem:[%s6262_s5 + $0x128] sm:$0xff] }
 0x39b   :  { %2547 = vmatpush.msrb.mxu2 %v2429_v11  ;;  %2529 = vmatpush.msrb.mxu0 %v2411_v51 }
 0x39c   :  { %v2294_v24 = vpop.f32.mrf.mxu3  ;;  %3177 = vrot.lane.b32.xlu1 %v3176_v28, %s3372_s14  ;;  %v2408_v28 = vld [vmem:[%s6262_s5 + $0x118] sm:$0xff] }
 0x39d   :  { %v2295_v41 = vadd.f32 %v2294_v24, %v2248_v39  ;;  %v2203_v0 = vpop.f32.mrf.mxu2  ;;  %v3329_v27 = vpop.eup %3328  ;;  %2548 = vmatpush.msrb.mxu2 %v2428_v35  ;;  %2530 = vmatpush.msrb.mxu0 %v2410_v13  ;;  %v2407_v39 = vld [vmem:[%s6262_s5 + $0x110] sm:$0xff] }
 0x39e   :  { %v6002_v52 = vpop.permute.xlu0 %2345  ;;  %v2159_v8 = vpop.f32.mrf.mxu0  ;;  %v2204_v25 = vadd.f32 %v2203_v0, %v2157_v19  ;;  %v2423_v24 = vld [vmem:[%s6262_s5 + $0x190] sm:$0xff]  ;;  %v2438_v19 = vld [vmem:[%s6262_s5 + $0x208] sm:$0xff] }
 0x39f   :  { %3330 = vtanh.f32 %v2295_v41  ;;  %v2370_v30 = vsel %vm353_vm0, %v2326_v62, %v6002_v52  ;;  %v2160_v49 = vadd.f32 %v2159_v8, %v5926_v26  ;;  %v2253_v15 = vpop.f32.mrf.mxu1  ;;  %v2448_v26 = vld [vmem:[%s6262_s5 + $0x258] sm:$0xff]  ;;  %2549 = vmatpush.msrb.mxu2 %v2427_v36  ;;  %2531 = vmatpush.msrb.mxu0 %v2409_v1  ;;  %v2422_v41 = vld [vmem:[%s6262_s5 + $0x188] sm:$0xff]  ;;  %v2439_v0 = vld [vmem:[%s6262_s5 + $0x210] sm:$0xff] }
 0x3a0   :  { %2516 = vmatmul.f32.vlgmr.msra.gmra.mxu2 %v2370_v30  ;;  %v2251_v34 = vadd.f32 %v2250_v22, %v2204_v25  ;;  %2564 = vmatpush.msrb.mxu1 %v2448_v26  ;;  %v2405_v62 = vld [vmem:[%s6262_s5 + $0x100] sm:$0xff]  ;;  %v2472_v22 = vld [vmem:[%s6262_s5 + $0x318] sm:$0xff]  ;;  %v2471_v8 = vld [vmem:[%s6262_s5 + $0x310] sm:$0xff] }
 0x3a1   :  { %2550 = vmatpush.msrb.mxu2 %v2426_v37  ;;  %2532 = vmatpush.msrb.mxu0 %v2408_v28  ;;  %v2421_v30 = vld [vmem:[%s6262_s5 + $0x180] sm:$0xff]  ;;  %v2470_v25 = vld [vmem:[%s6262_s5 + $0x308] sm:$0xff]  ;;  %v2632_v26 = vld [vmem:[%s6264_s7 + $0x58] sm:$0xff] }
 0x3a2   :  { %2565 = vmatpush.msrb.mxu1 %v2447_v43  ;;  %v2631_v43 = vld [vmem:[%s6264_s7 + $0x50] sm:$0xff]  ;;  %v2668_v28 = vld [vmem:[%s6266_s9 + $0x20] sm:$0xff] }
 0x3a3   :  { %2551 = vmatpush.msrb.mxu2 %v2425_v50  ;;  %2533 = vmatpush.msrb.mxu0 %v2407_v39  ;;  %v2666_v39 = vld [vmem:[%s6266_s9 + $0x10] sm:$0xff] }
 0x3a4   :  { %v2297_v38 = vpop.f32.mrf.mxu3  ;;  %2566 = vmatpush.msrb.mxu1 %v2446_v7  ;;  %v2627_v7 = vld [vmem:[%s6264_s7 + $0x30] sm:$0xff] }
 0x3a5   :  { %v3331_v33 = vpop.eup %3330  ;;  %v2206_v14 = vpop.f32.mrf.mxu2  ;;  %v2298_v9 = vadd.f32 %v2297_v38, %v2251_v34  ;;  %2552 = vmatpush.msrb.mxu2 %v2424_v18  ;;  %2534 = vmatpush.msrb.mxu0 %v2406_v17  ;;  %v2469_v38 = vld [vmem:[%s6262_s5 + $0x300] sm:$0xff]  ;;  %v2667_v18 = vld [vmem:[%s6266_s9 + $0x18] sm:$0xff] }
 0x3a6   :  { %v2336_v2 = vadd.f32 %v3331_v33, %v3329_v27  ;;  %v2207_v61 = vadd.f32 %v2206_v14, %v2160_v49  ;;  %2567 = vmatpush.msrb.mxu1 %v2445_v55  ;;  %v2437_v27 = vld [vmem:[%s6262_s5 + $0x200] sm:$0xff]  ;;  %v2635_v33 = vld [vmem:[%s6264_s7 + $0x70] sm:$0xff]  ;;  %v2634_v49 = vld [vmem:[%s6264_s7 + $0x68] sm:$0xff]  ;;  %v2497_v40 = vpop.f32.mrf.mxu0 }
 0x3a7   :  { %3332 = vtanh.f32 %v2298_v9  ;;  %2553 = vmatpush.msrb.mxu2 %v2423_v24  ;;  %2535 = vmatpush.msrb.mxu0 %v2405_v62  ;;  %v2622_v55 = vld [vmem:[%s6264_s7 + $0x8] sm:$0xff]  ;;  %v2664_v17 = vld [vmem:[%s6266_s9] sm:$0xff] }
 0x3a8   :  { %v2338_v48 = vmul.f32 0.5, %v2336_v2  ;;  %v2254_v63 = vadd.f32 %v2253_v15, %v2207_v61  ;;  %2568 = vmatpush.msrb.mxu1 %v2444_v23  ;;  %v2364_v15 = vpop.permute.xlu2 %2363  ;;  %v2673_v23 = vld [vmem:[%s6266_s9 + $0x48] sm:$0xff] }
 0x3a9   :  { %2554 = vmatpush.msrb.mxu2 %v2422_v41  ;;  %2612 = vmatpush.msra.mxu0 %v2472_v22  ;;  %v2665_v24 = vld [vmem:[%s6266_s9 + $0x8] sm:$0xff]  ;;  %v3182_v41 = vld [vmem:[%s6265_s8] ss:$0 sm:$0xff]  ;;  %s3376_s8 = smov [#allocation2]  }
 0x3aa   :  { %2365 = vrot.lane.b32.xlu1 %v2338_v48, %s3371_s13  ;;  %2569 = vmatpush.msrb.mxu1 %v2443_v29  ;;  %v2671_v29 = vld [vmem:[%s6266_s9 + $0x38] sm:$0xff]  ;;  %v3183_v22 = vld [vmem:[%s6267_s10] ss:$0 sm:$0xff]  ;;  %s2738_s9 = sshll.u32 %s3376_s8, 4  ;;  %s2739_s9 = int_to_ptr.vmem [resolvable:$true] %s2738_s9 }
 0x3ab   :  { %2555 = vmatpush.msrb.mxu2 %v2421_v30  ;;  %2613 = vmatpush.msra.mxu0 %v2471_v8 }
 0x3ac   :  { %v2300_v5 = vpop.f32.mrf.mxu3  ;;  %2570 = vmatpush.msrb.mxu1 %v2442_v20  ;;  %v2498_v20 = vadd.f32 %v3181_v4, %v2497_v40 }
 0x3ad   :  { %v2301_v31 = vadd.f32 %v2300_v5, %v2254_v63  ;;  %v3333_v47 = vpop.eup %3332  ;;  %2614 = vmatpush.msra.mxu0 %v2470_v25  ;;  %2644 = vmatpush.msra.mxu2 %v2635_v33 }
 0x3ae   :  { %2571 = vmatpush.msrb.mxu1 %v2441_v57 }
 0x3af   :  { %3334 = vtanh.f32 %v2301_v31  ;;  %2615 = vmatpush.msra.mxu0 %v2469_v38  ;;  %2645 = vmatpush.msra.mxu2 %v2634_v49 }
 0x3b0   :  { %2572 = vmatpush.msrb.mxu1 %v2440_v46 }
 0x3b2   :  { %2573 = vmatpush.msrb.mxu1 %v2439_v0 }
 0x3b4   :  { %2574 = vmatpush.msrb.mxu1 %v2438_v19 }
 0x3b5   :  { %v3335_v16 = vpop.eup %3334 }
 0x3b6   :  { %v6009_v10 = vadd.f32 %v3335_v16, %v3333_v47  ;;  %2575 = vmatpush.msrb.mxu1 %v2437_v27 }
 0x3b8   :  { %v2342_v31 = vmul.f32 0.5, %v6009_v10  ;;  %v2630_v10 = vld [vmem:[%s6264_s7 + $0x48] sm:$0xff] }
 0x3df   :  { %v2597_v36 = vpop.f32.mrf.mxu3 }
 0x3fc   :  { %v2348_v14 = vpop.permute.xlu0 %2347 }
 0x3fd   :  { %v2349_v48 = vsel %vm353_vm0, %v6002_v52, %v2348_v14  ;;  %v2633_v52 = vld [vmem:[%s6264_s7 + $0x60] sm:$0xff] }
 0x3fe   :  { %2646 = vmatpush.msra.mxu2 %v2633_v52 }
 0x400   :  { %2647 = vmatpush.msra.mxu2 %v2632_v26 }
 0x402   :  { %2648 = vmatpush.msra.mxu2 %v2631_v43 }
 0x404   :  { %2649 = vmatpush.msra.mxu2 %v2630_v10 }
 0x406   :  { %2650 = vmatpush.msra.mxu2 %v2629_v6 }
 0x408   :  { %2651 = vmatpush.msra.mxu2 %v2628_v45 }
 0x40a   :  { %2652 = vmatpush.msra.mxu2 %v2627_v7 }
 0x40c   :  { %2653 = vmatpush.msra.mxu2 %v2626_v53 }
 0x40e   :  { %v3178_v2 = vpop.permute.xlu1 %3177  ;;  %2654 = vmatpush.msra.mxu2 %v2625_v12 }
 0x40f   :  { %v3180_v61 = vunpack.i.h.bf16 %v3178_v2  ;;  %v3179_v34 = vunpack.i.l.bf16 %v3178_v2 }
 0x410   :  { %2655 = vmatpush.msra.mxu2 %v2624_v59 }
 0x411   :  { %v2358_v9 = vsel %vm382_vm1, %v3179_v34, %v3180_v61  ;;  %v2371_v63 = vsel %vm382_vm1, %v2349_v48, %v3179_v34 }
 0x412   :  { %2536 = vmatmul.f32.vlgmr.msrb.gmra.mxu0 %v2371_v63  ;;  %v2372_v5 = vsel %vm411_vm2, %v2358_v9, %v2364_v15  ;;  %2656 = vmatpush.msra.mxu2 %v2623_v44 }
 0x413   :  { %2556 = vmatmul.f32.vlgmr.msrb.gmra.mxu2 %v2372_v5  ;;  %2827 = vmatpush.msk.msrb.mxu0 %vm2683_vm7, %v2674_v54 }
 0x414   :  { %2657 = vmatpush.msra.mxu2 %v2622_v55 }
 0x415   :  { %2693 = vmatpush.msrb.mxu0 %v2673_v23 }
 0x416   :  { %2658 = vmatpush.msra.mxu2 %v2621_v3 }
 0x417   :  { %2694 = vmatpush.msrb.mxu0 %v2672_v42 }
 0x419   :  { %2695 = vmatpush.msrb.mxu0 %v2671_v29 }
 0x41a   :  { %2825 = vmatmul.msk.f32.vlgmr.msra.gmra.mxu0 %vm353_vm0, %v2342_v31 }
 0x41b   :  { %2696 = vmatpush.msrb.mxu0 %v2670_v60 }
 0x41c   :  { %v2366_v47 = vpop.permute.xlu1 %2365 }
 0x41d   :  { %v2367_v16 = vsel %vm411_vm2, %v2364_v15, %v2366_v47  ;;  %2697 = vmatpush.msrb.mxu0 %v2669_v58 }
 0x41e   :  { %2576 = vmatmul.f32.vlgmr.msrb.gmra.mxu1 %v2367_v16 }
 0x41f   :  { %2698 = vmatpush.msrb.mxu0 %v2668_v28 }
 0x421   :  { %2699 = vmatpush.msrb.mxu0 %v2667_v18 }
 0x423   :  { %v2517_v56 = vpop.f32.mrf.mxu2  ;;  %2700 = vmatpush.msrb.mxu0 %v2666_v39 }
 0x424   :  { %v2518_v11 = vadd.f32 %v2517_v56, %v2498_v20 }
 0x425   :  { %2701 = vmatpush.msrb.mxu0 %v2665_v24 }
 0x427   :  { %2702 = vmatpush.msrb.mxu0 %v2664_v17 }
 0x48f   :  { %v2537_v21 = vpop.f32.mrf.mxu0 }
 0x490   :  { %v2538_v32 = vadd.f32 %v2537_v21, %v2518_v11 }
 0x496   :  { %v2557_v57 = vpop.f32.mrf.mxu2 }
 0x497   :  { %v2558_v35 = vadd.f32 %v2557_v57, %v2538_v32  ;;  %v2617_v37 = vpop.f32.mrf.mxu0 }
 0x49b   :  { %v2577_v46 = vpop.f32.mrf.mxu1 }
 0x49c   :  { %v2578_v51 = vadd.f32 %v2577_v46, %v2558_v35 }
 0x49e   :  { %v2598_v13 = vadd.f32 %v2597_v36, %v2578_v51 }
 0x4a0   :  { %v2618_v1 = vadd.f32 %v2617_v37, %v2598_v13 }
 0x4a2   :  { %3336 = vtanh.f32 %v2618_v1 }
 0x4a8   :  { %v3337_v50 = vpop.eup %3336 }
 0x4a9   :  { %2826 = vmatmul.msk.f32.vlgmr.msra.gmra.mxu2 %vm1265_vm5, %v3337_v50 }
 0x52c   :  { %v2660_v0 = vpop.f32.mrf.mxu2 }
 0x52d   :  { %v2661_v62 = vadd.f32 %v3182_v41, %v2660_v0 }
 0x52f   :  { %3338 = vtanh.f32 %v2661_v62 }
 0x535   :  { %v3339_v30 = vpop.eup %3338 }
 0x536   :  { %2828 = vmatmul.msk.f32.vlgmr.msrb.gmra.mxu0 %vm2679_vm8, %v3339_v30 }
 0x5b3   :  { %v2704_v19 = vpop.f32.mrf.mxu0 }
 0x5b4   :  { %v2705_v8 = vadd.f32 %v3183_v22, %v2704_v19 }
 0x5b6   :  { %v2708_v27 = vsel %vm2707_vm9, %v2705_v8, -inf }
 0x5b7   :  { %2709 = vmax.xlane.f32.xlu2 %v2708_v27 }
 0x62a   :  { %v2710_v25 = vpop.xlane.xlu2 %2709 }
 0x62b   :  { %v2711_v38 = vsub.f32 %v2705_v8, %v2710_v25 }
 0x62d   :  { %v2712_v33 = vmul.f32 1.442695, %v2711_v38 }
 0x62f   :  { %3340 = vpow2.f32 %v2712_v33 }
 0x635   :  { %v3341_v49 = vpop.eup %3340 }
 0x636   :  { %v2714_v14 = vsel %vm2707_vm9, %v3341_v49, 0.0 }
 0x637   :  { %2715 = vadd.xlane.f32.xlu0 %v2714_v14 }
 0x6aa   :  { %v2716_v2 = vpop.xlane.xlu0 %2715 }
 0x6ab   :  { %3342 = vrcp.f32 %v2716_v2  ;;  %v2728_v15 = vand.u32 2147483648, %v2716_v2  ;;  %v2726_v63 = vand.u32 2147483647, %v2716_v2  ;;  %vm2722_vm11 = vweird.f32 %v2716_v2 }
 0x6ad   :  { %v2729_v31 = vor.u32 1.1754944e-38, %v2728_v15  ;;  %vm2727_vm13 = vcmp.eq.f32.partialorder %v2726_v63, 8.507059e+37 }
 0x6b1   :  { %v3343_v61 = vpop.eup %3342 }
 0x6b2   :  { %v2718_v34 = vmul.f32 %v3343_v61, %v2716_v2  ;;  %vm2723_vm10 = vweird.f32 %v3343_v61 }
 0x6b3   :  { %vm2724_vm12 = vmor %vm2722_vm11, %vm2723_vm10 }
 0x6b4   :  { %v2719_v48 = vsub.f32 1.0, %v2718_v34 }
 0x6b6   :  { %v2720_v9 = vmul.f32 %v3343_v61, %v2719_v48 }
 0x6b8   :  { %v2721_v5 = vadd.f32 %v3343_v61, %v2720_v9 }
 0x6ba   :  { %v2725_v47 = vsel %vm2724_vm12, %v3343_v61, %v2721_v5 }
 0x6bb   :  { %v2730_v16 = vsel %vm2727_vm13, %v2729_v31, %v2725_v47 }
 0x6bc   :  { %v2731_v52 = vmul.f32 %v3341_v49, %v2730_v16 }
 0x6be   :  { %2732 = vst.msk [vmem:[#allocation2] sm:$0xff] %vm2707_vm9, %v2731_v52 }
 0x6bf   :  { %2743 = dma.vmem_to_hbm [thread:$0]  %s2739_s9, 128, %s2741_s0, [#allocation3]  }
 0x6c0   :  { %3368 = dma.done.wait [#allocation3], 128  }
 0x6c1   :  { %3369 = vsyncadd [#allocation3], 4294967168 }
 0x6c2   :  { %2748 = vsyncpa [#allocation3], 1 }

</bundles_post_ra>
